<compile_context>
chip_gen: v6e
topology: v6e:2x2x1
jax: 0.10.0
libtpu: 0.0.40
codegen_flags: <defaults>
</compile_context>

<pallas_src>
import jax
import jax.numpy as jnp
from jax.experimental import pallas as pl
from jax.experimental.pallas import tpu as pltpu

# ---- scaled-down config, consistent with DenseGRU / CRNNTransform structure ----
NUM_PC = 2
IN_CHANNELS = NUM_PC * 2                      # densenet input channels
BLOCK_DEPTHS = [2, 2, 2]
GROWTH_RATES = [4, 2, 2]
F_DENSE = IN_CHANNELS + sum(d * g for d, g in zip(BLOCK_DEPTHS, GROWTH_RATES))  # 20
GRU_HIDDEN = 32                               # gru_hidden_size
EMBED = 16                                    # embedding_size
BATCH = 2
SEQ = 8
EPS = 1e-5                                    # nn.LayerNorm default
NEG_SLOPE = 0.01                              # nn.LeakyReLU default


# ------------------------------ fused forward kernel ------------------------------
def _fused_crnn_kernel(
        x_ref,                                               # (T*B, F) time-major rows, f32
        w1f_ref, w1b_ref, whh1_ref, gib1_ref, bhn1_ref,      # bi-GRU layer 0 (gate-major)
        w2a_ref, w2b_ref, whh2_ref, gib2_ref, bhn2_ref,      # bi-GRU layer 1 (gate-major)
        g0_ref, b0_ref, fc1w_ref, fc1b_ref, g1_ref, b1_ref,  # gru_ln, fc1, fc1_ln
        fc2w_ref, fc2b_ref, g2_ref, b2_ref, g3_ref, b3_ref,  # fc2, fc2_ln, final LN
        out_ref,                                             # (B, T*EMBED) lane-dense out
        gi1_ref, gi2_ref, a1_ref, a1r_ref, h2_ref, hd_ref):  # VMEM scratch
    B = out_ref.shape[0]
    E = g3_ref.shape[1]
    T = out_ref.shape[1] // E
    H2 = whh1_ref.shape[0]                    # 2H (both directions side by side)
    H = H2 // 2

    def recurrence(gi_ref, whh_ref, bhn_ref, store_step):
        """Both directions of one GRU layer in a single fully-unrolled loop.

        gi_ref rows are step-aligned gate-major: at step k the [*_f] columns were
        computed from the input at time k and the [*_b] columns from time T-1-k, so a
        single contiguous 2-row VMEM load per step feeds both directions, every gate
        slice lands on a 0 / 2H / 4H column boundary, and no per-step concatenate of
        h_f | h_b is needed.
        """
        whh = whh_ref[...]                    # (2H, 6H) bf16, block-structured
        bhn = bhn_ref[...]                    # (1, 2H)  = [b_hh_n(fwd) | b_hh_n(bwd)]
        h_cat = jnp.zeros((B, H2), jnp.float32)      # [h_fwd | h_bwd] carried in vregs
        for k in range(T):                    # fully unrolled (T static)
            gi = gi_ref[pl.ds(k * B, B), :]   # (B, 6H) VMEM load (off the XLU)
            gh = jnp.dot(h_cat.astype(jnp.bfloat16), whh,
                         preferred_element_type=jnp.float32)         # (B, 6H)
            r = jax.nn.sigmoid(gi[:, 0:H2] + gh[:, 0:H2])
            z = jax.nn.sigmoid(gi[:, H2:2 * H2] + gh[:, H2:2 * H2])
            n = jnp.tanh(gi[:, 2 * H2:3 * H2] + r * (gh[:, 2 * H2:3 * H2] + bhn))
            h_cat = (1.0 - z) * n + z * h_cat
            store_step(k, h_cat)

    # ---------------- bi-GRU layer 0 ----------------
    # Batched input projection for ALL steps, both directions, hoisted out of the
    # recurrence:  gi1 = x @ W1f + rev_time(x) @ W1b + (b_ih [+ b_hh for r/z]).
    x = x_ref[...].astype(jnp.bfloat16)
    x_rev = jnp.concatenate(
        [x_ref[pl.ds((T - 1 - t) * B, B), :] for t in range(T)],
        axis=0).astype(jnp.bfloat16)          # time-reversed rows (one-time)
    gi1_ref[...] = (
        jnp.dot(x, w1f_ref[...], preferred_element_type=jnp.float32)
        + jnp.dot(x_rev, w1b_ref[...], preferred_element_type=jnp.float32)
        + gib1_ref[...])

    def store_l0(k, h_cat):
        # Step-ordered buffer (row-block k = [h_f(k) | h_b(T-1-k)]) plus its time
        # reverse, written directly from the loop so layer 1 needs no post-shuffle.
        a1_ref[k * B:(k + 1) * B, :] = h_cat
        a1r_ref[(T - 1 - k) * B:(T - k) * B, :] = h_cat

    recurrence(gi1_ref, whh1_ref, bhn1_ref, store_l0)

    # ---------------- bi-GRU layer 1 ----------------
    # W2a / W2b are pre-blocked so that (A @ W2a + A_rev @ W2b) equals the gate-major,
    # step-aligned input projection of the time-aligned layer-0 output h1 -- h1 itself
    # is never materialised.  (GRU inter-layer dropout is identity at inference.)
    a1 = a1_ref[...].astype(jnp.bfloat16)
    a1r = a1r_ref[...].astype(jnp.bfloat16)
    gi2_ref[...] = (
        jnp.dot(a1, w2a_ref[...], preferred_element_type=jnp.float32)
        + jnp.dot(a1r, w2b_ref[...], preferred_element_type=jnp.float32)
        + gib2_ref[...])

    def store_l1(k, h_cat):
        # The head consumes the final GRU output time-aligned -> scatter directly.
        h2_ref[k * B:(k + 1) * B, 0:H] = h_cat[:, 0:H]
        h2_ref[(T - 1 - k) * B:(T - k) * B, H:H2] = h_cat[:, H:H2]

    recurrence(gi2_ref, whh2_ref, bhn2_ref, store_l1)

    # ---------------- fused head: gru_ln -> lrelu -> fc1 -> fc1_ln -> lrelu -> fc2
    #                  -> fc2_ln -> lrelu -> final LayerNorm (dropout = identity) ----
    def ln(v, g_ref, b_ref):
        mu = jnp.mean(v, axis=-1, keepdims=True)
        var = jnp.mean(jnp.square(v - mu), axis=-1, keepdims=True)
        return (v - mu) * jax.lax.rsqrt(var + EPS) * g_ref[...] + b_ref[...]

    def lrelu(v):
        return jnp.where(v >= 0, v, NEG_SLOPE * v)

    h = lrelu(ln(h2_ref[...], g0_ref, b0_ref))            # gru_ln
    h = jnp.dot(h.astype(jnp.bfloat16), fc1w_ref[...],
                preferred_element_type=jnp.float32) + fc1b_ref[...]
    h = lrelu(ln(h, g1_ref, b1_ref))                      # fc1_ln
    h = jnp.dot(h.astype(jnp.bfloat16), fc2w_ref[...],
                preferred_element_type=jnp.float32) + fc2b_ref[...]
    h = lrelu(ln(h, g2_ref, b2_ref))                      # fc2_ln
    hd_ref[...] = ln(h, g3_ref, b3_ref)                   # CRNNTransform.layernorm

    # ---------------- lane-dense (B, T*E) output ----------------
    # Stage the head result once, then T slice-load/stores build each 128-lane output
    # row (vld/vst slots -- no XLU concat ladder as in the previous version).
    for t in range(T):
        out_ref[:, t * E:(t + 1) * E] = hd_ref[t * B:(t + 1) * B, :]


# ------------------------------------ forward --------------------------------------
def forward_pallas(note_embedding_bft, packed):
    """note_embedding_bft: (B, F_DENSE, T) post-densenet feature map (NCW)."""
    B, Fd, T = note_embedding_bft.shape
    # DenseGRU does densenet(x).transpose(1, 2); lay it out time-major so the batched
    # gi projection is a single (T*B, F) matmul inside the kernel.
    x_flat = jnp.transpose(note_embedding_bft, (2, 0, 1)).reshape(T * B, Fd)

    out2d = pl.pallas_call(
        _fused_crnn_kernel,
        out_shape=jax.ShapeDtypeStruct((B, T * EMBED), jnp.float32),
        scratch_shapes=[
            pltpu.VMEM((T * B, 6 * GRU_HIDDEN), jnp.float32),   # gi, layer 0
            pltpu.VMEM((T * B, 6 * GRU_HIDDEN), jnp.float32),   # gi, layer 1
            pltpu.VMEM((T * B, 2 * GRU_HIDDEN), jnp.float32),   # layer-0 out, step order
            pltpu.VMEM((T * B, 2 * GRU_HIDDEN), jnp.float32),   # layer-0 out, reversed
            pltpu.VMEM((T * B, 2 * GRU_HIDDEN), jnp.float32),   # layer-1 out, time-aligned
            pltpu.VMEM((T * B, EMBED), jnp.float32),            # head output staging
        ],
        compiler_params=pltpu.CompilerParams(vmem_limit_bytes=2 * 1024 * 1024),
    )(x_flat, *packed)
    return out2d.reshape(B, T, EMBED)                     # free minor-dim split


# ------------------------------ parameter construction ------------------------------
def init_params(key):
    ks = iter(jax.random.split(key, 64))

    def unif(shape, scale):
        return jax.random.uniform(next(ks), shape, jnp.float32, -scale, scale)

    H = GRU_HIDDEN
    s_gru = 1.0 / (H ** 0.5)

    def gru_dir(in_dim):
        return dict(
            wihT=unif((in_dim, 3 * H), s_gru),
            whhT=unif((H, 3 * H), s_gru),
            bih=unif((1, 3 * H), s_gru),
            bhh=unif((1, 3 * H), s_gru),
        )

    P = {
        "l0_f": gru_dir(F_DENSE), "l0_b": gru_dir(F_DENSE),
        "l1_f": gru_dir(2 * H),   "l1_b": gru_dir(2 * H),
        # LayerNorms: PyTorch default init (gamma=1, beta=0)
        "gru_ln_g": jnp.ones((1, 2 * H), jnp.float32),
        "gru_ln_b": jnp.zeros((1, 2 * H), jnp.float32),
        "fc1_wT": unif((2 * H, H), 1.0 / ((2 * H) ** 0.5)),
        "fc1_b": unif((1, H), 1.0 / ((2 * H) ** 0.5)),
        "fc1_ln_g": jnp.ones((1, H), jnp.float32),
        "fc1_ln_b": jnp.zeros((1, H), jnp.float32),
        "fc2_wT": unif((H, EMBED), 1.0 / (H ** 0.5)),
        "fc2_b": unif((1, EMBED), 1.0 / (H ** 0.5)),
        "fc2_ln_g": jnp.ones((1, EMBED), jnp.float32),
        "fc2_ln_b": jnp.zeros((1, EMBED), jnp.float32),
        "out_ln_g": jnp.ones((1, EMBED), jnp.float32),    # CRNNTransform.layernorm
        "out_ln_b": jnp.zeros((1, EMBED), jnp.float32),
    }
    return P


def pack_params(P):
    """One-time repack (outside the hot path):
       * gate-major columns [r_f r_b | z_f z_b | n_f n_b] (r|z in lanes 0..127, n at the
         128-lane boundary),
       * block-structured recurrent weight so ONE matmul per step serves both directions,
       * layer-1 input weights re-blocked (W2a / W2b) against the step-ordered layer-0
         buffer and its time-reverse,
       * r/z biases pre-folded (b_ih + b_hh); n keeps b_hh inside the tanh (times r),
       * all matmul weights stored in bf16 (f32 accumulation inside the kernel)."""
    H = GRU_HIDDEN
    G = 6 * H
    bf = jnp.bfloat16

    def scatter_cols(w3, fwd):
        # w3: (rows, 3H) single-direction weights, columns [r | z | n].
        off = 0 if fwd else H
        out = jnp.zeros((w3.shape[0], G), jnp.float32)
        out = out.at[:, off:off + H].set(w3[:, 0:H])                        # r
        out = out.at[:, 2 * H + off:2 * H + off + H].set(w3[:, H:2 * H])    # z
        out = out.at[:, 4 * H + off:4 * H + off + H].set(w3[:, 2 * H:])     # n
        return out

    def biases(pf, pb):
        def fold(p):
            bih, bhh = p["bih"][0], p["bhh"][0]
            return (bih[0:H] + bhh[0:H], bih[H:2 * H] + bhh[H:2 * H], bih[2 * H:])
        rf, zf, nf = fold(pf)
        rb, zb, nb = fold(pb)
        gib = jnp.concatenate([rf, rb, zf, zb, nf, nb])[None, :]            # (1, 6H)
        bhn = jnp.concatenate([pf["bhh"][0, 2 * H:], pb["bhh"][0, 2 * H:]])[None, :]
        return gib, bhn

    def whh_block(pf, pb):
        return jnp.concatenate([scatter_cols(pf["whhT"], True),
                                scatter_cols(pb["whhT"], False)], axis=0)   # (2H, 6H)

    # layer 0:  gi = x @ W1f + rev_time(x) @ W1b + gib1
    w1f = scatter_cols(P["l0_f"]["wihT"], True).astype(bf)
    w1b = scatter_cols(P["l0_b"]["wihT"], False).astype(bf)
    whh1 = whh_block(P["l0_f"], P["l0_b"]).astype(bf)
    gib1, bhn1 = biases(P["l0_f"], P["l0_b"])

    # layer 1:  gi = A @ W2a + rev_time(A) @ W2b + gib2, where A row-block k is
    # [h1_fwd(k) | h1_bwd(T-1-k)] (the step-ordered layer-0 output buffer).
    w2f = scatter_cols(P["l1_f"]["wihT"], True)       # fwd gate columns
    w2b = scatter_cols(P["l1_b"]["wihT"], False)      # bwd gate columns
    w2a = jnp.concatenate([w2f[0:H, :], w2b[H:2 * H, :]], axis=0).astype(bf)
    w2r = jnp.concatenate([w2b[0:H, :], w2f[H:2 * H, :]], axis=0).astype(bf)
    whh2 = whh_block(P["l1_f"], P["l1_b"]).astype(bf)
    gib2, bhn2 = biases(P["l1_f"], P["l1_b"])

    head = (P["gru_ln_g"], P["gru_ln_b"],
            P["fc1_wT"].astype(bf), P["fc1_b"], P["fc1_ln_g"], P["fc1_ln_b"],
            P["fc2_wT"].astype(bf), P["fc2_b"], P["fc2_ln_g"], P["fc2_ln_b"],
            P["out_ln_g"], P["out_ln_b"])
    return (w1f, w1b, whh1, gib1, bhn1,
            w2a, w2r, whh2, gib2, bhn2) + head


# -------------------------------- pure-JAX reference --------------------------------
def ref_forward(note_embedding_bft, P, mm_dtype=None):
    """Pure-JAX reference.  mm_dtype=None: f32 / HIGHEST precision.
    mm_dtype=bfloat16: matmul operands cast exactly like the kernel (tight
    implementation-equivalence check)."""
    if mm_dtype is None:
        def mm(a, b):
            return jnp.dot(a, b, precision=jax.lax.Precision.HIGHEST)
    else:
        def mm(a, b):
            return jnp.dot(a.astype(mm_dtype), b.astype(mm_dtype),
                           preferred_element_type=jnp.float32)

    x = jnp.transpose(note_embedding_bft, (0, 2, 1))

    def gru_dir(x_btf, p):
        H = p["whhT"].shape[0]

        def step(h, x_t):
            gi = mm(x_t, p["wihT"]) + p["bih"]
            gh = mm(h, p["whhT"]) + p["bhh"]
            r = jax.nn.sigmoid(gi[:, :H] + gh[:, :H])
            z = jax.nn.sigmoid(gi[:, H:2 * H] + gh[:, H:2 * H])
            n = jnp.tanh(gi[:, 2 * H:] + r * gh[:, 2 * H:])
            h_new = (1.0 - z) * n + z * h
            return h_new, h_new

        h0 = jnp.zeros((x_btf.shape[0], H), jnp.float32)
        _, ys = jax.lax.scan(step, h0, jnp.transpose(x_btf, (1, 0, 2)))
        return jnp.transpose(ys, (1, 0, 2))

    def bi(x_btf, pf, pb):
        f = gru_dir(x_btf, pf)
        b = jnp.flip(gru_dir(jnp.flip(x_btf, axis=1), pb), axis=1)
        return jnp.concatenate([f, b], axis=-1)

    def ln(v, g, b):
        mu = jnp.mean(v, axis=-1, keepdims=True)
        var = jnp.mean(jnp.square(v - mu), axis=-1, keepdims=True)
        return (v - mu) * jax.lax.rsqrt(var + EPS) * g + b

    def lrelu(v):
        return jnp.where(v >= 0, v, NEG_SLOPE * v)

    h = bi(x, P["l0_f"], P["l0_b"])
    h = bi(h, P["l1_f"], P["l1_b"])
    h = lrelu(ln(h, P["gru_ln_g"], P["gru_ln_b"]))
    h = mm(h, P["fc1_wT"]) + P["fc1_b"]
    h = lrelu(ln(h, P["fc1_ln_g"], P["fc1_ln_b"]))
    h = mm(h, P["fc2_wT"]) + P["fc2_b"]
    h = lrelu(ln(h, P["fc2_ln_g"], P["fc2_ln_b"]))
    return ln(h, P["out_ln_g"], P["out_ln_b"])


if __name__ == "__main__":
    key = jax.random.PRNGKey(0)
    k_x, k_p = jax.random.split(key)
    # note_embedding: post-densenet feature map, channel-first (B, F_DENSE, T)
    note_embedding = jax.random.normal(k_x, (BATCH, F_DENSE, SEQ), dtype=jnp.float32)
    params = init_params(k_p)
    packed = pack_params(params)            # one-time repack (outside the hot path)

    fwd = jax.jit(forward_pallas)
    out = jax.block_until_ready(fwd(note_embedding, packed))
    assert out.shape == (BATCH, SEQ, EMBED), out.shape
    assert bool(jnp.all(jnp.isfinite(out)))

    # Tight implementation-equivalence check at matched matmul precision
    # (bf16 operands, f32 accumulation) -- differences are accumulation-order only.
    ref_matched = ref_forward(note_embedding, params, mm_dtype=jnp.bfloat16)
    err_matched = float(jnp.max(jnp.abs(out - ref_matched)))
    assert err_matched < 1e-2, f"mismatch vs matched-precision reference: {err_matched}"

    # Precision drift vs the f32/HIGHEST reference.  Tolerance widened vs 5e-2 because
    # the kernel now feeds bf16 operands to the MXU (perf review item 2).
    ref_hi = ref_forward(note_embedding, params)
    err_hi = float(jnp.max(jnp.abs(out - ref_hi)))
    assert err_hi < 1e-1, f"mismatch vs f32 reference: {err_hi}"

    print("KERNEL_OK")
</pallas_src>

<mosaic_0001>
module attributes {stable_mosaic.version = 11 : i64} {
  func.func @_fused_crnn_kernel(%arg0: memref<16x20xf32, #tpu.memory_space<vmem>>, %arg1: memref<20x192xbf16, #tpu.memory_space<vmem>>, %arg2: memref<20x192xbf16, #tpu.memory_space<vmem>>, %arg3: memref<64x192xbf16, #tpu.memory_space<vmem>>, %arg4: memref<1x192xf32, #tpu.memory_space<vmem>>, %arg5: memref<1x64xf32, #tpu.memory_space<vmem>>, %arg6: memref<64x192xbf16, #tpu.memory_space<vmem>>, %arg7: memref<64x192xbf16, #tpu.memory_space<vmem>>, %arg8: memref<64x192xbf16, #tpu.memory_space<vmem>>, %arg9: memref<1x192xf32, #tpu.memory_space<vmem>>, %arg10: memref<1x64xf32, #tpu.memory_space<vmem>>, %arg11: memref<1x64xf32, #tpu.memory_space<vmem>>, %arg12: memref<1x64xf32, #tpu.memory_space<vmem>>, %arg13: memref<64x32xbf16, #tpu.memory_space<vmem>>, %arg14: memref<1x32xf32, #tpu.memory_space<vmem>>, %arg15: memref<1x32xf32, #tpu.memory_space<vmem>>, %arg16: memref<1x32xf32, #tpu.memory_space<vmem>>, %arg17: memref<32x16xbf16, #tpu.memory_space<vmem>>, %arg18: memref<1x16xf32, #tpu.memory_space<vmem>>, %arg19: memref<1x16xf32, #tpu.memory_space<vmem>>, %arg20: memref<1x16xf32, #tpu.memory_space<vmem>>, %arg21: memref<1x16xf32, #tpu.memory_space<vmem>>, %arg22: memref<1x16xf32, #tpu.memory_space<vmem>>, %arg23: memref<2x128xf32, #tpu.memory_space<vmem>>, %arg24: memref<16x192xf32, #tpu.memory_space<vmem>>, %arg25: memref<16x192xf32, #tpu.memory_space<vmem>>, %arg26: memref<16x64xf32, #tpu.memory_space<vmem>>, %arg27: memref<16x64xf32, #tpu.memory_space<vmem>>, %arg28: memref<16x64xf32, #tpu.memory_space<vmem>>, %arg29: memref<16x16xf32, #tpu.memory_space<vmem>>) attributes {dimension_semantics = [], scalar_prefetch = 0 : i64, scratch_operands = 6 : i64, tpu.core_type = #tpu.core_type<tc>} {
    %c0 = arith.constant 0 : index
    %c0_0 = arith.constant 0 : index
    %0 = vector.load %arg0[%c0, %c0_0] : memref<16x20xf32, #tpu.memory_space<vmem>>, vector<16x20xf32>
    %1 = arith.truncf %0 : vector<16x20xf32> to vector<16x20xbf16>
    %c14 = arith.constant 14 : index
    %c0_1 = arith.constant 0 : index
    %2 = vector.load %arg0[%c14, %c0_1] : memref<16x20xf32, #tpu.memory_space<vmem>>, vector<2x20xf32>
    %c12 = arith.constant 12 : index
    %c0_2 = arith.constant 0 : index
    %3 = vector.load %arg0[%c12, %c0_2] : memref<16x20xf32, #tpu.memory_space<vmem>>, vector<2x20xf32>
    %c10 = arith.constant 10 : index
    %c0_3 = arith.constant 0 : index
    %4 = vector.load %arg0[%c10, %c0_3] : memref<16x20xf32, #tpu.memory_space<vmem>>, vector<2x20xf32>
    %c8 = arith.constant 8 : index
    %c0_4 = arith.constant 0 : index
    %5 = vector.load %arg0[%c8, %c0_4] : memref<16x20xf32, #tpu.memory_space<vmem>>, vector<2x20xf32>
    %c6 = arith.constant 6 : index
    %c0_5 = arith.constant 0 : index
    %6 = vector.load %arg0[%c6, %c0_5] : memref<16x20xf32, #tpu.memory_space<vmem>>, vector<2x20xf32>
    %c4 = arith.constant 4 : index
    %c0_6 = arith.constant 0 : index
    %7 = vector.load %arg0[%c4, %c0_6] : memref<16x20xf32, #tpu.memory_space<vmem>>, vector<2x20xf32>
    %c2 = arith.constant 2 : index
    %c0_7 = arith.constant 0 : index
    %8 = vector.load %arg0[%c2, %c0_7] : memref<16x20xf32, #tpu.memory_space<vmem>>, vector<2x20xf32>
    %c0_8 = arith.constant 0 : index
    %c0_9 = arith.constant 0 : index
    %9 = vector.load %arg0[%c0_8, %c0_9] : memref<16x20xf32, #tpu.memory_space<vmem>>, vector<2x20xf32>
    %10 = tpu.concatenate %2, %3, %4, %5, %6, %7, %8, %9 in 0 : vector<2x20xf32>, vector<2x20xf32>, vector<2x20xf32>, vector<2x20xf32>, vector<2x20xf32>, vector<2x20xf32>, vector<2x20xf32>, vector<2x20xf32> -> vector<16x20xf32>
    %11 = arith.truncf %10 : vector<16x20xf32> to vector<16x20xbf16>
    %c0_10 = arith.constant 0 : index
    %c0_11 = arith.constant 0 : index
    %12 = vector.load %arg1[%c0_10, %c0_11] : memref<20x192xbf16, #tpu.memory_space<vmem>>, vector<20x192xbf16>
    %cst = arith.constant dense<0.000000e+00> : vector<16x192xf32>
    %13 = tpu.matmul %1, %12, %cst {dimension_numbers = #tpu.dot_dimension_numbers<[1], [0], [0], [1], [0, 0, 1, 1], [], []>} : vector<16x20xbf16>, vector<20x192xbf16>, vector<16x192xf32> -> vector<16x192xf32>
    %c0_12 = arith.constant 0 : index
    %c0_13 = arith.constant 0 : index
    %14 = vector.load %arg2[%c0_12, %c0_13] : memref<20x192xbf16, #tpu.memory_space<vmem>>, vector<20x192xbf16>
    %cst_14 = arith.constant dense<0.000000e+00> : vector<16x192xf32>
    %15 = tpu.matmul %11, %14, %cst_14 {dimension_numbers = #tpu.dot_dimension_numbers<[1], [0], [0], [1], [0, 0, 1, 1], [], []>} : vector<16x20xbf16>, vector<20x192xbf16>, vector<16x192xf32> -> vector<16x192xf32>
    %16 = arith.addf %13, %15 : vector<16x192xf32>
    %c0_15 = arith.constant 0 : index
    %c0_16 = arith.constant 0 : index
    %17 = vector.load %arg4[%c0_15, %c0_16] : memref<1x192xf32, #tpu.memory_space<vmem>>, vector<1x192xf32>
    %18 = vector.broadcast %17 : vector<1x192xf32> to vector<16x192xf32>
    %19 = arith.addf %16, %18 : vector<16x192xf32>
    %c0_17 = arith.constant 0 : index
    %c0_18 = arith.constant 0 : index
    %20 = vector.load %arg24[%c0_17, %c0_18] : memref<16x192xf32, #tpu.memory_space<vmem>>, vector<16x192xf32>
    tpu.vector_store %arg24[%c0_17, %c0_18], %19 {strides = array<i32>} : memref<16x192xf32, #tpu.memory_space<vmem>>, vector<16x192xf32>,
    %c0_19 = arith.constant 0 : index
    %c0_20 = arith.constant 0 : index
    %21 = vector.load %arg3[%c0_19, %c0_20] : memref<64x192xbf16, #tpu.memory_space<vmem>>, vector<64x192xbf16>
    %c0_21 = arith.constant 0 : index
    %c0_22 = arith.constant 0 : index
    %22 = vector.load %arg5[%c0_21, %c0_22] : memref<1x64xf32, #tpu.memory_space<vmem>>, vector<1x64xf32>
    %cst_23 = arith.constant 0.000000e+00 : f32
    %23 = vector.broadcast %cst_23 : f32 to vector<2x64xf32>
    %c0_24 = arith.constant 0 : index
    %c0_25 = arith.constant 0 : index
    %24 = vector.load %arg24[%c0_24, %c0_25] : memref<16x192xf32, #tpu.memory_space<vmem>>, vector<2x192xf32>
    %25 = arith.truncf %23 : vector<2x64xf32> to vector<2x64xbf16>
    %cst_26 = arith.constant dense<0.000000e+00> : vector<2x192xf32>
    %26 = tpu.matmul %25, %21, %cst_26 {dimension_numbers = #tpu.dot_dimension_numbers<[1], [0], [0], [1], [0, 0, 1, 1], [], []>} : vector<2x64xbf16>, vector<64x192xbf16>, vector<2x192xf32> -> vector<2x192xf32>
    %27 = vector.extract_strided_slice %24 {offsets = [0, 0], sizes = [2, 64], strides = [1, 1]} : vector<2x192xf32> to vector<2x64xf32>
    %28 = vector.extract_strided_slice %26 {offsets = [0, 0], sizes = [2, 64], strides = [1, 1]} : vector<2x192xf32> to vector<2x64xf32>
    %29 = arith.addf %27, %28 : vector<2x64xf32>
    %30 = arith.negf %29 : vector<2x64xf32>
    %31 = math.exp %30 : vector<2x64xf32>
    %cst_27 = arith.constant 1.000000e+00 : f32
    %32 = vector.broadcast %cst_27 : f32 to vector<2x64xf32>
    %33 = arith.addf %32, %31 : vector<2x64xf32>
    %34 = arith.divf %32, %33 : vector<2x64xf32>
    %35 = vector.extract_strided_slice %24 {offsets = [0, 64], sizes = [2, 64], strides = [1, 1]} : vector<2x192xf32> to vector<2x64xf32>
    %36 = vector.extract_strided_slice %26 {offsets = [0, 64], sizes = [2, 64], strides = [1, 1]} : vector<2x192xf32> to vector<2x64xf32>
    %37 = arith.addf %35, %36 : vector<2x64xf32>
    %38 = arith.negf %37 : vector<2x64xf32>
    %39 = math.exp %38 : vector<2x64xf32>
    %cst_28 = arith.constant 1.000000e+00 : f32
    %40 = vector.broadcast %cst_28 : f32 to vector<2x64xf32>
    %41 = arith.addf %40, %39 : vector<2x64xf32>
    %42 = arith.divf %40, %41 : vector<2x64xf32>
    %43 = vector.extract_strided_slice %24 {offsets = [0, 128], sizes = [2, 64], strides = [1, 1]} : vector<2x192xf32> to vector<2x64xf32>
    %44 = vector.extract_strided_slice %26 {offsets = [0, 128], sizes = [2, 64], strides = [1, 1]} : vector<2x192xf32> to vector<2x64xf32>
    %45 = vector.broadcast %22 : vector<1x64xf32> to vector<2x64xf32>
    %46 = arith.addf %44, %45 : vector<2x64xf32>
    %47 = arith.mulf %34, %46 : vector<2x64xf32>
    %48 = arith.addf %43, %47 : vector<2x64xf32>
    %49 = math.tanh %48 : vector<2x64xf32>
    %cst_29 = arith.constant 1.000000e+00 : f32
    %50 = vector.broadcast %cst_29 : f32 to vector<2x64xf32>
    %51 = arith.subf %50, %42 : vector<2x64xf32>
    %52 = arith.mulf %51, %49 : vector<2x64xf32>
    %53 = arith.mulf %42, %23 : vector<2x64xf32>
    %54 = arith.addf %52, %53 : vector<2x64xf32>
    %c0_30 = arith.constant 0 : index
    %c0_31 = arith.constant 0 : index
    %55 = vector.load %arg26[%c0_30, %c0_31] : memref<16x64xf32, #tpu.memory_space<vmem>>, vector<2x64xf32>
    tpu.vector_store %arg26[%c0_30, %c0_31], %54 {strides = array<i32>} : memref<16x64xf32, #tpu.memory_space<vmem>>, vector<2x64xf32>,
    %c14_32 = arith.constant 14 : index
    %c0_33 = arith.constant 0 : index
    %56 = vector.load %arg27[%c14_32, %c0_33] : memref<16x64xf32, #tpu.memory_space<vmem>>, vector<2x64xf32>
    tpu.vector_store %arg27[%c14_32, %c0_33], %54 {strides = array<i32>} : memref<16x64xf32, #tpu.memory_space<vmem>>, vector<2x64xf32>,
    %c2_34 = arith.constant 2 : index
    %c0_35 = arith.constant 0 : index
    %57 = vector.load %arg24[%c2_34, %c0_35] : memref<16x192xf32, #tpu.memory_space<vmem>>, vector<2x192xf32>
    %58 = arith.truncf %54 : vector<2x64xf32> to vector<2x64xbf16>
    %cst_36 = arith.constant dense<0.000000e+00> : vector<2x192xf32>
    %59 = tpu.matmul %58, %21, %cst_36 {dimension_numbers = #tpu.dot_dimension_numbers<[1], [0], [0], [1], [0, 0, 1, 1], [], []>} : vector<2x64xbf16>, vector<64x192xbf16>, vector<2x192xf32> -> vector<2x192xf32>
    %60 = vector.extract_strided_slice %57 {offsets = [0, 0], sizes = [2, 64], strides = [1, 1]} : vector<2x192xf32> to vector<2x64xf32>
    %61 = vector.extract_strided_slice %59 {offsets = [0, 0], sizes = [2, 64], strides = [1, 1]} : vector<2x192xf32> to vector<2x64xf32>
    %62 = arith.addf %60, %61 : vector<2x64xf32>
    %63 = arith.negf %62 : vector<2x64xf32>
    %64 = math.exp %63 : vector<2x64xf32>
    %cst_37 = arith.constant 1.000000e+00 : f32
    %65 = vector.broadcast %cst_37 : f32 to vector<2x64xf32>
    %66 = arith.addf %65, %64 : vector<2x64xf32>
    %67 = arith.divf %65, %66 : vector<2x64xf32>
    %68 = vector.extract_strided_slice %57 {offsets = [0, 64], sizes = [2, 64], strides = [1, 1]} : vector<2x192xf32> to vector<2x64xf32>
    %69 = vector.extract_strided_slice %59 {offsets = [0, 64], sizes = [2, 64], strides = [1, 1]} : vector<2x192xf32> to vector<2x64xf32>
    %70 = arith.addf %68, %69 : vector<2x64xf32>
    %71 = arith.negf %70 : vector<2x64xf32>
    %72 = math.exp %71 : vector<2x64xf32>
    %cst_38 = arith.constant 1.000000e+00 : f32
    %73 = vector.broadcast %cst_38 : f32 to vector<2x64xf32>
    %74 = arith.addf %73, %72 : vector<2x64xf32>
    %75 = arith.divf %73, %74 : vector<2x64xf32>
    %76 = vector.extract_strided_slice %57 {offsets = [0, 128], sizes = [2, 64], strides = [1, 1]} : vector<2x192xf32> to vector<2x64xf32>
    %77 = vector.extract_strided_slice %59 {offsets = [0, 128], sizes = [2, 64], strides = [1, 1]} : vector<2x192xf32> to vector<2x64xf32>
    %78 = vector.broadcast %22 : vector<1x64xf32> to vector<2x64xf32>
    %79 = arith.addf %77, %78 : vector<2x64xf32>
    %80 = arith.mulf %67, %79 : vector<2x64xf32>
    %81 = arith.addf %76, %80 : vector<2x64xf32>
    %82 = math.tanh %81 : vector<2x64xf32>
    %cst_39 = arith.constant 1.000000e+00 : f32
    %83 = vector.broadcast %cst_39 : f32 to vector<2x64xf32>
    %84 = arith.subf %83, %75 : vector<2x64xf32>
    %85 = arith.mulf %84, %82 : vector<2x64xf32>
    %86 = arith.mulf %75, %54 : vector<2x64xf32>
    %87 = arith.addf %85, %86 : vector<2x64xf32>
    %c2_40 = arith.constant 2 : index
    %c0_41 = arith.constant 0 : index
    %88 = vector.load %arg26[%c2_40, %c0_41] : memref<16x64xf32, #tpu.memory_space<vmem>>, vector<2x64xf32>
    tpu.vector_store %arg26[%c2_40, %c0_41], %87 {strides = array<i32>} : memref<16x64xf32, #tpu.memory_space<vmem>>, vector<2x64xf32>,
    %c12_42 = arith.constant 12 : index
    %c0_43 = arith.constant 0 : index
    %89 = vector.load %arg27[%c12_42, %c0_43] : memref<16x64xf32, #tpu.memory_space<vmem>>, vector<2x64xf32>
    tpu.vector_store %arg27[%c12_42, %c0_43], %87 {strides = array<i32>} : memref<16x64xf32, #tpu.memory_space<vmem>>, vector<2x64xf32>,
    %c4_44 = arith.constant 4 : index
    %c0_45 = arith.constant 0 : index
    %90 = vector.load %arg24[%c4_44, %c0_45] : memref<16x192xf32, #tpu.memory_space<vmem>>, vector<2x192xf32>
    %91 = arith.truncf %87 : vector<2x64xf32> to vector<2x64xbf16>
    %cst_46 = arith.constant dense<0.000000e+00> : vector<2x192xf32>
    %92 = tpu.matmul %91, %21, %cst_46 {dimension_numbers = #tpu.dot_dimension_numbers<[1], [0], [0], [1], [0, 0, 1, 1], [], []>} : vector<2x64xbf16>, vector<64x192xbf16>, vector<2x192xf32> -> vector<2x192xf32>
    %93 = vector.extract_strided_slice %90 {offsets = [0, 0], sizes = [2, 64], strides = [1, 1]} : vector<2x192xf32> to vector<2x64xf32>
    %94 = vector.extract_strided_slice %92 {offsets = [0, 0], sizes = [2, 64], strides = [1, 1]} : vector<2x192xf32> to vector<2x64xf32>
    %95 = arith.addf %93, %94 : vector<2x64xf32>
    %96 = arith.negf %95 : vector<2x64xf32>
    %97 = math.exp %96 : vector<2x64xf32>
    %cst_47 = arith.constant 1.000000e+00 : f32
    %98 = vector.broadcast %cst_47 : f32 to vector<2x64xf32>
    %99 = arith.addf %98, %97 : vector<2x64xf32>
    %100 = arith.divf %98, %99 : vector<2x64xf32>
    %101 = vector.extract_strided_slice %90 {offsets = [0, 64], sizes = [2, 64], strides = [1, 1]} : vector<2x192xf32> to vector<2x64xf32>
    %102 = vector.extract_strided_slice %92 {offsets = [0, 64], sizes = [2, 64], strides = [1, 1]} : vector<2x192xf32> to vector<2x64xf32>
    %103 = arith.addf %101, %102 : vector<2x64xf32>
    %104 = arith.negf %103 : vector<2x64xf32>
    %105 = math.exp %104 : vector<2x64xf32>
    %cst_48 = arith.constant 1.000000e+00 : f32
    %106 = vector.broadcast %cst_48 : f32 to vector<2x64xf32>
    %107 = arith.addf %106, %105 : vector<2x64xf32>
    %108 = arith.divf %106, %107 : vector<2x64xf32>
    %109 = vector.extract_strided_slice %90 {offsets = [0, 128], sizes = [2, 64], strides = [1, 1]} : vector<2x192xf32> to vector<2x64xf32>
    %110 = vector.extract_strided_slice %92 {offsets = [0, 128], sizes = [2, 64], strides = [1, 1]} : vector<2x192xf32> to vector<2x64xf32>
    %111 = vector.broadcast %22 : vector<1x64xf32> to vector<2x64xf32>
    %112 = arith.addf %110, %111 : vector<2x64xf32>
    %113 = arith.mulf %100, %112 : vector<2x64xf32>
    %114 = arith.addf %109, %113 : vector<2x64xf32>
    %115 = math.tanh %114 : vector<2x64xf32>
    %cst_49 = arith.constant 1.000000e+00 : f32
    %116 = vector.broadcast %cst_49 : f32 to vector<2x64xf32>
    %117 = arith.subf %116, %108 : vector<2x64xf32>
    %118 = arith.mulf %117, %115 : vector<2x64xf32>
    %119 = arith.mulf %108, %87 : vector<2x64xf32>
    %120 = arith.addf %118, %119 : vector<2x64xf32>
    %c4_50 = arith.constant 4 : index
    %c0_51 = arith.constant 0 : index
    %121 = vector.load %arg26[%c4_50, %c0_51] : memref<16x64xf32, #tpu.memory_space<vmem>>, vector<2x64xf32>
    tpu.vector_store %arg26[%c4_50, %c0_51], %120 {strides = array<i32>} : memref<16x64xf32, #tpu.memory_space<vmem>>, vector<2x64xf32>,
    %c10_52 = arith.constant 10 : index
    %c0_53 = arith.constant 0 : index
    %122 = vector.load %arg27[%c10_52, %c0_53] : memref<16x64xf32, #tpu.memory_space<vmem>>, vector<2x64xf32>
    tpu.vector_store %arg27[%c10_52, %c0_53], %120 {strides = array<i32>} : memref<16x64xf32, #tpu.memory_space<vmem>>, vector<2x64xf32>,
    %c6_54 = arith.constant 6 : index
    %c0_55 = arith.constant 0 : index
    %123 = vector.load %arg24[%c6_54, %c0_55] : memref<16x192xf32, #tpu.memory_space<vmem>>, vector<2x192xf32>
    %124 = arith.truncf %120 : vector<2x64xf32> to vector<2x64xbf16>
    %cst_56 = arith.constant dense<0.000000e+00> : vector<2x192xf32>
    %125 = tpu.matmul %124, %21, %cst_56 {dimension_numbers = #tpu.dot_dimension_numbers<[1], [0], [0], [1], [0, 0, 1, 1], [], []>} : vector<2x64xbf16>, vector<64x192xbf16>, vector<2x192xf32> -> vector<2x192xf32>
    %126 = vector.extract_strided_slice %123 {offsets = [0, 0], sizes = [2, 64], strides = [1, 1]} : vector<2x192xf32> to vector<2x64xf32>
    %127 = vector.extract_strided_slice %125 {offsets = [0, 0], sizes = [2, 64], strides = [1, 1]} : vector<2x192xf32> to vector<2x64xf32>
    %128 = arith.addf %126, %127 : vector<2x64xf32>
    %129 = arith.negf %128 : vector<2x64xf32>
    %130 = math.exp %129 : vector<2x64xf32>
    %cst_57 = arith.constant 1.000000e+00 : f32
    %131 = vector.broadcast %cst_57 : f32 to vector<2x64xf32>
    %132 = arith.addf %131, %130 : vector<2x64xf32>
    %133 = arith.divf %131, %132 : vector<2x64xf32>
    %134 = vector.extract_strided_slice %123 {offsets = [0, 64], sizes = [2, 64], strides = [1, 1]} : vector<2x192xf32> to vector<2x64xf32>
    %135 = vector.extract_strided_slice %125 {offsets = [0, 64], sizes = [2, 64], strides = [1, 1]} : vector<2x192xf32> to vector<2x64xf32>
    %136 = arith.addf %134, %135 : vector<2x64xf32>
    %137 = arith.negf %136 : vector<2x64xf32>
    %138 = math.exp %137 : vector<2x64xf32>
    %cst_58 = arith.constant 1.000000e+00 : f32
    %139 = vector.broadcast %cst_58 : f32 to vector<2x64xf32>
    %140 = arith.addf %139, %138 : vector<2x64xf32>
    %141 = arith.divf %139, %140 : vector<2x64xf32>
    %142 = vector.extract_strided_slice %123 {offsets = [0, 128], sizes = [2, 64], strides = [1, 1]} : vector<2x192xf32> to vector<2x64xf32>
    %143 = vector.extract_strided_slice %125 {offsets = [0, 128], sizes = [2, 64], strides = [1, 1]} : vector<2x192xf32> to vector<2x64xf32>
    %144 = vector.broadcast %22 : vector<1x64xf32> to vector<2x64xf32>
    %145 = arith.addf %143, %144 : vector<2x64xf32>
    %146 = arith.mulf %133, %145 : vector<2x64xf32>
    %147 = arith.addf %142, %146 : vector<2x64xf32>
    %148 = math.tanh %147 : vector<2x64xf32>
    %cst_59 = arith.constant 1.000000e+00 : f32
    %149 = vector.broadcast %cst_59 : f32 to vector<2x64xf32>
    %150 = arith.subf %149, %141 : vector<2x64xf32>
    %151 = arith.mulf %150, %148 : vector<2x64xf32>
    %152 = arith.mulf %141, %120 : vector<2x64xf32>
    %153 = arith.addf %151, %152 : vector<2x64xf32>
    %c6_60 = arith.constant 6 : index
    %c0_61 = arith.constant 0 : index
    %154 = vector.load %arg26[%c6_60, %c0_61] : memref<16x64xf32, #tpu.memory_space<vmem>>, vector<2x64xf32>
    tpu.vector_store %arg26[%c6_60, %c0_61], %153 {strides = array<i32>} : memref<16x64xf32, #tpu.memory_space<vmem>>, vector<2x64xf32>,
    %c8_62 = arith.constant 8 : index
    %c0_63 = arith.constant 0 : index
    %155 = vector.load %arg27[%c8_62, %c0_63] : memref<16x64xf32, #tpu.memory_space<vmem>>, vector<2x64xf32>
    tpu.vector_store %arg27[%c8_62, %c0_63], %153 {strides = array<i32>} : memref<16x64xf32, #tpu.memory_space<vmem>>, vector<2x64xf32>,
    %c8_64 = arith.constant 8 : index
    %c0_65 = arith.constant 0 : index
    %156 = vector.load %arg24[%c8_64, %c0_65] : memref<16x192xf32, #tpu.memory_space<vmem>>, vector<2x192xf32>
    %157 = arith.truncf %153 : vector<2x64xf32> to vector<2x64xbf16>
    %cst_66 = arith.constant dense<0.000000e+00> : vector<2x192xf32>
    %158 = tpu.matmul %157, %21, %cst_66 {dimension_numbers = #tpu.dot_dimension_numbers<[1], [0], [0], [1], [0, 0, 1, 1], [], []>} : vector<2x64xbf16>, vector<64x192xbf16>, vector<2x192xf32> -> vector<2x192xf32>
    %159 = vector.extract_strided_slice %156 {offsets = [0, 0], sizes = [2, 64], strides = [1, 1]} : vector<2x192xf32> to vector<2x64xf32>
    %160 = vector.extract_strided_slice %158 {offsets = [0, 0], sizes = [2, 64], strides = [1, 1]} : vector<2x192xf32> to vector<2x64xf32>
    %161 = arith.addf %159, %160 : vector<2x64xf32>
    %162 = arith.negf %161 : vector<2x64xf32>
    %163 = math.exp %162 : vector<2x64xf32>
    %cst_67 = arith.constant 1.000000e+00 : f32
    %164 = vector.broadcast %cst_67 : f32 to vector<2x64xf32>
    %165 = arith.addf %164, %163 : vector<2x64xf32>
    %166 = arith.divf %164, %165 : vector<2x64xf32>
    %167 = vector.extract_strided_slice %156 {offsets = [0, 64], sizes = [2, 64], strides = [1, 1]} : vector<2x192xf32> to vector<2x64xf32>
    %168 = vector.extract_strided_slice %158 {offsets = [0, 64], sizes = [2, 64], strides = [1, 1]} : vector<2x192xf32> to vector<2x64xf32>
    %169 = arith.addf %167, %168 : vector<2x64xf32>
    %170 = arith.negf %169 : vector<2x64xf32>
    %171 = math.exp %170 : vector<2x64xf32>
    %cst_68 = arith.constant 1.000000e+00 : f32
    %172 = vector.broadcast %cst_68 : f32 to vector<2x64xf32>
    %173 = arith.addf %172, %171 : vector<2x64xf32>
    %174 = arith.divf %172, %173 : vector<2x64xf32>
    %175 = vector.extract_strided_slice %156 {offsets = [0, 128], sizes = [2, 64], strides = [1, 1]} : vector<2x192xf32> to vector<2x64xf32>
    %176 = vector.extract_strided_slice %158 {offsets = [0, 128], sizes = [2, 64], strides = [1, 1]} : vector<2x192xf32> to vector<2x64xf32>
    %177 = vector.broadcast %22 : vector<1x64xf32> to vector<2x64xf32>
    %178 = arith.addf %176, %177 : vector<2x64xf32>
    %179 = arith.mulf %166, %178 : vector<2x64xf32>
    %180 = arith.addf %175, %179 : vector<2x64xf32>
    %181 = math.tanh %180 : vector<2x64xf32>
    %cst_69 = arith.constant 1.000000e+00 : f32
    %182 = vector.broadcast %cst_69 : f32 to vector<2x64xf32>
    %183 = arith.subf %182, %174 : vector<2x64xf32>
    %184 = arith.mulf %183, %181 : vector<2x64xf32>
    %185 = arith.mulf %174, %153 : vector<2x64xf32>
    %186 = arith.addf %184, %185 : vector<2x64xf32>
    %c8_70 = arith.constant 8 : index
    %c0_71 = arith.constant 0 : index
    %187 = vector.load %arg26[%c8_70, %c0_71] : memref<16x64xf32, #tpu.memory_space<vmem>>, vector<2x64xf32>
    tpu.vector_store %arg26[%c8_70, %c0_71], %186 {strides = array<i32>} : memref<16x64xf32, #tpu.memory_space<vmem>>, vector<2x64xf32>,
    %c6_72 = arith.constant 6 : index
    %c0_73 = arith.constant 0 : index
    %188 = vector.load %arg27[%c6_72, %c0_73] : memref<16x64xf32, #tpu.memory_space<vmem>>, vector<2x64xf32>
    tpu.vector_store %arg27[%c6_72, %c0_73], %186 {strides = array<i32>} : memref<16x64xf32, #tpu.memory_space<vmem>>, vector<2x64xf32>,
    %c10_74 = arith.constant 10 : index
    %c0_75 = arith.constant 0 : index
    %189 = vector.load %arg24[%c10_74, %c0_75] : memref<16x192xf32, #tpu.memory_space<vmem>>, vector<2x192xf32>
    %190 = arith.truncf %186 : vector<2x64xf32> to vector<2x64xbf16>
    %cst_76 = arith.constant dense<0.000000e+00> : vector<2x192xf32>
    %191 = tpu.matmul %190, %21, %cst_76 {dimension_numbers = #tpu.dot_dimension_numbers<[1], [0], [0], [1], [0, 0, 1, 1], [], []>} : vector<2x64xbf16>, vector<64x192xbf16>, vector<2x192xf32> -> vector<2x192xf32>
    %192 = vector.extract_strided_slice %189 {offsets = [0, 0], sizes = [2, 64], strides = [1, 1]} : vector<2x192xf32> to vector<2x64xf32>
    %193 = vector.extract_strided_slice %191 {offsets = [0, 0], sizes = [2, 64], strides = [1, 1]} : vector<2x192xf32> to vector<2x64xf32>
    %194 = arith.addf %192, %193 : vector<2x64xf32>
    %195 = arith.negf %194 : vector<2x64xf32>
    %196 = math.exp %195 : vector<2x64xf32>
    %cst_77 = arith.constant 1.000000e+00 : f32
    %197 = vector.broadcast %cst_77 : f32 to vector<2x64xf32>
    %198 = arith.addf %197, %196 : vector<2x64xf32>
    %199 = arith.divf %197, %198 : vector<2x64xf32>
    %200 = vector.extract_strided_slice %189 {offsets = [0, 64], sizes = [2, 64], strides = [1, 1]} : vector<2x192xf32> to vector<2x64xf32>
    %201 = vector.extract_strided_slice %191 {offsets = [0, 64], sizes = [2, 64], strides = [1, 1]} : vector<2x192xf32> to vector<2x64xf32>
    %202 = arith.addf %200, %201 : vector<2x64xf32>
    %203 = arith.negf %202 : vector<2x64xf32>
    %204 = math.exp %203 : vector<2x64xf32>
    %cst_78 = arith.constant 1.000000e+00 : f32
    %205 = vector.broadcast %cst_78 : f32 to vector<2x64xf32>
    %206 = arith.addf %205, %204 : vector<2x64xf32>
    %207 = arith.divf %205, %206 : vector<2x64xf32>
    %208 = vector.extract_strided_slice %189 {offsets = [0, 128], sizes = [2, 64], strides = [1, 1]} : vector<2x192xf32> to vector<2x64xf32>
    %209 = vector.extract_strided_slice %191 {offsets = [0, 128], sizes = [2, 64], strides = [1, 1]} : vector<2x192xf32> to vector<2x64xf32>
    %210 = vector.broadcast %22 : vector<1x64xf32> to vector<2x64xf32>
    %211 = arith.addf %209, %210 : vector<2x64xf32>
    %212 = arith.mulf %199, %211 : vector<2x64xf32>
    %213 = arith.addf %208, %212 : vector<2x64xf32>
    %214 = math.tanh %213 : vector<2x64xf32>
    %cst_79 = arith.constant 1.000000e+00 : f32
    %215 = vector.broadcast %cst_79 : f32 to vector<2x64xf32>
    %216 = arith.subf %215, %207 : vector<2x64xf32>
    %217 = arith.mulf %216, %214 : vector<2x64xf32>
    %218 = arith.mulf %207, %186 : vector<2x64xf32>
    %219 = arith.addf %217, %218 : vector<2x64xf32>
    %c10_80 = arith.constant 10 : index
    %c0_81 = arith.constant 0 : index
    %220 = vector.load %arg26[%c10_80, %c0_81] : memref<16x64xf32, #tpu.memory_space<vmem>>, vector<2x64xf32>
    tpu.vector_store %arg26[%c10_80, %c0_81], %219 {strides = array<i32>} : memref<16x64xf32, #tpu.memory_space<vmem>>, vector<2x64xf32>,
    %c4_82 = arith.constant 4 : index
    %c0_83 = arith.constant 0 : index
    %221 = vector.load %arg27[%c4_82, %c0_83] : memref<16x64xf32, #tpu.memory_space<vmem>>, vector<2x64xf32>
    tpu.vector_store %arg27[%c4_82, %c0_83], %219 {strides = array<i32>} : memref<16x64xf32, #tpu.memory_space<vmem>>, vector<2x64xf32>,
    %c12_84 = arith.constant 12 : index
    %c0_85 = arith.constant 0 : index
    %222 = vector.load %arg24[%c12_84, %c0_85] : memref<16x192xf32, #tpu.memory_space<vmem>>, vector<2x192xf32>
    %223 = arith.truncf %219 : vector<2x64xf32> to vector<2x64xbf16>
    %cst_86 = arith.constant dense<0.000000e+00> : vector<2x192xf32>
    %224 = tpu.matmul %223, %21, %cst_86 {dimension_numbers = #tpu.dot_dimension_numbers<[1], [0], [0], [1], [0, 0, 1, 1], [], []>} : vector<2x64xbf16>, vector<64x192xbf16>, vector<2x192xf32> -> vector<2x192xf32>
    %225 = vector.extract_strided_slice %222 {offsets = [0, 0], sizes = [2, 64], strides = [1, 1]} : vector<2x192xf32> to vector<2x64xf32>
    %226 = vector.extract_strided_slice %224 {offsets = [0, 0], sizes = [2, 64], strides = [1, 1]} : vector<2x192xf32> to vector<2x64xf32>
    %227 = arith.addf %225, %226 : vector<2x64xf32>
    %228 = arith.negf %227 : vector<2x64xf32>
    %229 = math.exp %228 : vector<2x64xf32>
    %cst_87 = arith.constant 1.000000e+00 : f32
    %230 = vector.broadcast %cst_87 : f32 to vector<2x64xf32>
    %231 = arith.addf %230, %229 : vector<2x64xf32>
    %232 = arith.divf %230, %231 : vector<2x64xf32>
    %233 = vector.extract_strided_slice %222 {offsets = [0, 64], sizes = [2, 64], strides = [1, 1]} : vector<2x192xf32> to vector<2x64xf32>
    %234 = vector.extract_strided_slice %224 {offsets = [0, 64], sizes = [2, 64], strides = [1, 1]} : vector<2x192xf32> to vector<2x64xf32>
    %235 = arith.addf %233, %234 : vector<2x64xf32>
    %236 = arith.negf %235 : vector<2x64xf32>
    %237 = math.exp %236 : vector<2x64xf32>
    %cst_88 = arith.constant 1.000000e+00 : f32
    %238 = vector.broadcast %cst_88 : f32 to vector<2x64xf32>
    %239 = arith.addf %238, %237 : vector<2x64xf32>
    %240 = arith.divf %238, %239 : vector<2x64xf32>
    %241 = vector.extract_strided_slice %222 {offsets = [0, 128], sizes = [2, 64], strides = [1, 1]} : vector<2x192xf32> to vector<2x64xf32>
    %242 = vector.extract_strided_slice %224 {offsets = [0, 128], sizes = [2, 64], strides = [1, 1]} : vector<2x192xf32> to vector<2x64xf32>
    %243 = vector.broadcast %22 : vector<1x64xf32> to vector<2x64xf32>
    %244 = arith.addf %242, %243 : vector<2x64xf32>
    %245 = arith.mulf %232, %244 : vector<2x64xf32>
    %246 = arith.addf %241, %245 : vector<2x64xf32>
    %247 = math.tanh %246 : vector<2x64xf32>
    %cst_89 = arith.constant 1.000000e+00 : f32
    %248 = vector.broadcast %cst_89 : f32 to vector<2x64xf32>
    %249 = arith.subf %248, %240 : vector<2x64xf32>
    %250 = arith.mulf %249, %247 : vector<2x64xf32>
    %251 = arith.mulf %240, %219 : vector<2x64xf32>
    %252 = arith.addf %250, %251 : vector<2x64xf32>
    %c12_90 = arith.constant 12 : index
    %c0_91 = arith.constant 0 : index
    %253 = vector.load %arg26[%c12_90, %c0_91] : memref<16x64xf32, #tpu.memory_space<vmem>>, vector<2x64xf32>
    tpu.vector_store %arg26[%c12_90, %c0_91], %252 {strides = array<i32>} : memref<16x64xf32, #tpu.memory_space<vmem>>, vector<2x64xf32>,
    %c2_92 = arith.constant 2 : index
    %c0_93 = arith.constant 0 : index
    %254 = vector.load %arg27[%c2_92, %c0_93] : memref<16x64xf32, #tpu.memory_space<vmem>>, vector<2x64xf32>
    tpu.vector_store %arg27[%c2_92, %c0_93], %252 {strides = array<i32>} : memref<16x64xf32, #tpu.memory_space<vmem>>, vector<2x64xf32>,
    %c14_94 = arith.constant 14 : index
    %c0_95 = arith.constant 0 : index
    %255 = vector.load %arg24[%c14_94, %c0_95] : memref<16x192xf32, #tpu.memory_space<vmem>>, vector<2x192xf32>
    %256 = arith.truncf %252 : vector<2x64xf32> to vector<2x64xbf16>
    %cst_96 = arith.constant dense<0.000000e+00> : vector<2x192xf32>
    %257 = tpu.matmul %256, %21, %cst_96 {dimension_numbers = #tpu.dot_dimension_numbers<[1], [0], [0], [1], [0, 0, 1, 1], [], []>} : vector<2x64xbf16>, vector<64x192xbf16>, vector<2x192xf32> -> vector<2x192xf32>
    %258 = vector.extract_strided_slice %255 {offsets = [0, 0], sizes = [2, 64], strides = [1, 1]} : vector<2x192xf32> to vector<2x64xf32>
    %259 = vector.extract_strided_slice %257 {offsets = [0, 0], sizes = [2, 64], strides = [1, 1]} : vector<2x192xf32> to vector<2x64xf32>
    %260 = arith.addf %258, %259 : vector<2x64xf32>
    %261 = arith.negf %260 : vector<2x64xf32>
    %262 = math.exp %261 : vector<2x64xf32>
    %cst_97 = arith.constant 1.000000e+00 : f32
    %263 = vector.broadcast %cst_97 : f32 to vector<2x64xf32>
    %264 = arith.addf %263, %262 : vector<2x64xf32>
    %265 = arith.divf %263, %264 : vector<2x64xf32>
    %266 = vector.extract_strided_slice %255 {offsets = [0, 64], sizes = [2, 64], strides = [1, 1]} : vector<2x192xf32> to vector<2x64xf32>
    %267 = vector.extract_strided_slice %257 {offsets = [0, 64], sizes = [2, 64], strides = [1, 1]} : vector<2x192xf32> to vector<2x64xf32>
    %268 = arith.addf %266, %267 : vector<2x64xf32>
    %269 = arith.negf %268 : vector<2x64xf32>
    %270 = math.exp %269 : vector<2x64xf32>
    %cst_98 = arith.constant 1.000000e+00 : f32
    %271 = vector.broadcast %cst_98 : f32 to vector<2x64xf32>
    %272 = arith.addf %271, %270 : vector<2x64xf32>
    %273 = arith.divf %271, %272 : vector<2x64xf32>
    %274 = vector.extract_strided_slice %255 {offsets = [0, 128], sizes = [2, 64], strides = [1, 1]} : vector<2x192xf32> to vector<2x64xf32>
    %275 = vector.extract_strided_slice %257 {offsets = [0, 128], sizes = [2, 64], strides = [1, 1]} : vector<2x192xf32> to vector<2x64xf32>
    %276 = vector.broadcast %22 : vector<1x64xf32> to vector<2x64xf32>
    %277 = arith.addf %275, %276 : vector<2x64xf32>
    %278 = arith.mulf %265, %277 : vector<2x64xf32>
    %279 = arith.addf %274, %278 : vector<2x64xf32>
    %280 = math.tanh %279 : vector<2x64xf32>
    %cst_99 = arith.constant 1.000000e+00 : f32
    %281 = vector.broadcast %cst_99 : f32 to vector<2x64xf32>
    %282 = arith.subf %281, %273 : vector<2x64xf32>
    %283 = arith.mulf %282, %280 : vector<2x64xf32>
    %284 = arith.mulf %273, %252 : vector<2x64xf32>
    %285 = arith.addf %283, %284 : vector<2x64xf32>
    %c14_100 = arith.constant 14 : index
    %c0_101 = arith.constant 0 : index
    %286 = vector.load %arg26[%c14_100, %c0_101] : memref<16x64xf32, #tpu.memory_space<vmem>>, vector<2x64xf32>
    tpu.vector_store %arg26[%c14_100, %c0_101], %285 {strides = array<i32>} : memref<16x64xf32, #tpu.memory_space<vmem>>, vector<2x64xf32>,
    %c0_102 = arith.constant 0 : index
    %c0_103 = arith.constant 0 : index
    %287 = vector.load %arg27[%c0_102, %c0_103] : memref<16x64xf32, #tpu.memory_space<vmem>>, vector<2x64xf32>
    tpu.vector_store %arg27[%c0_102, %c0_103], %285 {strides = array<i32>} : memref<16x64xf32, #tpu.memory_space<vmem>>, vector<2x64xf32>,
    %c0_104 = arith.constant 0 : index
    %c0_105 = arith.constant 0 : index
    %288 = vector.load %arg26[%c0_104, %c0_105] : memref<16x64xf32, #tpu.memory_space<vmem>>, vector<16x64xf32>
    %289 = arith.truncf %288 : vector<16x64xf32> to vector<16x64xbf16>
    %c0_106 = arith.constant 0 : index
    %c0_107 = arith.constant 0 : index
    %290 = vector.load %arg27[%c0_106, %c0_107] : memref<16x64xf32, #tpu.memory_space<vmem>>, vector<16x64xf32>
    %291 = arith.truncf %290 : vector<16x64xf32> to vector<16x64xbf16>
    %c0_108 = arith.constant 0 : index
    %c0_109 = arith.constant 0 : index
    %292 = vector.load %arg6[%c0_108, %c0_109] : memref<64x192xbf16, #tpu.memory_space<vmem>>, vector<64x192xbf16>
    %cst_110 = arith.constant dense<0.000000e+00> : vector<16x192xf32>
    %293 = tpu.matmul %289, %292, %cst_110 {dimension_numbers = #tpu.dot_dimension_numbers<[1], [0], [0], [1], [0, 0, 1, 1], [], []>} : vector<16x64xbf16>, vector<64x192xbf16>, vector<16x192xf32> -> vector<16x192xf32>
    %c0_111 = arith.constant 0 : index
    %c0_112 = arith.constant 0 : index
    %294 = vector.load %arg7[%c0_111, %c0_112] : memref<64x192xbf16, #tpu.memory_space<vmem>>, vector<64x192xbf16>
    %cst_113 = arith.constant dense<0.000000e+00> : vector<16x192xf32>
    %295 = tpu.matmul %291, %294, %cst_113 {dimension_numbers = #tpu.dot_dimension_numbers<[1], [0], [0], [1], [0, 0, 1, 1], [], []>} : vector<16x64xbf16>, vector<64x192xbf16>, vector<16x192xf32> -> vector<16x192xf32>
    %296 = arith.addf %293, %295 : vector<16x192xf32>
    %c0_114 = arith.constant 0 : index
    %c0_115 = arith.constant 0 : index
    %297 = vector.load %arg9[%c0_114, %c0_115] : memref<1x192xf32, #tpu.memory_space<vmem>>, vector<1x192xf32>
    %298 = vector.broadcast %297 : vector<1x192xf32> to vector<16x192xf32>
    %299 = arith.addf %296, %298 : vector<16x192xf32>
    %c0_116 = arith.constant 0 : index
    %c0_117 = arith.constant 0 : index
    %300 = vector.load %arg25[%c0_116, %c0_117] : memref<16x192xf32, #tpu.memory_space<vmem>>, vector<16x192xf32>
    tpu.vector_store %arg25[%c0_116, %c0_117], %299 {strides = array<i32>} : memref<16x192xf32, #tpu.memory_space<vmem>>, vector<16x192xf32>,
    %c0_118 = arith.constant 0 : index
    %c0_119 = arith.constant 0 : index
    %301 = vector.load %arg8[%c0_118, %c0_119] : memref<64x192xbf16, #tpu.memory_space<vmem>>, vector<64x192xbf16>
    %c0_120 = arith.constant 0 : index
    %c0_121 = arith.constant 0 : index
    %302 = vector.load %arg10[%c0_120, %c0_121] : memref<1x64xf32, #tpu.memory_space<vmem>>, vector<1x64xf32>
    %cst_122 = arith.constant 0.000000e+00 : f32
    %303 = vector.broadcast %cst_122 : f32 to vector<2x64xf32>
    %c0_123 = arith.constant 0 : index
    %c0_124 = arith.constant 0 : index
    %304 = vector.load %arg25[%c0_123, %c0_124] : memref<16x192xf32, #tpu.memory_space<vmem>>, vector<2x192xf32>
    %305 = arith.truncf %303 : vector<2x64xf32> to vector<2x64xbf16>
    %cst_125 = arith.constant dense<0.000000e+00> : vector<2x192xf32>
    %306 = tpu.matmul %305, %301, %cst_125 {dimension_numbers = #tpu.dot_dimension_numbers<[1], [0], [0], [1], [0, 0, 1, 1], [], []>} : vector<2x64xbf16>, vector<64x192xbf16>, vector<2x192xf32> -> vector<2x192xf32>
    %307 = vector.extract_strided_slice %304 {offsets = [0, 0], sizes = [2, 64], strides = [1, 1]} : vector<2x192xf32> to vector<2x64xf32>
    %308 = vector.extract_strided_slice %306 {offsets = [0, 0], sizes = [2, 64], strides = [1, 1]} : vector<2x192xf32> to vector<2x64xf32>
    %309 = arith.addf %307, %308 : vector<2x64xf32>
    %310 = arith.negf %309 : vector<2x64xf32>
    %311 = math.exp %310 : vector<2x64xf32>
    %cst_126 = arith.constant 1.000000e+00 : f32
    %312 = vector.broadcast %cst_126 : f32 to vector<2x64xf32>
    %313 = arith.addf %312, %311 : vector<2x64xf32>
    %314 = arith.divf %312, %313 : vector<2x64xf32>
    %315 = vector.extract_strided_slice %304 {offsets = [0, 64], sizes = [2, 64], strides = [1, 1]} : vector<2x192xf32> to vector<2x64xf32>
    %316 = vector.extract_strided_slice %306 {offsets = [0, 64], sizes = [2, 64], strides = [1, 1]} : vector<2x192xf32> to vector<2x64xf32>
    %317 = arith.addf %315, %316 : vector<2x64xf32>
    %318 = arith.negf %317 : vector<2x64xf32>
    %319 = math.exp %318 : vector<2x64xf32>
    %cst_127 = arith.constant 1.000000e+00 : f32
    %320 = vector.broadcast %cst_127 : f32 to vector<2x64xf32>
    %321 = arith.addf %320, %319 : vector<2x64xf32>
    %322 = arith.divf %320, %321 : vector<2x64xf32>
    %323 = vector.extract_strided_slice %304 {offsets = [0, 128], sizes = [2, 64], strides = [1, 1]} : vector<2x192xf32> to vector<2x64xf32>
    %324 = vector.extract_strided_slice %306 {offsets = [0, 128], sizes = [2, 64], strides = [1, 1]} : vector<2x192xf32> to vector<2x64xf32>
    %325 = vector.broadcast %302 : vector<1x64xf32> to vector<2x64xf32>
    %326 = arith.addf %324, %325 : vector<2x64xf32>
    %327 = arith.mulf %314, %326 : vector<2x64xf32>
    %328 = arith.addf %323, %327 : vector<2x64xf32>
    %329 = math.tanh %328 : vector<2x64xf32>
    %cst_128 = arith.constant 1.000000e+00 : f32
    %330 = vector.broadcast %cst_128 : f32 to vector<2x64xf32>
    %331 = arith.subf %330, %322 : vector<2x64xf32>
    %332 = arith.mulf %331, %329 : vector<2x64xf32>
    %333 = arith.mulf %322, %303 : vector<2x64xf32>
    %334 = arith.addf %332, %333 : vector<2x64xf32>
    %335 = vector.extract_strided_slice %334 {offsets = [0, 0], sizes = [2, 32], strides = [1, 1]} : vector<2x64xf32> to vector<2x32xf32>
    %c0_129 = arith.constant 0 : index
    %c0_130 = arith.constant 0 : index
    %336 = vector.load %arg28[%c0_129, %c0_130] : memref<16x64xf32, #tpu.memory_space<vmem>>, vector<2x32xf32>
    tpu.vector_store %arg28[%c0_129, %c0_130], %335 {strides = array<i32>} : memref<16x64xf32, #tpu.memory_space<vmem>>, vector<2x32xf32>,
    %337 = vector.extract_strided_slice %334 {offsets = [0, 32], sizes = [2, 32], strides = [1, 1]} : vector<2x64xf32> to vector<2x32xf32>
    %c14_131 = arith.constant 14 : index
    %c32 = arith.constant 32 : index
    %338 = vector.load %arg28[%c14_131, %c32] : memref<16x64xf32, #tpu.memory_space<vmem>>, vector<2x32xf32>
    tpu.vector_store %arg28[%c14_131, %c32], %337 {strides = array<i32>} : memref<16x64xf32, #tpu.memory_space<vmem>>, vector<2x32xf32>,
    %c2_132 = arith.constant 2 : index
    %c0_133 = arith.constant 0 : index
    %339 = vector.load %arg25[%c2_132, %c0_133] : memref<16x192xf32, #tpu.memory_space<vmem>>, vector<2x192xf32>
    %340 = arith.truncf %334 : vector<2x64xf32> to vector<2x64xbf16>
    %cst_134 = arith.constant dense<0.000000e+00> : vector<2x192xf32>
    %341 = tpu.matmul %340, %301, %cst_134 {dimension_numbers = #tpu.dot_dimension_numbers<[1], [0], [0], [1], [0, 0, 1, 1], [], []>} : vector<2x64xbf16>, vector<64x192xbf16>, vector<2x192xf32> -> vector<2x192xf32>
    %342 = vector.extract_strided_slice %339 {offsets = [0, 0], sizes = [2, 64], strides = [1, 1]} : vector<2x192xf32> to vector<2x64xf32>
    %343 = vector.extract_strided_slice %341 {offsets = [0, 0], sizes = [2, 64], strides = [1, 1]} : vector<2x192xf32> to vector<2x64xf32>
    %344 = arith.addf %342, %343 : vector<2x64xf32>
    %345 = arith.negf %344 : vector<2x64xf32>
    %346 = math.exp %345 : vector<2x64xf32>
    %cst_135 = arith.constant 1.000000e+00 : f32
    %347 = vector.broadcast %cst_135 : f32 to vector<2x64xf32>
    %348 = arith.addf %347, %346 : vector<2x64xf32>
    %349 = arith.divf %347, %348 : vector<2x64xf32>
    %350 = vector.extract_strided_slice %339 {offsets = [0, 64], sizes = [2, 64], strides = [1, 1]} : vector<2x192xf32> to vector<2x64xf32>
    %351 = vector.extract_strided_slice %341 {offsets = [0, 64], sizes = [2, 64], strides = [1, 1]} : vector<2x192xf32> to vector<2x64xf32>
    %352 = arith.addf %350, %351 : vector<2x64xf32>
    %353 = arith.negf %352 : vector<2x64xf32>
    %354 = math.exp %353 : vector<2x64xf32>
    %cst_136 = arith.constant 1.000000e+00 : f32
    %355 = vector.broadcast %cst_136 : f32 to vector<2x64xf32>
    %356 = arith.addf %355, %354 : vector<2x64xf32>
    %357 = arith.divf %355, %356 : vector<2x64xf32>
    %358 = vector.extract_strided_slice %339 {offsets = [0, 128], sizes = [2, 64], strides = [1, 1]} : vector<2x192xf32> to vector<2x64xf32>
    %359 = vector.extract_strided_slice %341 {offsets = [0, 128], sizes = [2, 64], strides = [1, 1]} : vector<2x192xf32> to vector<2x64xf32>
    %360 = vector.broadcast %302 : vector<1x64xf32> to vector<2x64xf32>
    %361 = arith.addf %359, %360 : vector<2x64xf32>
    %362 = arith.mulf %349, %361 : vector<2x64xf32>
    %363 = arith.addf %358, %362 : vector<2x64xf32>
    %364 = math.tanh %363 : vector<2x64xf32>
    %cst_137 = arith.constant 1.000000e+00 : f32
    %365 = vector.broadcast %cst_137 : f32 to vector<2x64xf32>
    %366 = arith.subf %365, %357 : vector<2x64xf32>
    %367 = arith.mulf %366, %364 : vector<2x64xf32>
    %368 = arith.mulf %357, %334 : vector<2x64xf32>
    %369 = arith.addf %367, %368 : vector<2x64xf32>
    %370 = vector.extract_strided_slice %369 {offsets = [0, 0], sizes = [2, 32], strides = [1, 1]} : vector<2x64xf32> to vector<2x32xf32>
    %c2_138 = arith.constant 2 : index
    %c0_139 = arith.constant 0 : index
    %371 = vector.load %arg28[%c2_138, %c0_139] : memref<16x64xf32, #tpu.memory_space<vmem>>, vector<2x32xf32>
    tpu.vector_store %arg28[%c2_138, %c0_139], %370 {strides = array<i32>} : memref<16x64xf32, #tpu.memory_space<vmem>>, vector<2x32xf32>,
    %372 = vector.extract_strided_slice %369 {offsets = [0, 32], sizes = [2, 32], strides = [1, 1]} : vector<2x64xf32> to vector<2x32xf32>
    %c12_140 = arith.constant 12 : index
    %c32_141 = arith.constant 32 : index
    %373 = vector.load %arg28[%c12_140, %c32_141] : memref<16x64xf32, #tpu.memory_space<vmem>>, vector<2x32xf32>
    tpu.vector_store %arg28[%c12_140, %c32_141], %372 {strides = array<i32>} : memref<16x64xf32, #tpu.memory_space<vmem>>, vector<2x32xf32>,
    %c4_142 = arith.constant 4 : index
    %c0_143 = arith.constant 0 : index
    %374 = vector.load %arg25[%c4_142, %c0_143] : memref<16x192xf32, #tpu.memory_space<vmem>>, vector<2x192xf32>
    %375 = arith.truncf %369 : vector<2x64xf32> to vector<2x64xbf16>
    %cst_144 = arith.constant dense<0.000000e+00> : vector<2x192xf32>
    %376 = tpu.matmul %375, %301, %cst_144 {dimension_numbers = #tpu.dot_dimension_numbers<[1], [0], [0], [1], [0, 0, 1, 1], [], []>} : vector<2x64xbf16>, vector<64x192xbf16>, vector<2x192xf32> -> vector<2x192xf32>
    %377 = vector.extract_strided_slice %374 {offsets = [0, 0], sizes = [2, 64], strides = [1, 1]} : vector<2x192xf32> to vector<2x64xf32>
    %378 = vector.extract_strided_slice %376 {offsets = [0, 0], sizes = [2, 64], strides = [1, 1]} : vector<2x192xf32> to vector<2x64xf32>
    %379 = arith.addf %377, %378 : vector<2x64xf32>
    %380 = arith.negf %379 : vector<2x64xf32>
    %381 = math.exp %380 : vector<2x64xf32>
    %cst_145 = arith.constant 1.000000e+00 : f32
    %382 = vector.broadcast %cst_145 : f32 to vector<2x64xf32>
    %383 = arith.addf %382, %381 : vector<2x64xf32>
    %384 = arith.divf %382, %383 : vector<2x64xf32>
    %385 = vector.extract_strided_slice %374 {offsets = [0, 64], sizes = [2, 64], strides = [1, 1]} : vector<2x192xf32> to vector<2x64xf32>
    %386 = vector.extract_strided_slice %376 {offsets = [0, 64], sizes = [2, 64], strides = [1, 1]} : vector<2x192xf32> to vector<2x64xf32>
    %387 = arith.addf %385, %386 : vector<2x64xf32>
    %388 = arith.negf %387 : vector<2x64xf32>
    %389 = math.exp %388 : vector<2x64xf32>
    %cst_146 = arith.constant 1.000000e+00 : f32
    %390 = vector.broadcast %cst_146 : f32 to vector<2x64xf32>
    %391 = arith.addf %390, %389 : vector<2x64xf32>
    %392 = arith.divf %390, %391 : vector<2x64xf32>
    %393 = vector.extract_strided_slice %374 {offsets = [0, 128], sizes = [2, 64], strides = [1, 1]} : vector<2x192xf32> to vector<2x64xf32>
    %394 = vector.extract_strided_slice %376 {offsets = [0, 128], sizes = [2, 64], strides = [1, 1]} : vector<2x192xf32> to vector<2x64xf32>
    %395 = vector.broadcast %302 : vector<1x64xf32> to vector<2x64xf32>
    %396 = arith.addf %394, %395 : vector<2x64xf32>
    %397 = arith.mulf %384, %396 : vector<2x64xf32>
    %398 = arith.addf %393, %397 : vector<2x64xf32>
    %399 = math.tanh %398 : vector<2x64xf32>
    %cst_147 = arith.constant 1.000000e+00 : f32
    %400 = vector.broadcast %cst_147 : f32 to vector<2x64xf32>
    %401 = arith.subf %400, %392 : vector<2x64xf32>
    %402 = arith.mulf %401, %399 : vector<2x64xf32>
    %403 = arith.mulf %392, %369 : vector<2x64xf32>
    %404 = arith.addf %402, %403 : vector<2x64xf32>
    %405 = vector.extract_strided_slice %404 {offsets = [0, 0], sizes = [2, 32], strides = [1, 1]} : vector<2x64xf32> to vector<2x32xf32>
    %c4_148 = arith.constant 4 : index
    %c0_149 = arith.constant 0 : index
    %406 = vector.load %arg28[%c4_148, %c0_149] : memref<16x64xf32, #tpu.memory_space<vmem>>, vector<2x32xf32>
    tpu.vector_store %arg28[%c4_148, %c0_149], %405 {strides = array<i32>} : memref<16x64xf32, #tpu.memory_space<vmem>>, vector<2x32xf32>,
    %407 = vector.extract_strided_slice %404 {offsets = [0, 32], sizes = [2, 32], strides = [1, 1]} : vector<2x64xf32> to vector<2x32xf32>
    %c10_150 = arith.constant 10 : index
    %c32_151 = arith.constant 32 : index
    %408 = vector.load %arg28[%c10_150, %c32_151] : memref<16x64xf32, #tpu.memory_space<vmem>>, vector<2x32xf32>
    tpu.vector_store %arg28[%c10_150, %c32_151], %407 {strides = array<i32>} : memref<16x64xf32, #tpu.memory_space<vmem>>, vector<2x32xf32>,
    %c6_152 = arith.constant 6 : index
    %c0_153 = arith.constant 0 : index
    %409 = vector.load %arg25[%c6_152, %c0_153] : memref<16x192xf32, #tpu.memory_space<vmem>>, vector<2x192xf32>
    %410 = arith.truncf %404 : vector<2x64xf32> to vector<2x64xbf16>
    %cst_154 = arith.constant dense<0.000000e+00> : vector<2x192xf32>
    %411 = tpu.matmul %410, %301, %cst_154 {dimension_numbers = #tpu.dot_dimension_numbers<[1], [0], [0], [1], [0, 0, 1, 1], [], []>} : vector<2x64xbf16>, vector<64x192xbf16>, vector<2x192xf32> -> vector<2x192xf32>
    %412 = vector.extract_strided_slice %409 {offsets = [0, 0], sizes = [2, 64], strides = [1, 1]} : vector<2x192xf32> to vector<2x64xf32>
    %413 = vector.extract_strided_slice %411 {offsets = [0, 0], sizes = [2, 64], strides = [1, 1]} : vector<2x192xf32> to vector<2x64xf32>
    %414 = arith.addf %412, %413 : vector<2x64xf32>
    %415 = arith.negf %414 : vector<2x64xf32>
    %416 = math.exp %415 : vector<2x64xf32>
    %cst_155 = arith.constant 1.000000e+00 : f32
    %417 = vector.broadcast %cst_155 : f32 to vector<2x64xf32>
    %418 = arith.addf %417, %416 : vector<2x64xf32>
    %419 = arith.divf %417, %418 : vector<2x64xf32>
    %420 = vector.extract_strided_slice %409 {offsets = [0, 64], sizes = [2, 64], strides = [1, 1]} : vector<2x192xf32> to vector<2x64xf32>
    %421 = vector.extract_strided_slice %411 {offsets = [0, 64], sizes = [2, 64], strides = [1, 1]} : vector<2x192xf32> to vector<2x64xf32>
    %422 = arith.addf %420, %421 : vector<2x64xf32>
    %423 = arith.negf %422 : vector<2x64xf32>
    %424 = math.exp %423 : vector<2x64xf32>
    %cst_156 = arith.constant 1.000000e+00 : f32
    %425 = vector.broadcast %cst_156 : f32 to vector<2x64xf32>
    %426 = arith.addf %425, %424 : vector<2x64xf32>
    %427 = arith.divf %425, %426 : vector<2x64xf32>
    %428 = vector.extract_strided_slice %409 {offsets = [0, 128], sizes = [2, 64], strides = [1, 1]} : vector<2x192xf32> to vector<2x64xf32>
    %429 = vector.extract_strided_slice %411 {offsets = [0, 128], sizes = [2, 64], strides = [1, 1]} : vector<2x192xf32> to vector<2x64xf32>
    %430 = vector.broadcast %302 : vector<1x64xf32> to vector<2x64xf32>
    %431 = arith.addf %429, %430 : vector<2x64xf32>
    %432 = arith.mulf %419, %431 : vector<2x64xf32>
    %433 = arith.addf %428, %432 : vector<2x64xf32>
    %434 = math.tanh %433 : vector<2x64xf32>
    %cst_157 = arith.constant 1.000000e+00 : f32
    %435 = vector.broadcast %cst_157 : f32 to vector<2x64xf32>
    %436 = arith.subf %435, %427 : vector<2x64xf32>
    %437 = arith.mulf %436, %434 : vector<2x64xf32>
    %438 = arith.mulf %427, %404 : vector<2x64xf32>
    %439 = arith.addf %437, %438 : vector<2x64xf32>
    %440 = vector.extract_strided_slice %439 {offsets = [0, 0], sizes = [2, 32], strides = [1, 1]} : vector<2x64xf32> to vector<2x32xf32>
    %c6_158 = arith.constant 6 : index
    %c0_159 = arith.constant 0 : index
    %441 = vector.load %arg28[%c6_158, %c0_159] : memref<16x64xf32, #tpu.memory_space<vmem>>, vector<2x32xf32>
    tpu.vector_store %arg28[%c6_158, %c0_159], %440 {strides = array<i32>} : memref<16x64xf32, #tpu.memory_space<vmem>>, vector<2x32xf32>,
    %442 = vector.extract_strided_slice %439 {offsets = [0, 32], sizes = [2, 32], strides = [1, 1]} : vector<2x64xf32> to vector<2x32xf32>
    %c8_160 = arith.constant 8 : index
    %c32_161 = arith.constant 32 : index
    %443 = vector.load %arg28[%c8_160, %c32_161] : memref<16x64xf32, #tpu.memory_space<vmem>>, vector<2x32xf32>
    tpu.vector_store %arg28[%c8_160, %c32_161], %442 {strides = array<i32>} : memref<16x64xf32, #tpu.memory_space<vmem>>, vector<2x32xf32>,
    %c8_162 = arith.constant 8 : index
    %c0_163 = arith.constant 0 : index
    %444 = vector.load %arg25[%c8_162, %c0_163] : memref<16x192xf32, #tpu.memory_space<vmem>>, vector<2x192xf32>
    %445 = arith.truncf %439 : vector<2x64xf32> to vector<2x64xbf16>
    %cst_164 = arith.constant dense<0.000000e+00> : vector<2x192xf32>
    %446 = tpu.matmul %445, %301, %cst_164 {dimension_numbers = #tpu.dot_dimension_numbers<[1], [0], [0], [1], [0, 0, 1, 1], [], []>} : vector<2x64xbf16>, vector<64x192xbf16>, vector<2x192xf32> -> vector<2x192xf32>
    %447 = vector.extract_strided_slice %444 {offsets = [0, 0], sizes = [2, 64], strides = [1, 1]} : vector<2x192xf32> to vector<2x64xf32>
    %448 = vector.extract_strided_slice %446 {offsets = [0, 0], sizes = [2, 64], strides = [1, 1]} : vector<2x192xf32> to vector<2x64xf32>
    %449 = arith.addf %447, %448 : vector<2x64xf32>
    %450 = arith.negf %449 : vector<2x64xf32>
    %451 = math.exp %450 : vector<2x64xf32>
    %cst_165 = arith.constant 1.000000e+00 : f32
    %452 = vector.broadcast %cst_165 : f32 to vector<2x64xf32>
    %453 = arith.addf %452, %451 : vector<2x64xf32>
    %454 = arith.divf %452, %453 : vector<2x64xf32>
    %455 = vector.extract_strided_slice %444 {offsets = [0, 64], sizes = [2, 64], strides = [1, 1]} : vector<2x192xf32> to vector<2x64xf32>
    %456 = vector.extract_strided_slice %446 {offsets = [0, 64], sizes = [2, 64], strides = [1, 1]} : vector<2x192xf32> to vector<2x64xf32>
    %457 = arith.addf %455, %456 : vector<2x64xf32>
    %458 = arith.negf %457 : vector<2x64xf32>
    %459 = math.exp %458 : vector<2x64xf32>
    %cst_166 = arith.constant 1.000000e+00 : f32
    %460 = vector.broadcast %cst_166 : f32 to vector<2x64xf32>
    %461 = arith.addf %460, %459 : vector<2x64xf32>
    %462 = arith.divf %460, %461 : vector<2x64xf32>
    %463 = vector.extract_strided_slice %444 {offsets = [0, 128], sizes = [2, 64], strides = [1, 1]} : vector<2x192xf32> to vector<2x64xf32>
    %464 = vector.extract_strided_slice %446 {offsets = [0, 128], sizes = [2, 64], strides = [1, 1]} : vector<2x192xf32> to vector<2x64xf32>
    %465 = vector.broadcast %302 : vector<1x64xf32> to vector<2x64xf32>
    %466 = arith.addf %464, %465 : vector<2x64xf32>
    %467 = arith.mulf %454, %466 : vector<2x64xf32>
    %468 = arith.addf %463, %467 : vector<2x64xf32>
    %469 = math.tanh %468 : vector<2x64xf32>
    %cst_167 = arith.constant 1.000000e+00 : f32
    %470 = vector.broadcast %cst_167 : f32 to vector<2x64xf32>
    %471 = arith.subf %470, %462 : vector<2x64xf32>
    %472 = arith.mulf %471, %469 : vector<2x64xf32>
    %473 = arith.mulf %462, %439 : vector<2x64xf32>
    %474 = arith.addf %472, %473 : vector<2x64xf32>
    %475 = vector.extract_strided_slice %474 {offsets = [0, 0], sizes = [2, 32], strides = [1, 1]} : vector<2x64xf32> to vector<2x32xf32>
    %c8_168 = arith.constant 8 : index
    %c0_169 = arith.constant 0 : index
    %476 = vector.load %arg28[%c8_168, %c0_169] : memref<16x64xf32, #tpu.memory_space<vmem>>, vector<2x32xf32>
    tpu.vector_store %arg28[%c8_168, %c0_169], %475 {strides = array<i32>} : memref<16x64xf32, #tpu.memory_space<vmem>>, vector<2x32xf32>,
    %477 = vector.extract_strided_slice %474 {offsets = [0, 32], sizes = [2, 32], strides = [1, 1]} : vector<2x64xf32> to vector<2x32xf32>
    %c6_170 = arith.constant 6 : index
    %c32_171 = arith.constant 32 : index
    %478 = vector.load %arg28[%c6_170, %c32_171] : memref<16x64xf32, #tpu.memory_space<vmem>>, vector<2x32xf32>
    tpu.vector_store %arg28[%c6_170, %c32_171], %477 {strides = array<i32>} : memref<16x64xf32, #tpu.memory_space<vmem>>, vector<2x32xf32>,
    %c10_172 = arith.constant 10 : index
    %c0_173 = arith.constant 0 : index
    %479 = vector.load %arg25[%c10_172, %c0_173] : memref<16x192xf32, #tpu.memory_space<vmem>>, vector<2x192xf32>
    %480 = arith.truncf %474 : vector<2x64xf32> to vector<2x64xbf16>
    %cst_174 = arith.constant dense<0.000000e+00> : vector<2x192xf32>
    %481 = tpu.matmul %480, %301, %cst_174 {dimension_numbers = #tpu.dot_dimension_numbers<[1], [0], [0], [1], [0, 0, 1, 1], [], []>} : vector<2x64xbf16>, vector<64x192xbf16>, vector<2x192xf32> -> vector<2x192xf32>
    %482 = vector.extract_strided_slice %479 {offsets = [0, 0], sizes = [2, 64], strides = [1, 1]} : vector<2x192xf32> to vector<2x64xf32>
    %483 = vector.extract_strided_slice %481 {offsets = [0, 0], sizes = [2, 64], strides = [1, 1]} : vector<2x192xf32> to vector<2x64xf32>
    %484 = arith.addf %482, %483 : vector<2x64xf32>
    %485 = arith.negf %484 : vector<2x64xf32>
    %486 = math.exp %485 : vector<2x64xf32>
    %cst_175 = arith.constant 1.000000e+00 : f32
    %487 = vector.broadcast %cst_175 : f32 to vector<2x64xf32>
    %488 = arith.addf %487, %486 : vector<2x64xf32>
    %489 = arith.divf %487, %488 : vector<2x64xf32>
    %490 = vector.extract_strided_slice %479 {offsets = [0, 64], sizes = [2, 64], strides = [1, 1]} : vector<2x192xf32> to vector<2x64xf32>
    %491 = vector.extract_strided_slice %481 {offsets = [0, 64], sizes = [2, 64], strides = [1, 1]} : vector<2x192xf32> to vector<2x64xf32>
    %492 = arith.addf %490, %491 : vector<2x64xf32>
    %493 = arith.negf %492 : vector<2x64xf32>
    %494 = math.exp %493 : vector<2x64xf32>
    %cst_176 = arith.constant 1.000000e+00 : f32
    %495 = vector.broadcast %cst_176 : f32 to vector<2x64xf32>
    %496 = arith.addf %495, %494 : vector<2x64xf32>
    %497 = arith.divf %495, %496 : vector<2x64xf32>
    %498 = vector.extract_strided_slice %479 {offsets = [0, 128], sizes = [2, 64], strides = [1, 1]} : vector<2x192xf32> to vector<2x64xf32>
    %499 = vector.extract_strided_slice %481 {offsets = [0, 128], sizes = [2, 64], strides = [1, 1]} : vector<2x192xf32> to vector<2x64xf32>
    %500 = vector.broadcast %302 : vector<1x64xf32> to vector<2x64xf32>
    %501 = arith.addf %499, %500 : vector<2x64xf32>
    %502 = arith.mulf %489, %501 : vector<2x64xf32>
    %503 = arith.addf %498, %502 : vector<2x64xf32>
    %504 = math.tanh %503 : vector<2x64xf32>
    %cst_177 = arith.constant 1.000000e+00 : f32
    %505 = vector.broadcast %cst_177 : f32 to vector<2x64xf32>
    %506 = arith.subf %505, %497 : vector<2x64xf32>
    %507 = arith.mulf %506, %504 : vector<2x64xf32>
    %508 = arith.mulf %497, %474 : vector<2x64xf32>
    %509 = arith.addf %507, %508 : vector<2x64xf32>
    %510 = vector.extract_strided_slice %509 {offsets = [0, 0], sizes = [2, 32], strides = [1, 1]} : vector<2x64xf32> to vector<2x32xf32>
    %c10_178 = arith.constant 10 : index
    %c0_179 = arith.constant 0 : index
    %511 = vector.load %arg28[%c10_178, %c0_179] : memref<16x64xf32, #tpu.memory_space<vmem>>, vector<2x32xf32>
    tpu.vector_store %arg28[%c10_178, %c0_179], %510 {strides = array<i32>} : memref<16x64xf32, #tpu.memory_space<vmem>>, vector<2x32xf32>,
    %512 = vector.extract_strided_slice %509 {offsets = [0, 32], sizes = [2, 32], strides = [1, 1]} : vector<2x64xf32> to vector<2x32xf32>
    %c4_180 = arith.constant 4 : index
    %c32_181 = arith.constant 32 : index
    %513 = vector.load %arg28[%c4_180, %c32_181] : memref<16x64xf32, #tpu.memory_space<vmem>>, vector<2x32xf32>
    tpu.vector_store %arg28[%c4_180, %c32_181], %512 {strides = array<i32>} : memref<16x64xf32, #tpu.memory_space<vmem>>, vector<2x32xf32>,
    %c12_182 = arith.constant 12 : index
    %c0_183 = arith.constant 0 : index
    %514 = vector.load %arg25[%c12_182, %c0_183] : memref<16x192xf32, #tpu.memory_space<vmem>>, vector<2x192xf32>
    %515 = arith.truncf %509 : vector<2x64xf32> to vector<2x64xbf16>
    %cst_184 = arith.constant dense<0.000000e+00> : vector<2x192xf32>
    %516 = tpu.matmul %515, %301, %cst_184 {dimension_numbers = #tpu.dot_dimension_numbers<[1], [0], [0], [1], [0, 0, 1, 1], [], []>} : vector<2x64xbf16>, vector<64x192xbf16>, vector<2x192xf32> -> vector<2x192xf32>
    %517 = vector.extract_strided_slice %514 {offsets = [0, 0], sizes = [2, 64], strides = [1, 1]} : vector<2x192xf32> to vector<2x64xf32>
    %518 = vector.extract_strided_slice %516 {offsets = [0, 0], sizes = [2, 64], strides = [1, 1]} : vector<2x192xf32> to vector<2x64xf32>
    %519 = arith.addf %517, %518 : vector<2x64xf32>
    %520 = arith.negf %519 : vector<2x64xf32>
    %521 = math.exp %520 : vector<2x64xf32>
    %cst_185 = arith.constant 1.000000e+00 : f32
    %522 = vector.broadcast %cst_185 : f32 to vector<2x64xf32>
    %523 = arith.addf %522, %521 : vector<2x64xf32>
    %524 = arith.divf %522, %523 : vector<2x64xf32>
    %525 = vector.extract_strided_slice %514 {offsets = [0, 64], sizes = [2, 64], strides = [1, 1]} : vector<2x192xf32> to vector<2x64xf32>
    %526 = vector.extract_strided_slice %516 {offsets = [0, 64], sizes = [2, 64], strides = [1, 1]} : vector<2x192xf32> to vector<2x64xf32>
    %527 = arith.addf %525, %526 : vector<2x64xf32>
    %528 = arith.negf %527 : vector<2x64xf32>
    %529 = math.exp %528 : vector<2x64xf32>
    %cst_186 = arith.constant 1.000000e+00 : f32
    %530 = vector.broadcast %cst_186 : f32 to vector<2x64xf32>
    %531 = arith.addf %530, %529 : vector<2x64xf32>
    %532 = arith.divf %530, %531 : vector<2x64xf32>
    %533 = vector.extract_strided_slice %514 {offsets = [0, 128], sizes = [2, 64], strides = [1, 1]} : vector<2x192xf32> to vector<2x64xf32>
    %534 = vector.extract_strided_slice %516 {offsets = [0, 128], sizes = [2, 64], strides = [1, 1]} : vector<2x192xf32> to vector<2x64xf32>
    %535 = vector.broadcast %302 : vector<1x64xf32> to vector<2x64xf32>
    %536 = arith.addf %534, %535 : vector<2x64xf32>
    %537 = arith.mulf %524, %536 : vector<2x64xf32>
    %538 = arith.addf %533, %537 : vector<2x64xf32>
    %539 = math.tanh %538 : vector<2x64xf32>
    %cst_187 = arith.constant 1.000000e+00 : f32
    %540 = vector.broadcast %cst_187 : f32 to vector<2x64xf32>
    %541 = arith.subf %540, %532 : vector<2x64xf32>
    %542 = arith.mulf %541, %539 : vector<2x64xf32>
    %543 = arith.mulf %532, %509 : vector<2x64xf32>
    %544 = arith.addf %542, %543 : vector<2x64xf32>
    %545 = vector.extract_strided_slice %544 {offsets = [0, 0], sizes = [2, 32], strides = [1, 1]} : vector<2x64xf32> to vector<2x32xf32>
    %c12_188 = arith.constant 12 : index
    %c0_189 = arith.constant 0 : index
    %546 = vector.load %arg28[%c12_188, %c0_189] : memref<16x64xf32, #tpu.memory_space<vmem>>, vector<2x32xf32>
    tpu.vector_store %arg28[%c12_188, %c0_189], %545 {strides = array<i32>} : memref<16x64xf32, #tpu.memory_space<vmem>>, vector<2x32xf32>,
    %547 = vector.extract_strided_slice %544 {offsets = [0, 32], sizes = [2, 32], strides = [1, 1]} : vector<2x64xf32> to vector<2x32xf32>
    %c2_190 = arith.constant 2 : index
    %c32_191 = arith.constant 32 : index
    %548 = vector.load %arg28[%c2_190, %c32_191] : memref<16x64xf32, #tpu.memory_space<vmem>>, vector<2x32xf32>
    tpu.vector_store %arg28[%c2_190, %c32_191], %547 {strides = array<i32>} : memref<16x64xf32, #tpu.memory_space<vmem>>, vector<2x32xf32>,
    %c14_192 = arith.constant 14 : index
    %c0_193 = arith.constant 0 : index
    %549 = vector.load %arg25[%c14_192, %c0_193] : memref<16x192xf32, #tpu.memory_space<vmem>>, vector<2x192xf32>
    %550 = arith.truncf %544 : vector<2x64xf32> to vector<2x64xbf16>
    %cst_194 = arith.constant dense<0.000000e+00> : vector<2x192xf32>
    %551 = tpu.matmul %550, %301, %cst_194 {dimension_numbers = #tpu.dot_dimension_numbers<[1], [0], [0], [1], [0, 0, 1, 1], [], []>} : vector<2x64xbf16>, vector<64x192xbf16>, vector<2x192xf32> -> vector<2x192xf32>
    %552 = vector.extract_strided_slice %549 {offsets = [0, 0], sizes = [2, 64], strides = [1, 1]} : vector<2x192xf32> to vector<2x64xf32>
    %553 = vector.extract_strided_slice %551 {offsets = [0, 0], sizes = [2, 64], strides = [1, 1]} : vector<2x192xf32> to vector<2x64xf32>
    %554 = arith.addf %552, %553 : vector<2x64xf32>
    %555 = arith.negf %554 : vector<2x64xf32>
    %556 = math.exp %555 : vector<2x64xf32>
    %cst_195 = arith.constant 1.000000e+00 : f32
    %557 = vector.broadcast %cst_195 : f32 to vector<2x64xf32>
    %558 = arith.addf %557, %556 : vector<2x64xf32>
    %559 = arith.divf %557, %558 : vector<2x64xf32>
    %560 = vector.extract_strided_slice %549 {offsets = [0, 64], sizes = [2, 64], strides = [1, 1]} : vector<2x192xf32> to vector<2x64xf32>
    %561 = vector.extract_strided_slice %551 {offsets = [0, 64], sizes = [2, 64], strides = [1, 1]} : vector<2x192xf32> to vector<2x64xf32>
    %562 = arith.addf %560, %561 : vector<2x64xf32>
    %563 = arith.negf %562 : vector<2x64xf32>
    %564 = math.exp %563 : vector<2x64xf32>
    %cst_196 = arith.constant 1.000000e+00 : f32
    %565 = vector.broadcast %cst_196 : f32 to vector<2x64xf32>
    %566 = arith.addf %565, %564 : vector<2x64xf32>
    %567 = arith.divf %565, %566 : vector<2x64xf32>
    %568 = vector.extract_strided_slice %549 {offsets = [0, 128], sizes = [2, 64], strides = [1, 1]} : vector<2x192xf32> to vector<2x64xf32>
    %569 = vector.extract_strided_slice %551 {offsets = [0, 128], sizes = [2, 64], strides = [1, 1]} : vector<2x192xf32> to vector<2x64xf32>
    %570 = vector.broadcast %302 : vector<1x64xf32> to vector<2x64xf32>
    %571 = arith.addf %569, %570 : vector<2x64xf32>
    %572 = arith.mulf %559, %571 : vector<2x64xf32>
    %573 = arith.addf %568, %572 : vector<2x64xf32>
    %574 = math.tanh %573 : vector<2x64xf32>
    %cst_197 = arith.constant 1.000000e+00 : f32
    %575 = vector.broadcast %cst_197 : f32 to vector<2x64xf32>
    %576 = arith.subf %575, %567 : vector<2x64xf32>
    %577 = arith.mulf %576, %574 : vector<2x64xf32>
    %578 = arith.mulf %567, %544 : vector<2x64xf32>
    %579 = arith.addf %577, %578 : vector<2x64xf32>
    %580 = vector.extract_strided_slice %579 {offsets = [0, 0], sizes = [2, 32], strides = [1, 1]} : vector<2x64xf32> to vector<2x32xf32>
    %c14_198 = arith.constant 14 : index
    %c0_199 = arith.constant 0 : index
    %581 = vector.load %arg28[%c14_198, %c0_199] : memref<16x64xf32, #tpu.memory_space<vmem>>, vector<2x32xf32>
    tpu.vector_store %arg28[%c14_198, %c0_199], %580 {strides = array<i32>} : memref<16x64xf32, #tpu.memory_space<vmem>>, vector<2x32xf32>,
    %582 = vector.extract_strided_slice %579 {offsets = [0, 32], sizes = [2, 32], strides = [1, 1]} : vector<2x64xf32> to vector<2x32xf32>
    %c0_200 = arith.constant 0 : index
    %c32_201 = arith.constant 32 : index
    %583 = vector.load %arg28[%c0_200, %c32_201] : memref<16x64xf32, #tpu.memory_space<vmem>>, vector<2x32xf32>
    tpu.vector_store %arg28[%c0_200, %c32_201], %582 {strides = array<i32>} : memref<16x64xf32, #tpu.memory_space<vmem>>, vector<2x32xf32>,
    %c0_202 = arith.constant 0 : index
    %c0_203 = arith.constant 0 : index
    %584 = vector.load %arg28[%c0_202, %c0_203] : memref<16x64xf32, #tpu.memory_space<vmem>>, vector<16x64xf32>
    %cst_204 = arith.constant dense<0.000000e+00> : vector<16xf32>
    %585 = vector.multi_reduction <add>, %584, %cst_204 [1] : vector<16x64xf32> to vector<16xf32>
    %586 = vector.shape_cast %585 : vector<16xf32> to vector<16x1xf32>
    %cst_205 = arith.constant 6.400000e+01 : f32
    %587 = vector.broadcast %cst_205 : f32 to vector<16x1xf32>
    %588 = arith.divf %586, %587 : vector<16x1xf32>
    %589 = vector.broadcast %588 : vector<16x1xf32> to vector<16x64xf32>
    %590 = arith.subf %584, %589 : vector<16x64xf32>
    %591 = arith.mulf %590, %590 : vector<16x64xf32>
    %cst_206 = arith.constant dense<0.000000e+00> : vector<16xf32>
    %592 = vector.multi_reduction <add>, %591, %cst_206 [1] : vector<16x64xf32> to vector<16xf32>
    %593 = vector.shape_cast %592 : vector<16xf32> to vector<16x1xf32>
    %cst_207 = arith.constant 6.400000e+01 : f32
    %594 = vector.broadcast %cst_207 : f32 to vector<16x1xf32>
    %595 = arith.divf %593, %594 : vector<16x1xf32>
    %596 = vector.broadcast %588 : vector<16x1xf32> to vector<16x64xf32>
    %597 = arith.subf %584, %596 : vector<16x64xf32>
    %cst_208 = arith.constant 9.99999974E-6 : f32
    %598 = vector.broadcast %cst_208 : f32 to vector<16x1xf32>
    %599 = arith.addf %595, %598 : vector<16x1xf32>
    %600 = math.rsqrt %599 : vector<16x1xf32>
    %601 = vector.broadcast %600 : vector<16x1xf32> to vector<16x64xf32>
    %602 = arith.mulf %597, %601 : vector<16x64xf32>
    %c0_209 = arith.constant 0 : index
    %c0_210 = arith.constant 0 : index
    %603 = vector.load %arg11[%c0_209, %c0_210] : memref<1x64xf32, #tpu.memory_space<vmem>>, vector<1x64xf32>
    %604 = vector.broadcast %603 : vector<1x64xf32> to vector<16x64xf32>
    %605 = arith.mulf %602, %604 : vector<16x64xf32>
    %c0_211 = arith.constant 0 : index
    %c0_212 = arith.constant 0 : index
    %606 = vector.load %arg12[%c0_211, %c0_212] : memref<1x64xf32, #tpu.memory_space<vmem>>, vector<1x64xf32>
    %607 = vector.broadcast %606 : vector<1x64xf32> to vector<16x64xf32>
    %608 = arith.addf %605, %607 : vector<16x64xf32>
    %cst_213 = arith.constant 0.000000e+00 : f32
    %609 = vector.broadcast %cst_213 : f32 to vector<16x64xf32>
    %610 = arith.cmpf oge, %608, %609 : vector<16x64xf32>
    %cst_214 = arith.constant 0.00999999977 : f32
    %611 = vector.broadcast %cst_214 : f32 to vector<16x64xf32>
    %612 = arith.mulf %611, %608 : vector<16x64xf32>
    %613 = arith.select %610, %608, %612 : vector<16x64xi1>, vector<16x64xf32>
    %614 = arith.truncf %613 : vector<16x64xf32> to vector<16x64xbf16>
    %c0_215 = arith.constant 0 : index
    %c0_216 = arith.constant 0 : index
    %615 = vector.load %arg13[%c0_215, %c0_216] : memref<64x32xbf16, #tpu.memory_space<vmem>>, vector<64x32xbf16>
    %cst_217 = arith.constant dense<0.000000e+00> : vector<16x32xf32>
    %616 = tpu.matmul %614, %615, %cst_217 {dimension_numbers = #tpu.dot_dimension_numbers<[1], [0], [0], [1], [0, 0, 1, 1], [], []>} : vector<16x64xbf16>, vector<64x32xbf16>, vector<16x32xf32> -> vector<16x32xf32>
    %c0_218 = arith.constant 0 : index
    %c0_219 = arith.constant 0 : index
    %617 = vector.load %arg14[%c0_218, %c0_219] : memref<1x32xf32, #tpu.memory_space<vmem>>, vector<1x32xf32>
    %618 = vector.broadcast %617 : vector<1x32xf32> to vector<16x32xf32>
    %619 = arith.addf %616, %618 : vector<16x32xf32>
    %cst_220 = arith.constant dense<0.000000e+00> : vector<16xf32>
    %620 = vector.multi_reduction <add>, %619, %cst_220 [1] : vector<16x32xf32> to vector<16xf32>
    %621 = vector.shape_cast %620 : vector<16xf32> to vector<16x1xf32>
    %cst_221 = arith.constant 3.200000e+01 : f32
    %622 = vector.broadcast %cst_221 : f32 to vector<16x1xf32>
    %623 = arith.divf %621, %622 : vector<16x1xf32>
    %624 = vector.broadcast %623 : vector<16x1xf32> to vector<16x32xf32>
    %625 = arith.subf %619, %624 : vector<16x32xf32>
    %626 = arith.mulf %625, %625 : vector<16x32xf32>
    %cst_222 = arith.constant dense<0.000000e+00> : vector<16xf32>
    %627 = vector.multi_reduction <add>, %626, %cst_222 [1] : vector<16x32xf32> to vector<16xf32>
    %628 = vector.shape_cast %627 : vector<16xf32> to vector<16x1xf32>
    %cst_223 = arith.constant 3.200000e+01 : f32
    %629 = vector.broadcast %cst_223 : f32 to vector<16x1xf32>
    %630 = arith.divf %628, %629 : vector<16x1xf32>
    %631 = vector.broadcast %623 : vector<16x1xf32> to vector<16x32xf32>
    %632 = arith.subf %619, %631 : vector<16x32xf32>
    %cst_224 = arith.constant 9.99999974E-6 : f32
    %633 = vector.broadcast %cst_224 : f32 to vector<16x1xf32>
    %634 = arith.addf %630, %633 : vector<16x1xf32>
    %635 = math.rsqrt %634 : vector<16x1xf32>
    %636 = vector.broadcast %635 : vector<16x1xf32> to vector<16x32xf32>
    %637 = arith.mulf %632, %636 : vector<16x32xf32>
    %c0_225 = arith.constant 0 : index
    %c0_226 = arith.constant 0 : index
    %638 = vector.load %arg15[%c0_225, %c0_226] : memref<1x32xf32, #tpu.memory_space<vmem>>, vector<1x32xf32>
    %639 = vector.broadcast %638 : vector<1x32xf32> to vector<16x32xf32>
    %640 = arith.mulf %637, %639 : vector<16x32xf32>
    %c0_227 = arith.constant 0 : index
    %c0_228 = arith.constant 0 : index
    %641 = vector.load %arg16[%c0_227, %c0_228] : memref<1x32xf32, #tpu.memory_space<vmem>>, vector<1x32xf32>
    %642 = vector.broadcast %641 : vector<1x32xf32> to vector<16x32xf32>
    %643 = arith.addf %640, %642 : vector<16x32xf32>
    %cst_229 = arith.constant 0.000000e+00 : f32
    %644 = vector.broadcast %cst_229 : f32 to vector<16x32xf32>
    %645 = arith.cmpf oge, %643, %644 : vector<16x32xf32>
    %cst_230 = arith.constant 0.00999999977 : f32
    %646 = vector.broadcast %cst_230 : f32 to vector<16x32xf32>
    %647 = arith.mulf %646, %643 : vector<16x32xf32>
    %648 = arith.select %645, %643, %647 : vector<16x32xi1>, vector<16x32xf32>
    %649 = arith.truncf %648 : vector<16x32xf32> to vector<16x32xbf16>
    %c0_231 = arith.constant 0 : index
    %c0_232 = arith.constant 0 : index
    %650 = vector.load %arg17[%c0_231, %c0_232] : memref<32x16xbf16, #tpu.memory_space<vmem>>, vector<32x16xbf16>
    %cst_233 = arith.constant dense<0.000000e+00> : vector<16x16xf32>
    %651 = tpu.matmul %649, %650, %cst_233 {dimension_numbers = #tpu.dot_dimension_numbers<[1], [0], [0], [1], [0, 0, 1, 1], [], []>} : vector<16x32xbf16>, vector<32x16xbf16>, vector<16x16xf32> -> vector<16x16xf32>
    %c0_234 = arith.constant 0 : index
    %c0_235 = arith.constant 0 : index
    %652 = vector.load %arg18[%c0_234, %c0_235] : memref<1x16xf32, #tpu.memory_space<vmem>>, vector<1x16xf32>
    %653 = vector.broadcast %652 : vector<1x16xf32> to vector<16x16xf32>
    %654 = arith.addf %651, %653 : vector<16x16xf32>
    %cst_236 = arith.constant dense<0.000000e+00> : vector<16xf32>
    %655 = vector.multi_reduction <add>, %654, %cst_236 [1] : vector<16x16xf32> to vector<16xf32>
    %656 = vector.shape_cast %655 : vector<16xf32> to vector<16x1xf32>
    %cst_237 = arith.constant 1.600000e+01 : f32
    %657 = vector.broadcast %cst_237 : f32 to vector<16x1xf32>
    %658 = arith.divf %656, %657 : vector<16x1xf32>
    %659 = vector.broadcast %658 : vector<16x1xf32> to vector<16x16xf32>
    %660 = arith.subf %654, %659 : vector<16x16xf32>
    %661 = arith.mulf %660, %660 : vector<16x16xf32>
    %cst_238 = arith.constant dense<0.000000e+00> : vector<16xf32>
    %662 = vector.multi_reduction <add>, %661, %cst_238 [1] : vector<16x16xf32> to vector<16xf32>
    %663 = vector.shape_cast %662 : vector<16xf32> to vector<16x1xf32>
    %cst_239 = arith.constant 1.600000e+01 : f32
    %664 = vector.broadcast %cst_239 : f32 to vector<16x1xf32>
    %665 = arith.divf %663, %664 : vector<16x1xf32>
    %666 = vector.broadcast %658 : vector<16x1xf32> to vector<16x16xf32>
    %667 = arith.subf %654, %666 : vector<16x16xf32>
    %cst_240 = arith.constant 9.99999974E-6 : f32
    %668 = vector.broadcast %cst_240 : f32 to vector<16x1xf32>
    %669 = arith.addf %665, %668 : vector<16x1xf32>
    %670 = math.rsqrt %669 : vector<16x1xf32>
    %671 = vector.broadcast %670 : vector<16x1xf32> to vector<16x16xf32>
    %672 = arith.mulf %667, %671 : vector<16x16xf32>
    %c0_241 = arith.constant 0 : index
    %c0_242 = arith.constant 0 : index
    %673 = vector.load %arg19[%c0_241, %c0_242] : memref<1x16xf32, #tpu.memory_space<vmem>>, vector<1x16xf32>
    %674 = vector.broadcast %673 : vector<1x16xf32> to vector<16x16xf32>
    %675 = arith.mulf %672, %674 : vector<16x16xf32>
    %c0_243 = arith.constant 0 : index
    %c0_244 = arith.constant 0 : index
    %676 = vector.load %arg20[%c0_243, %c0_244] : memref<1x16xf32, #tpu.memory_space<vmem>>, vector<1x16xf32>
    %677 = vector.broadcast %676 : vector<1x16xf32> to vector<16x16xf32>
    %678 = arith.addf %675, %677 : vector<16x16xf32>
    %cst_245 = arith.constant 0.000000e+00 : f32
    %679 = vector.broadcast %cst_245 : f32 to vector<16x16xf32>
    %680 = arith.cmpf oge, %678, %679 : vector<16x16xf32>
    %cst_246 = arith.constant 0.00999999977 : f32
    %681 = vector.broadcast %cst_246 : f32 to vector<16x16xf32>
    %682 = arith.mulf %681, %678 : vector<16x16xf32>
    %683 = arith.select %680, %678, %682 : vector<16x16xi1>, vector<16x16xf32>
    %cst_247 = arith.constant dense<0.000000e+00> : vector<16xf32>
    %684 = vector.multi_reduction <add>, %683, %cst_247 [1] : vector<16x16xf32> to vector<16xf32>
    %685 = vector.shape_cast %684 : vector<16xf32> to vector<16x1xf32>
    %cst_248 = arith.constant 1.600000e+01 : f32
    %686 = vector.broadcast %cst_248 : f32 to vector<16x1xf32>
    %687 = arith.divf %685, %686 : vector<16x1xf32>
    %688 = vector.broadcast %687 : vector<16x1xf32> to vector<16x16xf32>
    %689 = arith.subf %683, %688 : vector<16x16xf32>
    %690 = arith.mulf %689, %689 : vector<16x16xf32>
    %cst_249 = arith.constant dense<0.000000e+00> : vector<16xf32>
    %691 = vector.multi_reduction <add>, %690, %cst_249 [1] : vector<16x16xf32> to vector<16xf32>
    %692 = vector.shape_cast %691 : vector<16xf32> to vector<16x1xf32>
    %cst_250 = arith.constant 1.600000e+01 : f32
    %693 = vector.broadcast %cst_250 : f32 to vector<16x1xf32>
    %694 = arith.divf %692, %693 : vector<16x1xf32>
    %695 = vector.broadcast %687 : vector<16x1xf32> to vector<16x16xf32>
    %696 = arith.subf %683, %695 : vector<16x16xf32>
    %cst_251 = arith.constant 9.99999974E-6 : f32
    %697 = vector.broadcast %cst_251 : f32 to vector<16x1xf32>
    %698 = arith.addf %694, %697 : vector<16x1xf32>
    %699 = math.rsqrt %698 : vector<16x1xf32>
    %700 = vector.broadcast %699 : vector<16x1xf32> to vector<16x16xf32>
    %701 = arith.mulf %696, %700 : vector<16x16xf32>
    %c0_252 = arith.constant 0 : index
    %c0_253 = arith.constant 0 : index
    %702 = vector.load %arg21[%c0_252, %c0_253] : memref<1x16xf32, #tpu.memory_space<vmem>>, vector<1x16xf32>
    %703 = vector.broadcast %702 : vector<1x16xf32> to vector<16x16xf32>
    %704 = arith.mulf %701, %703 : vector<16x16xf32>
    %c0_254 = arith.constant 0 : index
    %c0_255 = arith.constant 0 : index
    %705 = vector.load %arg22[%c0_254, %c0_255] : memref<1x16xf32, #tpu.memory_space<vmem>>, vector<1x16xf32>
    %706 = vector.broadcast %705 : vector<1x16xf32> to vector<16x16xf32>
    %707 = arith.addf %704, %706 : vector<16x16xf32>
    %c0_256 = arith.constant 0 : index
    %c0_257 = arith.constant 0 : index
    %708 = vector.load %arg29[%c0_256, %c0_257] : memref<16x16xf32, #tpu.memory_space<vmem>>, vector<16x16xf32>
    tpu.vector_store %arg29[%c0_256, %c0_257], %707 {strides = array<i32>} : memref<16x16xf32, #tpu.memory_space<vmem>>, vector<16x16xf32>,
    %c0_258 = arith.constant 0 : index
    %c0_259 = arith.constant 0 : index
    %709 = vector.load %arg29[%c0_258, %c0_259] : memref<16x16xf32, #tpu.memory_space<vmem>>, vector<2x16xf32>
    %c0_260 = arith.constant 0 : index
    %c0_261 = arith.constant 0 : index
    %710 = vector.load %arg23[%c0_260, %c0_261] : memref<2x128xf32, #tpu.memory_space<vmem>>, vector<2x16xf32>
    tpu.vector_store %arg23[%c0_260, %c0_261], %709 {strides = array<i32>} : memref<2x128xf32, #tpu.memory_space<vmem>>, vector<2x16xf32>,
    %c2_262 = arith.constant 2 : index
    %c0_263 = arith.constant 0 : index
    %711 = vector.load %arg29[%c2_262, %c0_263] : memref<16x16xf32, #tpu.memory_space<vmem>>, vector<2x16xf32>
    %c0_264 = arith.constant 0 : index
    %c16 = arith.constant 16 : index
    %712 = vector.load %arg23[%c0_264, %c16] : memref<2x128xf32, #tpu.memory_space<vmem>>, vector<2x16xf32>
    tpu.vector_store %arg23[%c0_264, %c16], %711 {strides = array<i32>} : memref<2x128xf32, #tpu.memory_space<vmem>>, vector<2x16xf32>,
    %c4_265 = arith.constant 4 : index
    %c0_266 = arith.constant 0 : index
    %713 = vector.load %arg29[%c4_265, %c0_266] : memref<16x16xf32, #tpu.memory_space<vmem>>, vector<2x16xf32>
    %c0_267 = arith.constant 0 : index
    %c32_268 = arith.constant 32 : index
    %714 = vector.load %arg23[%c0_267, %c32_268] : memref<2x128xf32, #tpu.memory_space<vmem>>, vector<2x16xf32>
    tpu.vector_store %arg23[%c0_267, %c32_268], %713 {strides = array<i32>} : memref<2x128xf32, #tpu.memory_space<vmem>>, vector<2x16xf32>,
    %c6_269 = arith.constant 6 : index
    %c0_270 = arith.constant 0 : index
    %715 = vector.load %arg29[%c6_269, %c0_270] : memref<16x16xf32, #tpu.memory_space<vmem>>, vector<2x16xf32>
    %c0_271 = arith.constant 0 : index
    %c48 = arith.constant 48 : index
    %716 = vector.load %arg23[%c0_271, %c48] : memref<2x128xf32, #tpu.memory_space<vmem>>, vector<2x16xf32>
    tpu.vector_store %arg23[%c0_271, %c48], %715 {strides = array<i32>} : memref<2x128xf32, #tpu.memory_space<vmem>>, vector<2x16xf32>,
    %c8_272 = arith.constant 8 : index
    %c0_273 = arith.constant 0 : index
    %717 = vector.load %arg29[%c8_272, %c0_273] : memref<16x16xf32, #tpu.memory_space<vmem>>, vector<2x16xf32>
    %c0_274 = arith.constant 0 : index
    %c64 = arith.constant 64 : index
    %718 = vector.load %arg23[%c0_274, %c64] : memref<2x128xf32, #tpu.memory_space<vmem>>, vector<2x16xf32>
    tpu.vector_store %arg23[%c0_274, %c64], %717 {strides = array<i32>} : memref<2x128xf32, #tpu.memory_space<vmem>>, vector<2x16xf32>,
    %c10_275 = arith.constant 10 : index
    %c0_276 = arith.constant 0 : index
    %719 = vector.load %arg29[%c10_275, %c0_276] : memref<16x16xf32, #tpu.memory_space<vmem>>, vector<2x16xf32>
    %c0_277 = arith.constant 0 : index
    %c80 = arith.constant 80 : index
    %720 = vector.load %arg23[%c0_277, %c80] : memref<2x128xf32, #tpu.memory_space<vmem>>, vector<2x16xf32>
    tpu.vector_store %arg23[%c0_277, %c80], %719 {strides = array<i32>} : memref<2x128xf32, #tpu.memory_space<vmem>>, vector<2x16xf32>,
    %c12_278 = arith.constant 12 : index
    %c0_279 = arith.constant 0 : index
    %721 = vector.load %arg29[%c12_278, %c0_279] : memref<16x16xf32, #tpu.memory_space<vmem>>, vector<2x16xf32>
    %c0_280 = arith.constant 0 : index
    %c96 = arith.constant 96 : index
    %722 = vector.load %arg23[%c0_280, %c96] : memref<2x128xf32, #tpu.memory_space<vmem>>, vector<2x16xf32>
    tpu.vector_store %arg23[%c0_280, %c96], %721 {strides = array<i32>} : memref<2x128xf32, #tpu.memory_space<vmem>>, vector<2x16xf32>,
    %c14_281 = arith.constant 14 : index
    %c0_282 = arith.constant 0 : index
    %723 = vector.load %arg29[%c14_281, %c0_282] : memref<16x16xf32, #tpu.memory_space<vmem>>, vector<2x16xf32>
    %c0_283 = arith.constant 0 : index
    %c112 = arith.constant 112 : index
    %724 = vector.load %arg23[%c0_283, %c112] : memref<2x128xf32, #tpu.memory_space<vmem>>, vector<2x16xf32>
    tpu.vector_store %arg23[%c0_283, %c112], %723 {strides = array<i32>} : memref<2x128xf32, #tpu.memory_space<vmem>>, vector<2x16xf32>,
    return
  }
}

</mosaic_0001>

<bundles_post_ra>
// kernel: forward_pallas.1
= control target key start
LH: loop header
LB: loop body
LE: loop exit
PB: predicated region body
PF: predicated region fallthrough
CT: control target
= control target key end

     0   :  { %s3773_s0 = inlined_call_operand.vmem [shape: f32[16,20], index: 0, kind: input, shape index: {}]   ;;  %s3774_s1 = inlined_call_operand.vmem [shape: bf16[20,192], index: 1, kind: input, shape index: {}]   ;;  %s3775_s2 = inlined_call_operand.vmem [shape: bf16[20,192], index: 2, kind: input, shape index: {}]   ;;  %s3776_s3 = inlined_call_operand.vmem [shape: bf16[64,192], index: 3, kind: input, shape index: {}]   ;;  %s3777_s4 = inlined_call_operand.hbm [shape: f32[1,192], index: 4, kind: input, shape index: {}]   ;;  %s3778_s5 = inlined_call_operand.hbm [shape: f32[1,64], index: 5, kind: input, shape index: {}]   ;;  %s3779_s6 = inlined_call_operand.hbm [shape: bf16[64,192], index: 6, kind: input, shape index: {}]   ;;  %s3780_s7 = inlined_call_operand.hbm [shape: bf16[64,192], index: 7, kind: input, shape index: {}]   ;;  %s3781_s8 = inlined_call_operand.hbm [shape: bf16[64,192], index: 8, kind: input, shape index: {}]   ;;  %s3782_s9 = inlined_call_operand.hbm [shape: f32[1,192], index: 9, kind: input, shape index: {}]   ;;  %s3783_s10 = inlined_call_operand.hbm [shape: f32[1,64], index: 10, kind: input, shape index: {}]   ;;  %s3784_s11 = inlined_call_operand.hbm [shape: f32[1,64], index: 11, kind: input, shape index: {}]   ;;  %s3785_s12 = inlined_call_operand.hbm [shape: f32[1,64], index: 12, kind: input, shape index: {}]   ;;  %s3786_s13 = inlined_call_operand.vmem [shape: bf16[64,32], index: 13, kind: input, shape index: {}]   ;;  %s3787_s14 = inlined_call_operand.hbm [shape: f32[1,32], index: 14, kind: input, shape index: {}]   ;;  %s3788_s15 = inlined_call_operand.hbm [shape: f32[1,32], index: 15, kind: input, shape index: {}]   ;;  %s3789_s16 = inlined_call_operand.hbm [shape: f32[1,32], index: 16, kind: input, shape index: {}]   ;;  %s3790_s17 = inlined_call_operand.vmem [shape: bf16[32,16], index: 17, kind: input, shape index: {}]   ;;  %s3791_s18 = inlined_call_operand.vmem [shape: f32[1,16], index: 18, kind: input, shape index: {}]   ;;  %s3792_s19 = inlined_call_operand.vmem [shape: f32[1,16], index: 19, kind: input, shape index: {}]   ;;  %s3793_s20 = inlined_call_operand.vmem [shape: f32[1,16], index: 20, kind: input, shape index: {}]   ;;  %s3794_s21 = inlined_call_operand.vmem [shape: f32[1,16], index: 21, kind: input, shape index: {}]   ;;  %s3795_s22 = inlined_call_operand.vmem [shape: f32[1,16], index: 22, kind: input, shape index: {}]   ;;  %s3796_s23 = inlined_call_operand.vmem [shape: f32[2,128], index: 23, kind: output, shape index: {}]  }
   0x1   :  { %3801 = sst [smem:[#allocation34_spill]] %s3773_s0 }
   0x2   :  { %3802 = sst [smem:[#allocation35_spill]] %s3774_s1 }
   0x3   :  { %3803 = sst [smem:[#allocation36_spill]] %s3775_s2 }
   0x4   :  { %3804 = sst [smem:[#allocation37_spill]] %s3776_s3 }
   0x5   :  { %3805 = sst [smem:[#allocation38_spill]] %s3777_s4 }
   0x6   :  { %3806 = sst [smem:[#allocation39_spill]] %s3778_s5 }
   0x7   :  { %3807 = sst [smem:[#allocation40_spill]] %s3779_s6 }
   0x8   :  { %3808 = sst [smem:[#allocation41_spill]] %s3780_s7 }
   0x9   :  { %28 = vsyncpa [#allocation9], 0 }
   0xa   :  { %29 = vsyncpa [#allocation11], 0 }
   0xb   :  { %30 = vsyncpa [#allocation14], 0 }
   0xc   :  { %31 = vsyncpa [#allocation17], 0 }
   0xd   :  { %32 = vsyncpa [#allocation20], 0 }
   0xe   :  { %33 = vsyncpa [#allocation23], 0 }
   0xf   :  { %34 = vsyncpa [#allocation26], 0  ;;  %s3052_s4 = smov [#allocation10]  }
  0x10   :  { %s59_s30 = sshll.u32 %s3052_s4, 4  ;;  %s60_s30 = int_to_ptr.vmem [resolvable:$true] %s59_s30 }
  0x11   :  { %s2806_s24 = scalar_lea.vmem %s60_s30, 16  ;;  %s2810_s25 = scalar_lea.vmem %s60_s30, 32 }
  0x12   :  { %p2807_p0 = scmp.ne.s32.totalorder %s60_s30, %s2806_s24  ;;  %p2811_p1 = scmp.lt.s32.totalorder %s60_s30, %s60_s30 }
  0x13   :  { %p2812_p2 = scmp.lt.s32.totalorder %s2810_s25, %s2806_s24 }
  0x15   :  { %p2813_p3 = por %p2812_p2, %p2811_p1 }
  0x17   :  { %p2814_p4 = pnand %p2813_p3, %p2807_p0 }
  0x19   :  { %2817 = shalt.err (!%p2814_p4)
}
  0x1a   :  { %s3809_s26 = sld [smem:[#allocation39_spill]]  ;;  %s3053_s2 = smov [#allocation13]  }
  0x1b   :  { %s80_s6 = sshll.u32 %s3053_s2, 4  ;;  %s3054_s27 = smov [#allocation16]   ;;  %s81_s6 = int_to_ptr.vmem [resolvable:$true] %s80_s6 }
  0x1c   :  { %s105_s7 = sshll.u32 %s3054_s27, 4  ;;  %s2826_s28 = scalar_lea.vmem %s81_s6, 1024  ;;  %s106_s7 = int_to_ptr.vmem [resolvable:$true] %s105_s7 }
  0x1d   :  { %p2827_p5 = scmp.ne.s32.totalorder %s81_s6, %s2826_s28  ;;  %p2831_p6 = scmp.lt.s32.totalorder %s81_s6, %s81_s6 }
  0x1e   :  { %p2832_p7 = scmp.lt.s32.totalorder %s2826_s28, %s2826_s28 }
  0x20   :  { %62 = dma.hbm_to_vmem [thread:$0]  %s3809_s26, 16, %s60_s30, [#allocation11]  }
  0x21   :  { %p2833_p8 = por %p2832_p7, %p2831_p6 }
  0x23   :  { %p2834_p9 = pnand %p2833_p8, %p2827_p5 }
  0x25   :  { %2837 = shalt.err (!%p2834_p9)
}
  0x26   :  { %s3055_s29 = smov 128   ;;  %s3056_s3 = smov 8  }
  0x27   :  { %s3810_s30 = sld [smem:[#allocation41_spill]]  ;;  %s2846_s24 = scalar_lea.vmem %s106_s7, 32 }
  0x28   :  { %p2847_p10 = scmp.ne.s32.totalorder %s106_s7, %s2846_s24  ;;  %p2851_p11 = scmp.lt.s32.totalorder %s106_s7, %s106_s7 }
  0x29   :  { %p2852_p12 = scmp.lt.s32.totalorder %s2846_s24, %s2846_s24 }
  0x2b   :  { %p2853_p13 = por %p2852_p12, %p2851_p11 }
  0x2d   :  { %86 = dma.hbm_to_vmem [thread:$0]  %s3810_s30, 1024, %s81_s6, [#allocation14], %s3055_s29, %s3055_s29, %s3056_s3  }
  0x2e   :  { %p2854_p0 = pnand %p2853_p13, %p2847_p10 }
  0x30   :  { %2857 = shalt.err (!%p2854_p0)
}
  0x31   :  { %108 = dma.hbm_to_vmem [thread:$0]  %s3782_s9, 32, %s106_s7, [#allocation17]  }
  0x32   :  { %s3057_s1 = smov [#allocation19]   ;;  %s3058_s2 = smov [#allocation22]  }
  0x33   :  { %s125_s26 = sshll.u32 %s3057_s1, 4  ;;  %s147_s27 = sshll.u32 %s3058_s2, 4  ;;  %s126_s26 = int_to_ptr.vmem [resolvable:$true] %s125_s26  ;;  %s148_s27 = int_to_ptr.vmem [resolvable:$true] %s147_s27 }
  0x34   :  { %s2866_s28 = scalar_lea.vmem %s126_s26, 16  ;;  %s2870_s6 = scalar_lea.vmem %s126_s26, 32 }
  0x35   :  { %p2867_p1 = scmp.ne.s32.totalorder %s126_s26, %s2866_s28  ;;  %p2871_p2 = scmp.lt.s32.totalorder %s126_s26, %s126_s26 }
  0x36   :  { %p2872_p3 = scmp.lt.s32.totalorder %s2870_s6, %s2866_s28 }
  0x38   :  { %p2873_p4 = por %p2872_p3, %p2871_p2 }
  0x3a   :  { %p2874_p5 = pnand %p2873_p4, %p2867_p1 }
  0x3c   :  { %2877 = shalt.err (!%p2874_p5)
}
  0x3d   :  { %128 = dma.hbm_to_vmem [thread:$0]  %s3784_s11, 16, %s126_s26, [#allocation20]  }
  0x3e   :  { %s2886_s30 = scalar_lea.vmem %s148_s27, 16  ;;  %s2890_s9 = scalar_lea.vmem %s148_s27, 32 }
  0x3f   :  { %p2887_p6 = scmp.ne.s32.totalorder %s148_s27, %s2886_s30  ;;  %p2891_p7 = scmp.lt.s32.totalorder %s148_s27, %s148_s27 }
  0x40   :  { %p2892_p8 = scmp.lt.s32.totalorder %s2890_s9, %s2886_s30 }
  0x42   :  { %p2893_p9 = por %p2892_p8, %p2891_p7 }
  0x44   :  { %p2894_p10 = pnand %p2893_p9, %p2887_p6 }
  0x46   :  { %2897 = shalt.err (!%p2894_p10)
}
  0x47   :  { %150 = dma.hbm_to_vmem [thread:$0]  %s3787_s14, 16, %s148_s27, [#allocation23]  }
  0x48   :  { %s3059_s25 = smov [#allocation8]   ;;  %s3060_s1 = smov [#allocation12]  }
  0x49   :  { %s49_s5 = sshll.u32 %s3059_s25, 4  ;;  %s68_s2 = sshll.u32 %s3060_s1, 4  ;;  %s50_s5 = int_to_ptr.vmem [resolvable:$true] %s49_s5  ;;  %s69_s2 = int_to_ptr.vmem [resolvable:$true] %s68_s2 }
  0x4a   :  { %s2906_s28 = scalar_lea.vmem %s50_s5, 32  ;;  %p2911_p12 = scmp.lt.s32.totalorder %s50_s5, %s50_s5 }
  0x4b   :  { %p2907_p11 = scmp.ne.s32.totalorder %s50_s5, %s2906_s28  ;;  %p2912_p13 = scmp.lt.s32.totalorder %s2906_s28, %s2906_s28 }
  0x4d   :  { %p2913_p0 = por %p2912_p13, %p2911_p12 }
  0x4f   :  { %p2914_p1 = pnand %p2913_p0, %p2907_p11 }
  0x51   :  { %2917 = shalt.err (!%p2914_p1)
}
  0x52   :  { %s3811_s6 = sld [smem:[#allocation38_spill]]  ;;  %s2926_s0 = scalar_lea.vmem %s69_s2, 1024 }
  0x53   :  { %p2927_p2 = scmp.ne.s32.totalorder %s69_s2, %s2926_s0  ;;  %p2931_p3 = scmp.lt.s32.totalorder %s69_s2, %s69_s2 }
  0x54   :  { %p2932_p4 = scmp.lt.s32.totalorder %s2926_s0, %s2926_s0 }
  0x56   :  { %p2933_p5 = por %p2932_p4, %p2931_p3 }
  0x58   :  { %52 = dma.hbm_to_vmem [thread:$0]  %s3811_s6, 32, %s50_s5, [#allocation9]  }
  0x59   :  { %p2934_p6 = pnand %p2933_p5, %p2927_p2 }
  0x5b   :  { %2937 = shalt.err (!%p2934_p6)
}
  0x5c   :  { %s3812_s4 = sld [smem:[#allocation40_spill]]  ;;  %s3061_s30 = smov [#allocation15]  }
  0x5d   :  { %s92_s9 = sshll.u32 %s3061_s30, 4  ;;  %s3062_s7 = smov [#allocation18]   ;;  %s93_s9 = int_to_ptr.vmem [resolvable:$true] %s92_s9 }
  0x5e   :  { %s115_s24 = sshll.u32 %s3062_s7, 4  ;;  %s2946_s25 = scalar_lea.vmem %s93_s9, 1024  ;;  %s116_s24 = int_to_ptr.vmem [resolvable:$true] %s115_s24 }
  0x5f   :  { %p2947_p7 = scmp.ne.s32.totalorder %s93_s9, %s2946_s25  ;;  %p2951_p8 = scmp.lt.s32.totalorder %s93_s9, %s93_s9 }
  0x60   :  { %p2952_p9 = scmp.lt.s32.totalorder %s2946_s25, %s2946_s25 }
  0x62   :  { %74 = dma.hbm_to_vmem [thread:$0]  %s3812_s4, 1024, %s69_s2, [#allocation11], %s3055_s29, %s3055_s29, %s3056_s3  }
  0x63   :  { %p2953_p10 = por %p2952_p9, %p2951_p8 }
  0x65   :  { %p2954_p11 = pnand %p2953_p10, %p2947_p7 }
  0x67   :  { %2957 = shalt.err (!%p2954_p11)
}
  0x68   :  { %98 = dma.hbm_to_vmem [thread:$0]  %s3781_s8, 1024, %s93_s9, [#allocation14], %s3055_s29, %s3055_s29, %s3056_s3  }
  0x69   :  { %s2966_s2 = scalar_lea.vmem %s116_s24, 16  ;;  %s2970_s28 = scalar_lea.vmem %s116_s24, 32 }
  0x6a   :  { %p2967_p12 = scmp.ne.s32.totalorder %s116_s24, %s2966_s2  ;;  %p2971_p13 = scmp.lt.s32.totalorder %s116_s24, %s116_s24 }
  0x6b   :  { %p2972_p0 = scmp.lt.s32.totalorder %s2970_s28, %s2966_s2 }
  0x6d   :  { %p2973_p1 = por %p2972_p0, %p2971_p13 }
  0x6f   :  { %p2974_p2 = pnand %p2973_p1, %p2967_p12 }
  0x71   :  { %2977 = shalt.err (!%p2974_p2)
}
  0x72   :  { %118 = dma.hbm_to_vmem [thread:$0]  %s3783_s10, 16, %s116_s24, [#allocation17]  }
  0x73   :  { %s3063_s6 = smov [#allocation21]   ;;  %s3064_s14 = smov [#allocation24]  }
  0x74   :  { %s135_s0 = sshll.u32 %s3063_s6, 4  ;;  %s157_s27 = sshll.u32 %s3064_s14, 4  ;;  %s136_s0 = int_to_ptr.vmem [resolvable:$true] %s135_s0  ;;  %s158_s27 = int_to_ptr.vmem [resolvable:$true] %s157_s27 }
  0x75   :  { %s2986_s4 = scalar_lea.vmem %s136_s0, 16  ;;  %s2990_s8 = scalar_lea.vmem %s136_s0, 32 }
  0x76   :  { %p2987_p3 = scmp.ne.s32.totalorder %s136_s0, %s2986_s4  ;;  %p2991_p4 = scmp.lt.s32.totalorder %s136_s0, %s136_s0 }
  0x77   :  { %p2992_p5 = scmp.lt.s32.totalorder %s2990_s8, %s2986_s4 }
  0x79   :  { %p2993_p6 = por %p2992_p5, %p2991_p4 }
  0x7b   :  { %p2994_p7 = pnand %p2993_p6, %p2987_p3 }
  0x7d   :  { %2997 = shalt.err (!%p2994_p7)
}
  0x7e   :  { %138 = dma.hbm_to_vmem [thread:$0]  %s3785_s12, 16, %s136_s0, [#allocation20]  }
  0x7f   :  { %s3006_s30 = scalar_lea.vmem %s158_s27, 16  ;;  %s3010_s10 = scalar_lea.vmem %s158_s27, 32 }
  0x80   :  { %p3007_p8 = scmp.ne.s32.totalorder %s158_s27, %s3006_s30  ;;  %p3011_p9 = scmp.lt.s32.totalorder %s158_s27, %s158_s27 }
  0x81   :  { %p3012_p10 = scmp.lt.s32.totalorder %s3010_s10, %s3006_s30 }
  0x83   :  { %p3013_p11 = por %p3012_p10, %p3011_p9 }
  0x85   :  { %p3014_p12 = pnand %p3013_p11, %p3007_p8 }
  0x87   :  { %3017 = shalt.err (!%p3014_p12)
}
  0x88   :  { %160 = dma.hbm_to_vmem [thread:$0]  %s3788_s15, 16, %s158_s27, [#allocation23]  }
  0x89   :  { %s3065_s24 = smov [#allocation25]  }
  0x8a   :  { %s167_s25 = sshll.u32 %s3065_s24, 4  ;;  %s168_s25 = int_to_ptr.vmem [resolvable:$true] %s167_s25 }
  0x8b   :  { %s3026_s5 = scalar_lea.vmem %s168_s25, 16  ;;  %s3030_s1 = scalar_lea.vmem %s168_s25, 32 }
  0x8c   :  { %p3027_p13 = scmp.ne.s32.totalorder %s168_s25, %s3026_s5  ;;  %p3031_p0 = scmp.lt.s32.totalorder %s168_s25, %s168_s25 }
  0x8d   :  { %p3032_p1 = scmp.lt.s32.totalorder %s3030_s1, %s3026_s5 }
  0x8f   :  { %p3033_p2 = por %p3032_p1, %p3031_p0 }
  0x91   :  { %p3034_p3 = pnand %p3033_p2, %p3027_p13 }
  0x93   :  { %3037 = shalt.err (!%p3034_p3)
}
  0x94   :  { %170 = dma.hbm_to_vmem [thread:$0]  %s3789_s16, 16, %s168_s25, [#allocation26]  }
  0x95   :  { %3038 = dma.done.wait [#allocation9], 32  }
  0x96   :  { %3039 = vsyncadd [#allocation9], 4294967264 }
  0x97   :  { %3040 = dma.done.wait [#allocation11], 1040  }
  0x98   :  { %3041 = vsyncadd [#allocation11], 4294966256 }
  0x99   :  { %3042 = dma.done.wait [#allocation14], 2048  }
  0x9a   :  { %3043 = vsyncadd [#allocation14], 4294965248 }
  0x9b   :  { %3044 = dma.done.wait [#allocation17], 48  }
  0x9c   :  { %3045 = vsyncadd [#allocation17], 4294967248 }
  0x9d   :  { %3046 = dma.done.wait [#allocation20], 32  }
  0x9e   :  { %3047 = vsyncadd [#allocation20], 4294967264 }
  0x9f   :  { %3048 = dma.done.wait [#allocation23], 32  }
  0xa0   :  { %3049 = vsyncadd [#allocation23], 4294967264 }
  0xa1   :  { %3050 = dma.done.wait [#allocation26], 16  }
  0xa2   :  { %3051 = vsyncadd [#allocation26], 4294967280  ;;  %v3066_v0 = vmov 0   ;;  %vm249_vm0 = vcmask 1041408   ;;  %s3813_s28 = sld [smem:[#allocation36_spill]]  ;;  %vm251_vm1 = vcmask 1043456   ;;  %v402_v45 = vlaneseq }
  0xa3   :  { %322 = vmatprep.mubr.bf16.mxu0 %v3066_v0  ;;  %389 = vmatprep.mubr.bf16.mxu1 %v3066_v0  ;;  %s3814_s6 = sld [smem:[#allocation35_spill]]  ;;  %vm253_vm2 = vcmask 1045504   ;;  %vm280_vm3 = vcmask 162816   ;;  %v400_v48 = vld [vmem:[#allocation8] sm:$0x3]  ;;  %vm417_vm4 = vcmask 523264  }
  0xa4   :  { %s3815_s7 = sld [smem:[#allocation34_spill]]  ;;  %v3371_v46 = vshrl.u32 %v402_v45, 7  ;;  %s3067_s0 = smov 64   ;;  %vm545_vm5 = vcmask 517120   ;;  %vm714_vm6 = vcmask 521220   ;;  %vm629_vm7 = vcmask 519170  }
  0xa5   :  { %s3816_s10 = sld [smem:[#allocation37_spill]]  ;;  %vm799_vm8 = vcmask 523270   ;;  %vm1466_vm9 = vcmask 254976   ;;  %vm1468_vm10 = vcmask 517376   ;;  %vm1637_vm11 = vcmask 259076   ;;  %s3070_s16 = smov 16  }
  0xa6   :  { %v404_v47 = vsub.s32 0, %v3371_v46  ;;  %v408_v49 = vsub.s32 1, %v3371_v46  ;;  %vm1639_vm12 = vcmask 521476   ;;  %vm1551_vm13 = vcmask 257026   ;;  %s3072_s11 = smov 48   ;;  %s3073_s26 = smov 80  }
  0xa7   :  { %vm1553_vm14 = vcmask 519426   ;;  %vm1723_vm15 = vcmask 261126   ;;  %s3075_s14 = smov 96  }
  0xa8   :  { %v264_v1 = vld [vmem:[%s3813_s28 + $0x10] sm:$0x33]  ;;  %v2626_v7 = vld [vmem:[%s3813_s28 + $0x4] ss:$8 sps:$4 sm:$0xff]   ;;  %v2630_v9 = vld [vmem:[%s3813_s28] ss:$8 sps:$4 sm:$0xff]   ;;  %v405_v51 = vrot.slane %v400_v48, %v404_v47  ;;  %v409_v55 = vrot.slane %v400_v48, %v408_v49 }
  0xa9   :  { %v261_v2 = vld [vmem:[%s3814_s6 + $0x10] sm:$0x33]  ;;  %v2477_v3 = vcombine.high %v264_v1, %v264_v1  ;;  %v2476_v5 = vcombine.low %v264_v1, %v264_v1  ;;  %v2628_v8 = vld [vmem:[%s3814_s6 + $0x4] ss:$8 sps:$4 sm:$0xff]   ;;  %v2631_v12 = vld [vmem:[%s3814_s6] ss:$8 sps:$4 sm:$0xff]  }
  0xaa   :  { %v2483_v4 = vcombine.high %v261_v2, %v261_v2  ;;  %v2482_v6 = vcombine.low %v261_v2, %v261_v2  ;;  %v223_v13 = vld [vmem:[%s3815_s7 + $0xe] sm:$0x3]  ;;  %v224_v14 = vld [vmem:[%s3815_s7 + $0xc] sm:$0x3]  ;;  %v225_v15 = vld [vmem:[%s3815_s7 + $0xa] sm:$0x3] }
  0xab   :  { %2478 = vmatprep.subr.msk.bf16.mxu0 %vm249_vm0, %v2477_v3  ;;  %v285_v10 = vsel %vm249_vm0, %v2476_v5, 0  ;;  %v226_v16 = vld [vmem:[%s3815_s7 + $0x8] sm:$0x3]  ;;  %v227_v17 = vld [vmem:[%s3815_s7 + $0x6] sm:$0x3]  ;;  %v232_v21 = vrot.slane %v224_v14, 6 }
  0xac   :  { %2484 = vmatprep.subr.msk.bf16.mxu1 %vm249_vm0, %v2483_v4  ;;  %v352_v11 = vsel %vm249_vm0, %v2482_v6, 0  ;;  %303 = vmatpush1.bf16.msra.mxu0 %v285_v10  ;;  %v228_v18 = vld [vmem:[%s3815_s7 + $0x4] sm:$0x3]  ;;  %v229_v19 = vld [vmem:[%s3815_s7 + $0x2] sm:$0x3]  ;;  %v235_v22 = vrot.slane %v225_v15, 4 }
  0xad   :  { %370 = vmatpush1.bf16.msra.mxu1 %v352_v11  ;;  %304 = vmatprep.subr.bf16.mxu0 %v2626_v7  ;;  %v230_v20 = vld [vmem:[%s3815_s7] sm:$0x3]  ;;  %v238_v23 = vrot.slane %v226_v16, 2  ;;  %v241_v24 = vrot.slane %v228_v18, 6  ;;  %v244_v25 = vrot.slane %v229_v19, 4  ;;  %v221_v28 = vld [vmem:[%s3815_s7 + $0x8] sm:$0xff]  ;;  %v250_v29 = vsel %vm249_vm0, %v223_v13, %v232_v21 }
  0xae   :  { %371 = vmatprep.subr.bf16.mxu1 %v2628_v8  ;;  %v247_v26 = vrot.slane %v230_v20, 2  ;;  %v220_v27 = vld [vmem:[%s3815_s7] sm:$0xff]  ;;  %v3300_v32 = vld [vmem:[%s3816_s10 + $0x34] ss:$8 sps:$4 sm:$0xff]   ;;  %v252_v33 = vsel %vm251_vm1, %v250_v29, %v235_v22  ;;  %v3308_v37 = vld [vmem:[%s3816_s10 + $0x30] ss:$8 sps:$4 sm:$0xff]  }
  0xaf   :  { %v255_v30 = vsel %vm249_vm0, %v227_v17, %v241_v24  ;;  %v222_v31 = vpack.c.bf16 %v221_v28, %v220_v27  ;;  %v254_v35 = vsel %vm253_vm2, %v252_v33, %v238_v23  ;;  %v3315_v39 = vld [vmem:[%s3816_s10 + $0x24] ss:$8 sps:$4 sm:$0xff]   ;;  %v3320_v40 = vld [vmem:[%s3816_s10 + $0x20] ss:$8 sps:$4 sm:$0xff]   ;;  %v3328_v41 = vld [vmem:[%s3816_s10 + $0x14] ss:$8 sps:$4 sm:$0xff]  }
  0xb0   :  { %305 = vmatpush1.bf16.msra.mxu0 %v2630_v9  ;;  %v256_v34 = vsel %vm251_vm1, %v255_v30, %v244_v25  ;;  %v3337_v42 = vld [vmem:[%s3816_s10 + $0x10] ss:$8 sps:$4 sm:$0xff]   ;;  %v3343_v43 = vld [vmem:[%s3816_s10 + $0x4] ss:$8 sps:$4 sm:$0xff]   ;;  %v3351_v44 = vld [vmem:[%s3816_s10] ss:$8 sps:$4 sm:$0xff]  }
  0xb1   :  { %372 = vmatpush1.bf16.msra.mxu1 %v2631_v12  ;;  %v257_v36 = vsel %vm253_vm2, %v256_v34, %v247_v26  ;;  %483 = vmatprep.subr.bf16.mxu0 %v3300_v32  ;;  %v3381_v14 = vld [vmem:[#allocation10] ss:$0 sm:$0xff]  ;;  %vm1725_vm0 = vcmask 523526   ;;  %vm3069_vm1 = vmmov 0   ;;  %s3074_s6 = smov 112  }
  0xb2   :  { %565 = vmatprep.subr.bf16.mxu1 %v3300_v32  ;;  %v258_v38 = vpack.c.bf16 %v257_v36, %v254_v35 }
  0xb4   :  { %2485 = vmatmul.mubr.msk.bf16.vlgmr.msra.gmra.mxu1 %vm280_vm3, %v222_v31  ;;  %2479 = vmatmul.mubr.msk.bf16.vlgmr.msra.gmra.mxu0 %vm280_vm3, %v258_v38 }
  0xb5   :  { %566 = vmatpush1.bf16.msra.mxu1 %v3308_v37  ;;  %589 = vmatprep.mubr.bf16.mxu1 %v3066_v0 }
  0xb6   :  { %567 = vmatprep.subr.bf16.mxu1 %v3315_v39  ;;  %484 = vmatpush1.bf16.msra.mxu0 %v3308_v37 }
  0xb7   :  { %507 = vmatprep.mubr.bf16.mxu0 %v3066_v0  ;;  %485 = vmatprep.subr.bf16.mxu0 %v3315_v39 }
  0xb9   :  { %568 = vmatpush1.bf16.msra.mxu1 %v3320_v40 }
  0xba   :  { %569 = vmatprep.subr.bf16.mxu1 %v3328_v41  ;;  %486 = vmatpush1.bf16.msra.mxu0 %v3320_v40 }
  0xbb   :  { %487 = vmatprep.subr.bf16.mxu0 %v3328_v41 }
  0xbd   :  { %570 = vmatpush1.bf16.msra.mxu1 %v3337_v42 }
  0xbe   :  { %571 = vmatprep.subr.bf16.mxu1 %v3343_v43  ;;  %488 = vmatpush1.bf16.msra.mxu0 %v3337_v42 }
  0xbf   :  { %489 = vmatprep.subr.bf16.mxu0 %v3343_v43 }
  0xc1   :  { %572 = vmatpush1.bf16.msra.mxu1 %v3351_v44 }
  0xc2   :  { %735 = vmatprep.subr.bf16.mxu1 %v3300_v32  ;;  %490 = vmatpush1.bf16.msra.mxu0 %v3351_v44 }
  0xc3   :  { %650 = vmatprep.subr.bf16.mxu0 %v3300_v32 }
  0xc5   :  { %508 = vmatmul.mubr.bf16.vlgmr.msra.gmra.mxu0 %v3066_v0 }
  0xc6   :  { %651 = vmatpush1.bf16.msra.mxu0 %v3308_v37  ;;  %674 = vmatprep.mubr.bf16.mxu0 %v3066_v0 }
  0xc7   :  { %652 = vmatprep.subr.bf16.mxu0 %v3315_v39 }
  0xca   :  { %653 = vmatpush1.bf16.msra.mxu0 %v3320_v40 }
  0xcb   :  { %654 = vmatprep.subr.bf16.mxu0 %v3328_v41 }
  0xce   :  { %655 = vmatpush1.bf16.msra.mxu0 %v3337_v42 }
  0xcf   :  { %656 = vmatprep.subr.bf16.mxu0 %v3343_v43 }
  0xd2   :  { %657 = vmatpush1.bf16.msra.mxu0 %v3351_v44 }
  0xd3   :  { %820 = vmatprep.subr.bf16.mxu0 %v3300_v32 }
 0x174   :  { %v391_v50 = vpop.f32.mrf.mxu1  ;;  %v324_v52 = vpop.f32.mrf.mxu0 }
 0x175   :  { %v392_v54 = vadd.f32 %v391_v50, %v324_v52 }
 0x176   :  { %v393_v53 = vpop.f32.mrf.mxu1  ;;  %v326_v56 = vpop.f32.mrf.mxu0 }
 0x177   :  { %v412_v58 = vadd.f32 %v405_v51, %v392_v54  ;;  %v394_v59 = vadd.f32 %v393_v53, %v326_v56 }
 0x178   :  { %v395_v57 = vpop.f32.mrf.mxu1  ;;  %v328_v60 = vpop.f32.mrf.mxu0 }
 0x179   :  { %416 = vst [vmem:[#allocation2] sm:$0xff] %v412_v58  ;;  %v413_v62 = vadd.f32 %v409_v55, %v394_v59  ;;  %v396_v63 = vadd.f32 %v395_v57, %v328_v60 }
 0x17a   :  { %v397_v61 = vpop.f32.mrf.mxu1  ;;  %v330_v1 = vpop.f32.mrf.mxu0 }
 0x17b   :  { %418 = vst.msk [vmem:[#allocation2 + $0x8] sm:$0xff] %vm417_vm4, %v413_v62  ;;  %v414_v2 = vadd.f32 %v405_v51, %v396_v63  ;;  %v398_v3 = vadd.f32 %v397_v61, %v330_v1 }
 0x17d   :  { %419 = vst [vmem:[#allocation2 + $0x10] sm:$0xff] %v414_v2  ;;  %v415_v4 = vadd.f32 %v409_v55, %v398_v3 }
 0x17f   :  { %420 = vst.msk [vmem:[#allocation2 + $0x18] sm:$0xff] %vm417_vm4, %v415_v4 }
 0x180   :  { %v430_v5 = vld [vmem:[#allocation2] sm:$0x3]  ;;  %v548_v30 = vld [vmem:[#allocation2] sm:$0xc]  ;;  %v632_v4 = vld [vmem:[#allocation2] sm:$0x30] }
 0x182   :  { %v431_v18 = vld [vmem:[#allocation2 + $0x8] sm:$0x3]  ;;  %v549_v53 = vld [vmem:[#allocation2 + $0x8] sm:$0xc] }
 0x185   :  { %v509_v6 = vpop.f32.mrf.mxu0 }
 0x186   :  { %v516_v7 = vadd.f32 %v509_v6, %v430_v5 }
 0x187   :  { %v511_v8 = vpop.f32.mrf.mxu0 }
 0x188   :  { %v2494_v9 = vmul.f32 -1.442695, %v516_v7  ;;  %v529_v15 = vadd.f32 %v3381_v14, %v511_v8 }
 0x189   :  { %v513_v10 = vpop.f32.mrf.mxu0 }
 0x18a   :  { %2686 = vpow2.f32 %v2494_v9 }
 0x18b   :  { %v514_v11 = vpop.f32.mrf.mxu0 }
 0x197   :  { %v2687_v12 = vpop.eup %2686 }
 0x198   :  { %v520_v13 = vadd.f32 1.0, %v2687_v12 }
 0x19a   :  { %2688 = vrcp.f32 %v520_v13 }
 0x1a7   :  { %v2689_v16 = vpop.eup %2688 }
 0x1a8   :  { %v530_v17 = vmul.f32 %v2689_v16, %v529_v15  ;;  %v533_v21 = vsub.f32 1.0, %v2689_v16  ;;  %v539_v23 = vmul.f32 0.0, %v2689_v16 }
 0x1aa   :  { %v531_v19 = vadd.f32 %v530_v17, %v431_v18  ;;  %v633_v17 = vld [vmem:[#allocation2 + $0x8] sm:$0x30] }
 0x1ac   :  { %2690 = vtanh.f32 %v531_v19 }
 0x1b9   :  { %v2691_v20 = vpop.eup %2690 }
 0x1ba   :  { %535 = vrot.lane.b32.xlu0 %v2691_v20, %s3067_s0 }
 0x22c   :  { %v536_v22 = vpop.permute.xlu0 %535 }
 0x22d   :  { %v538_v24 = vmul.f32 %v536_v22, %v533_v21 }
 0x22f   :  { %v3385_v25 = vadd.f32 %v539_v23, %v538_v24 }
 0x231   :  { %v550_v26 = vpack.c.bf16 %v3385_v25, %v3385_v25  ;;  %v621_v57 = vrot.slane %v3385_v25, 6 }
 0x233   :  { %552 = vrot.lane.b32.xlu0 %v550_v26, %s3067_s0 }
 0x2a5   :  { %v553_v27 = vpop.permute.xlu0 %552 }
 0x2a6   :  { %2496 = vmatmul.mubr.msk.bf16.vlgmr.msra.gmra.mxu1 %vm417_vm4, %v553_v27 }
 0x2a7   :  { %736 = vmatpush1.bf16.msra.mxu1 %v3308_v37  ;;  %759 = vmatprep.mubr.bf16.mxu1 %v3066_v0 }
 0x2a8   :  { %737 = vmatprep.subr.bf16.mxu1 %v3315_v39 }
 0x2ab   :  { %738 = vmatpush1.bf16.msra.mxu1 %v3320_v40 }
 0x2ac   :  { %739 = vmatprep.subr.bf16.mxu1 %v3328_v41 }
 0x2af   :  { %740 = vmatpush1.bf16.msra.mxu1 %v3337_v42 }
 0x2b0   :  { %741 = vmatprep.subr.bf16.mxu1 %v3343_v43 }
 0x2b3   :  { %742 = vmatpush1.bf16.msra.mxu1 %v3351_v44 }
 0x2b4   :  { %897 = vmatprep.subr.bf16.mxu1 %v3300_v32 }
 0x366   :  { %v591_v28 = vpop.f32.mrf.mxu1 }
 0x367   :  { %v599_v29 = vrot.slane %v591_v28, 6 }
 0x368   :  { %v593_v31 = vpop.f32.mrf.mxu1 }
 0x369   :  { %v601_v33 = vadd.f32 %v599_v29, %v548_v30  ;;  %v608_v48 = vadd.f32 %v3381_v14, %v593_v31 }
 0x36a   :  { %v595_v34 = vpop.f32.mrf.mxu1 }
 0x36b   :  { %v2497_v35 = vmul.f32 -1.442695, %v601_v33  ;;  %v610_v50 = vrot.slane %v608_v48, 6  ;;  %v717_v33 = vld [vmem:[#allocation2] sm:$0xc0] }
 0x36c   :  { %v596_v36 = vpop.f32.mrf.mxu1 }
 0x36d   :  { %2692 = vpow2.f32 %v2497_v35 }
 0x37a   :  { %v2693_v38 = vpop.eup %2692 }
 0x37b   :  { %v605_v45 = vadd.f32 1.0, %v2693_v38 }
 0x37d   :  { %2694 = vrcp.f32 %v605_v45 }
 0x38a   :  { %v2695_v51 = vpop.eup %2694 }
 0x38b   :  { %v612_v52 = vmul.f32 %v2695_v51, %v610_v50  ;;  %v615_v56 = vsub.f32 1.0, %v2695_v51  ;;  %v623_v59 = vmul.f32 %v2695_v51, %v621_v57 }
 0x38d   :  { %v613_v54 = vadd.f32 %v612_v52, %v549_v53 }
 0x38f   :  { %2696 = vtanh.f32 %v613_v54 }
 0x39c   :  { %v2697_v55 = vpop.eup %2696 }
 0x39d   :  { %617 = vrot.lane.b32.xlu1 %v2697_v55, %s3067_s0  ;;  %v718_v55 = vld [vmem:[#allocation2 + $0x8] sm:$0xc0] }
 0x40f   :  { %v618_v58 = vpop.permute.xlu1 %617 }
 0x410   :  { %v620_v60 = vmul.f32 %v618_v58, %v615_v56 }
 0x412   :  { %v3403_v61 = vadd.f32 %v623_v59, %v620_v60 }
 0x414   :  { %v634_v62 = vpack.c.bf16 %v3403_v61, %v3403_v61  ;;  %v706_v21 = vrot.slane %v3403_v61, 6 }
 0x416   :  { %v636_v63 = vrot.slane %v634_v62, 1 }
 0x418   :  { %637 = vrot.lane.b32.xlu1 %v636_v63, %s3067_s0 }
 0x48a   :  { %v638_v1 = vpop.permute.xlu1 %637 }
 0x48b   :  { %2498 = vmatmul.mubr.msk.bf16.vlgmr.msra.gmra.mxu0 %vm417_vm4, %v638_v1 }
 0x48c   :  { %821 = vmatpush1.bf16.msra.mxu0 %v3308_v37  ;;  %844 = vmatprep.mubr.bf16.mxu0 %v3066_v0 }
 0x48d   :  { %822 = vmatprep.subr.bf16.mxu0 %v3315_v39 }
 0x490   :  { %823 = vmatpush1.bf16.msra.mxu0 %v3320_v40 }
 0x491   :  { %824 = vmatprep.subr.bf16.mxu0 %v3328_v41 }
 0x494   :  { %825 = vmatpush1.bf16.msra.mxu0 %v3337_v42 }
 0x495   :  { %826 = vmatprep.subr.bf16.mxu0 %v3343_v43 }
 0x498   :  { %827 = vmatpush1.bf16.msra.mxu0 %v3351_v44 }
 0x499   :  { %981 = vmatprep.subr.bf16.mxu0 %v3300_v32 }
 0x54b   :  { %v676_v2 = vpop.f32.mrf.mxu0 }
 0x54c   :  { %v684_v3 = vrot.slane %v676_v2, 4 }
 0x54d   :  { %v678_v5 = vpop.f32.mrf.mxu0 }
 0x54e   :  { %v686_v6 = vadd.f32 %v684_v3, %v632_v4  ;;  %v693_v12 = vadd.f32 %v3381_v14, %v678_v5  ;;  %v802_v4 = vld [vmem:[#allocation2 + $0x10] sm:$0x3] }
 0x54f   :  { %v680_v7 = vpop.f32.mrf.mxu0 }
 0x550   :  { %v2499_v8 = vmul.f32 -1.442695, %v686_v6  ;;  %v695_v13 = vrot.slane %v693_v12, 4 }
 0x551   :  { %v681_v9 = vpop.f32.mrf.mxu0 }
 0x552   :  { %2698 = vpow2.f32 %v2499_v8 }
 0x55f   :  { %v2699_v10 = vpop.eup %2698 }
 0x560   :  { %v690_v11 = vadd.f32 1.0, %v2699_v10 }
 0x562   :  { %2700 = vrcp.f32 %v690_v11 }
 0x56f   :  { %v2701_v15 = vpop.eup %2700 }
 0x570   :  { %v697_v16 = vmul.f32 %v2701_v15, %v695_v13  ;;  %v700_v20 = vsub.f32 1.0, %v2701_v15  ;;  %v708_v23 = vmul.f32 %v2701_v15, %v706_v21 }
 0x572   :  { %v698_v18 = vadd.f32 %v697_v16, %v633_v17  ;;  %v803_v17 = vld [vmem:[#allocation2 + $0x18] sm:$0x3] }
 0x574   :  { %2702 = vtanh.f32 %v698_v18 }
 0x581   :  { %v2703_v19 = vpop.eup %2702 }
 0x582   :  { %702 = vrot.lane.b32.xlu0 %v2703_v19, %s3067_s0 }
 0x5f4   :  { %v703_v22 = vpop.permute.xlu0 %702 }
 0x5f5   :  { %v705_v24 = vmul.f32 %v703_v22, %v700_v20 }
 0x5f7   :  { %v3421_v26 = vadd.f32 %v708_v23, %v705_v24 }
 0x5f9   :  { %v719_v27 = vpack.c.bf16 %v3421_v26, %v3421_v26  ;;  %v791_v58 = vrot.slane %v3421_v26, 6 }
 0x5fb   :  { %v721_v28 = vrot.slane %v719_v27, 2 }
 0x5fd   :  { %722 = vrot.lane.b32.xlu1 %v721_v28, %s3067_s0 }
 0x66f   :  { %v723_v29 = vpop.permute.xlu1 %722 }
 0x670   :  { %2500 = vmatmul.mubr.msk.bf16.vlgmr.msra.gmra.mxu1 %vm417_vm4, %v723_v29 }
 0x671   :  { %898 = vmatpush1.bf16.msra.mxu1 %v3308_v37  ;;  %921 = vmatprep.mubr.bf16.mxu1 %v3066_v0 }
 0x672   :  { %899 = vmatprep.subr.bf16.mxu1 %v3315_v39 }
 0x675   :  { %900 = vmatpush1.bf16.msra.mxu1 %v3320_v40 }
 0x676   :  { %901 = vmatprep.subr.bf16.mxu1 %v3328_v41 }
 0x679   :  { %902 = vmatpush1.bf16.msra.mxu1 %v3337_v42 }
 0x67a   :  { %903 = vmatprep.subr.bf16.mxu1 %v3343_v43 }
 0x67d   :  { %904 = vmatpush1.bf16.msra.mxu1 %v3351_v44 }
 0x67e   :  { %1065 = vmatprep.subr.bf16.mxu1 %v3300_v32 }
 0x730   :  { %v761_v30 = vpop.f32.mrf.mxu1 }
 0x731   :  { %v769_v31 = vrot.slane %v761_v30, 2 }
 0x732   :  { %v763_v34 = vpop.f32.mrf.mxu1 }
 0x733   :  { %v771_v35 = vadd.f32 %v769_v31, %v717_v33  ;;  %v778_v51 = vadd.f32 %v3381_v14, %v763_v34  ;;  %v880_v33 = vld [vmem:[#allocation2 + $0x10] sm:$0xc] }
 0x734   :  { %v765_v36 = vpop.f32.mrf.mxu1 }
 0x735   :  { %v2501_v38 = vmul.f32 -1.442695, %v771_v35  ;;  %v780_v52 = vrot.slane %v778_v51, 2 }
 0x736   :  { %v766_v45 = vpop.f32.mrf.mxu1 }
 0x737   :  { %2704 = vpow2.f32 %v2501_v38 }
 0x744   :  { %v2705_v48 = vpop.eup %2704 }
 0x745   :  { %v775_v50 = vadd.f32 1.0, %v2705_v48 }
 0x747   :  { %2706 = vrcp.f32 %v775_v50 }
 0x754   :  { %v2707_v53 = vpop.eup %2706 }
 0x755   :  { %v782_v54 = vmul.f32 %v2707_v53, %v780_v52  ;;  %v785_v57 = vsub.f32 1.0, %v2707_v53  ;;  %v793_v60 = vmul.f32 %v2707_v53, %v791_v58 }
 0x757   :  { %v783_v56 = vadd.f32 %v782_v54, %v718_v55 }
 0x759   :  { %2708 = vtanh.f32 %v783_v56 }
 0x766   :  { %v2709_v32 = vpop.eup %2708 }
 0x767   :  { %787 = vrot.lane.b32.xlu0 %v2709_v32, %s3067_s0 }
 0x7d9   :  { %v788_v59 = vpop.permute.xlu0 %787 }
 0x7da   :  { %v790_v62 = vmul.f32 %v788_v59, %v785_v57 }
 0x7dc   :  { %v3439_v63 = vadd.f32 %v793_v60, %v790_v62  ;;  %v963_v62 = vld [vmem:[#allocation2 + $0x10] sm:$0x30] }
 0x7de   :  { %v804_v1 = vpack.c.bf16 %v3439_v63, %v3439_v63  ;;  %v870_v21 = vrot.slane %v3439_v63, 6 }
 0x7e0   :  { %v806_v2 = vrot.slane %v804_v1, 3 }
 0x7e2   :  { %807 = vrot.lane.b32.xlu1 %v806_v2, %s3067_s0 }
 0x854   :  { %v808_v3 = vpop.permute.xlu1 %807 }
 0x855   :  { %2502 = vmatmul.mubr.msk.bf16.vlgmr.msra.gmra.mxu0 %vm417_vm4, %v808_v3 }
 0x856   :  { %982 = vmatpush1.bf16.msra.mxu0 %v3308_v37  ;;  %1005 = vmatprep.mubr.bf16.mxu0 %v3066_v0 }
 0x857   :  { %983 = vmatprep.subr.bf16.mxu0 %v3315_v39 }
 0x85a   :  { %984 = vmatpush1.bf16.msra.mxu0 %v3320_v40 }
 0x85b   :  { %985 = vmatprep.subr.bf16.mxu0 %v3328_v41 }
 0x85e   :  { %986 = vmatpush1.bf16.msra.mxu0 %v3337_v42 }
 0x85f   :  { %987 = vmatprep.subr.bf16.mxu0 %v3343_v43 }
 0x862   :  { %988 = vmatpush1.bf16.msra.mxu0 %v3351_v44 }
 0x915   :  { %v846_v5 = vpop.f32.mrf.mxu0 }
 0x916   :  { %v853_v6 = vadd.f32 %v846_v5, %v802_v4 }
 0x917   :  { %v848_v7 = vpop.f32.mrf.mxu0 }
 0x918   :  { %v2503_v8 = vmul.f32 -1.442695, %v853_v6  ;;  %v860_v13 = vadd.f32 %v3381_v14, %v848_v7 }
 0x919   :  { %v850_v9 = vpop.f32.mrf.mxu0 }
 0x91a   :  { %2710 = vpow2.f32 %v2503_v8 }
 0x91b   :  { %v851_v10 = vpop.f32.mrf.mxu0 }
 0x927   :  { %v2711_v11 = vpop.eup %2710 }
 0x928   :  { %v857_v12 = vadd.f32 1.0, %v2711_v11 }
 0x92a   :  { %2712 = vrcp.f32 %v857_v12  ;;  %v964_v12 = vld [vmem:[#allocation2 + $0x18] sm:$0x30] }
 0x937   :  { %v2713_v15 = vpop.eup %2712 }
 0x938   :  { %v861_v16 = vmul.f32 %v2713_v15, %v860_v13  ;;  %v864_v20 = vsub.f32 1.0, %v2713_v15  ;;  %v872_v23 = vmul.f32 %v2713_v15, %v870_v21 }
 0x93a   :  { %v862_v18 = vadd.f32 %v861_v16, %v803_v17 }
 0x93c   :  { %2714 = vtanh.f32 %v862_v18 }
 0x949   :  { %v2715_v19 = vpop.eup %2714 }
 0x94a   :  { %866 = vrot.lane.b32.xlu0 %v2715_v19, %s3067_s0 }
 0x9bc   :  { %v867_v22 = vpop.permute.xlu0 %866 }
 0x9bd   :  { %v869_v24 = vmul.f32 %v867_v22, %v864_v20 }
 0x9bf   :  { %v3456_v27 = vadd.f32 %v872_v23, %v869_v24 }
 0x9c1   :  { %v882_v28 = vpack.c.bf16 %v3456_v27, %v3456_v27  ;;  %v953_v52 = vrot.slane %v3456_v27, 6 }
 0x9c3   :  { %884 = vrot.lane.b32.xlu1 %v882_v28, %s3067_s0 }
 0xa35   :  { %v885_v29 = vpop.permute.xlu1 %884 }
 0xa36   :  { %2504 = vmatmul.mubr.msk.bf16.vlgmr.msra.gmra.mxu1 %vm417_vm4, %v885_v29 }
 0xa37   :  { %1066 = vmatpush1.bf16.msra.mxu1 %v3308_v37  ;;  %1089 = vmatprep.mubr.bf16.mxu1 %v3066_v0 }
 0xa38   :  { %1067 = vmatprep.subr.bf16.mxu1 %v3315_v39 }
 0xa3b   :  { %1068 = vmatpush1.bf16.msra.mxu1 %v3320_v40 }
 0xa3c   :  { %1069 = vmatprep.subr.bf16.mxu1 %v3328_v41 }
 0xa3f   :  { %1070 = vmatpush1.bf16.msra.mxu1 %v3337_v42 }
 0xa40   :  { %1071 = vmatprep.subr.bf16.mxu1 %v3343_v43  ;;  %v881_v43 = vld [vmem:[#allocation2 + $0x18] sm:$0xc] }
 0xa43   :  { %1072 = vmatpush1.bf16.msra.mxu1 %v3351_v44 }
 0xaf6   :  { %v923_v30 = vpop.f32.mrf.mxu1 }
 0xaf7   :  { %v931_v31 = vrot.slane %v923_v30, 6 }
 0xaf8   :  { %v925_v34 = vpop.f32.mrf.mxu1 }
 0xaf9   :  { %v933_v35 = vadd.f32 %v931_v31, %v880_v33  ;;  %v940_v40 = vadd.f32 %v3381_v14, %v925_v34  ;;  %v1047_v31 = vld [vmem:[#allocation2 + $0x10] sm:$0xc0] }
 0xafa   :  { %v927_v37 = vpop.f32.mrf.mxu1 }
 0xafb   :  { %v2505_v36 = vmul.f32 -1.442695, %v933_v35  ;;  %v942_v41 = vrot.slane %v940_v40, 6 }
 0xafc   :  { %v928_v38 = vpop.f32.mrf.mxu1 }
 0xafd   :  { %2716 = vpow2.f32 %v2505_v36 }
 0xb0a   :  { %v2717_v39 = vpop.eup %2716 }
 0xb0b   :  { %v937_v45 = vadd.f32 1.0, %v2717_v39 }
 0xb0d   :  { %2718 = vrcp.f32 %v937_v45 }
 0xb1a   :  { %v2719_v42 = vpop.eup %2718 }
 0xb1b   :  { %v944_v48 = vmul.f32 %v2719_v42, %v942_v41  ;;  %v947_v51 = vsub.f32 1.0, %v2719_v42  ;;  %v955_v54 = vmul.f32 %v2719_v42, %v953_v52  ;;  %v2644_v52 = vld [vmem:[#allocation13 + $0x30] ss:$8 sps:$4 sm:$0xff]  }
 0xb1d   :  { %v945_v50 = vadd.f32 %v944_v48, %v881_v43 }
 0xb1f   :  { %2720 = vtanh.f32 %v945_v50  ;;  %v1048_v50 = vld [vmem:[#allocation2 + $0x18] sm:$0xc0] }
 0xb2c   :  { %v2721_v44 = vpop.eup %2720 }
 0xb2d   :  { %949 = vrot.lane.b32.xlu0 %v2721_v44, %s3067_s0 }
 0xb9f   :  { %v950_v53 = vpop.permute.xlu0 %949 }
 0xba0   :  { %v952_v55 = vmul.f32 %v950_v53, %v947_v51  ;;  %v2646_v53 = vld [vmem:[#allocation13 + $0x34] ss:$8 sps:$4 sm:$0xff]  }
 0xba1   :  { %1204 = vmatprep.subr.bf16.mxu0 %v2646_v53 }
 0xba2   :  { %v3473_v56 = vadd.f32 %v955_v54, %v952_v55  ;;  %v2647_v54 = vld [vmem:[#allocation12 + $0x30] ss:$8 sps:$4 sm:$0xff]   ;;  %v2649_v55 = vld [vmem:[#allocation12 + $0x34] ss:$8 sps:$4 sm:$0xff]  }
 0xba3   :  { %1290 = vmatprep.subr.bf16.mxu1 %v2649_v55  ;;  %v3556_v55 = vld [vmem:[#allocation18] ss:$0 sm:$0xff] }
 0xba4   :  { %v965_v32 = vpack.c.bf16 %v3473_v56, %v3473_v56  ;;  %v1037_v17 = vrot.slane %v3473_v56, 6 }
 0xba6   :  { %v967_v57 = vrot.slane %v965_v32, 1  ;;  %v2652_v32 = vld [vmem:[#allocation13 + $0x24] ss:$8 sps:$4 sm:$0xff]  }
 0xba8   :  { %968 = vrot.lane.b32.xlu1 %v967_v57, %s3067_s0  ;;  %v2655_v57 = vld [vmem:[#allocation12 + $0x24] ss:$8 sps:$4 sm:$0xff]  }
 0xc1a   :  { %v969_v58 = vpop.permute.xlu1 %968 }
 0xc1b   :  { %2506 = vmatmul.mubr.msk.bf16.vlgmr.msra.gmra.mxu0 %vm417_vm4, %v969_v58  ;;  %v2653_v58 = vld [vmem:[#allocation12 + $0x20] ss:$8 sps:$4 sm:$0xff]  }
 0xc1c   :  { %1228 = vmatprep.mubr.bf16.mxu0 %v3066_v0  ;;  %1205 = vmatpush1.bf16.msra.mxu0 %v2644_v52 }
 0xc1d   :  { %1206 = vmatprep.subr.bf16.mxu0 %v2652_v32 }
 0xcdb   :  { %v1007_v59 = vpop.f32.mrf.mxu0 }
 0xcdc   :  { %v1015_v60 = vrot.slane %v1007_v59, 4  ;;  %v2656_v59 = vld [vmem:[#allocation13 + $0x10] ss:$8 sps:$4 sm:$0xff]  }
 0xcdd   :  { %v1009_v1 = vpop.f32.mrf.mxu0 }
 0xcde   :  { %v1017_v2 = vadd.f32 %v1015_v60, %v963_v62  ;;  %v1024_v8 = vadd.f32 %v3381_v14, %v1009_v1  ;;  %v2658_v60 = vld [vmem:[#allocation13 + $0x14] ss:$8 sps:$4 sm:$0xff]   ;;  %v2659_v62 = vld [vmem:[#allocation12 + $0x10] ss:$8 sps:$4 sm:$0xff]  }
 0xcdf   :  { %v1011_v3 = vpop.f32.mrf.mxu0  ;;  %v2661_v1 = vld [vmem:[#allocation12 + $0x14] ss:$8 sps:$4 sm:$0xff]  }
 0xce0   :  { %v2507_v4 = vmul.f32 -1.442695, %v1017_v2  ;;  %v1026_v9 = vrot.slane %v1024_v8, 4  ;;  %v2664_v2 = vld [vmem:[#allocation13 + $0x4] ss:$8 sps:$4 sm:$0xff]  }
 0xce1   :  { %v1012_v5 = vpop.f32.mrf.mxu0  ;;  %v2667_v3 = vld [vmem:[#allocation12 + $0x4] ss:$8 sps:$4 sm:$0xff]  }
 0xce2   :  { %2722 = vpow2.f32 %v2507_v4  ;;  %v2662_v4 = vld [vmem:[#allocation13] ss:$8 sps:$4 sm:$0xff]   ;;  %v3501_v5 = vld [vmem:[#allocation15 + $0x34] ss:$8 sps:$4 sm:$0xff]  }
 0xcef   :  { %v2723_v6 = vpop.eup %2722 }
 0xcf0   :  { %v1021_v7 = vadd.f32 1.0, %v2723_v6 }
 0xcf2   :  { %2724 = vrcp.f32 %v1021_v7 }
 0xcff   :  { %v2725_v10 = vpop.eup %2724 }
 0xd00   :  { %v1028_v11 = vmul.f32 %v2725_v10, %v1026_v9  ;;  %v1031_v16 = vsub.f32 1.0, %v2725_v10  ;;  %v1039_v19 = vmul.f32 %v2725_v10, %v1037_v17 }
 0xd02   :  { %v1029_v13 = vadd.f32 %v1028_v11, %v964_v12 }
 0xd04   :  { %2726 = vtanh.f32 %v1029_v13  ;;  %v3506_v13 = vld [vmem:[#allocation15 + $0x30] ss:$8 sps:$4 sm:$0xff]  }
 0xd11   :  { %v2727_v15 = vpop.eup %2726 }
 0xd12   :  { %1033 = vrot.lane.b32.xlu0 %v2727_v15, %s3067_s0 }
 0xd84   :  { %v1034_v18 = vpop.permute.xlu0 %1033 }
 0xd85   :  { %v1036_v20 = vmul.f32 %v1034_v18, %v1031_v16 }
 0xd87   :  { %v1040_v21 = vadd.f32 %v1039_v19, %v1036_v20  ;;  %v3508_v20 = vld [vmem:[#allocation15 + $0x24] ss:$8 sps:$4 sm:$0xff]  }
 0xd89   :  { %v1049_v22 = vpack.c.bf16 %v1040_v21, %v1040_v21  ;;  %v1121_v41 = vrot.slane %v1040_v21, 6 }
 0xd8b   :  { %v1051_v23 = vrot.slane %v1049_v22, 2  ;;  %v3517_v22 = vld [vmem:[#allocation15 + $0x14] ss:$8 sps:$4 sm:$0xff]  }
 0xd8d   :  { %1052 = vrot.lane.b32.xlu1 %v1051_v23, %s3067_s0  ;;  %v3523_v23 = vld [vmem:[#allocation15 + $0x10] ss:$8 sps:$4 sm:$0xff]  }
 0xd91   :  { %542 = vrot.lane.b32.xlu1 %v3385_v25, %s3067_s0 }
 0xd95   :  { %711 = vrot.lane.b32.xlu1 %v3421_v26, %s3067_s0 }
 0xd99   :  { %875 = vrot.lane.b32.xlu1 %v3456_v27, %s3067_s0 }
 0xd9d   :  { %1042 = vrot.lane.b32.xlu1 %v1040_v21, %s3067_s0  ;;  %v3513_v21 = vld [vmem:[#allocation15 + $0x20] ss:$8 sps:$4 sm:$0xff]  }
 0xdff   :  { %v1053_v24 = vpop.permute.xlu1 %1052 }
 0xe00   :  { %2508 = vmatmul.mubr.msk.bf16.vlgmr.msra.gmra.mxu1 %vm417_vm4, %v1053_v24  ;;  %v3526_v24 = vld [vmem:[#allocation15 + $0x4] ss:$8 sps:$4 sm:$0xff]  }
 0xe01   :  { %1314 = vmatprep.mubr.bf16.mxu1 %v3066_v0  ;;  %1291 = vmatpush1.bf16.msra.mxu1 %v2647_v54 }
 0xe02   :  { %1292 = vmatprep.subr.bf16.mxu1 %v2655_v57 }
 0xe03   :  { %v543_v28 = vpop.permute.xlu1 %542 }
 0xe04   :  { %546 = vst.msk [vmem:[#allocation4] sm:$0x3] %vm545_vm5, %v543_v28  ;;  %547 = vst.msk [vmem:[#allocation5 + $0xe] sm:$0x3] %vm545_vm5, %v543_v28  ;;  %v3531_v28 = vld [vmem:[#allocation15] ss:$8 sps:$4 sm:$0xff]  }
 0xe05   :  { %1293 = vmatpush1.bf16.msra.mxu1 %v2653_v58 }
 0xe06   :  { %1294 = vmatprep.subr.bf16.mxu1 %v2661_v1 }
 0xe07   :  { %v712_v29 = vpop.permute.xlu1 %711 }
 0xe08   :  { %715 = vst.msk [vmem:[#allocation4] sm:$0x30] %vm714_vm6, %v712_v29  ;;  %716 = vst.msk [vmem:[#allocation5 + $0x6] sm:$0x30] %vm714_vm6, %v712_v29  ;;  %v1325_v29 = vld [vmem:[#allocation16] sm:$0x3] }
 0xe09   :  { %1295 = vmatpush1.bf16.msra.mxu1 %v2659_v62 }
 0xe0a   :  { %1296 = vmatprep.subr.bf16.mxu1 %v2667_v3 }
 0xe0b   :  { %v876_v25 = vpop.permute.xlu1 %875 }
 0xe0c   :  { %878 = vst.msk [vmem:[#allocation4 + $0x8] sm:$0x3] %vm545_vm5, %v876_v25  ;;  %879 = vst.msk [vmem:[#allocation5 + $0x6] sm:$0x3] %vm545_vm5, %v876_v25  ;;  %v1330_v25 = vrot.slane %v1325_v29, %v404_v47  ;;  %vm2193_vm5 = vcmask 261120  }
 0xe0f   :  { %v1043_v26 = vpop.permute.xlu1 %1042 }
 0xe10   :  { %1045 = vst.msk [vmem:[#allocation4 + $0x8] sm:$0x30] %vm714_vm6, %v1043_v26  ;;  %1046 = vst.msk [vmem:[#allocation5 - $0x2] sm:$0x30] %vm714_vm6, %v1043_v26 }
 0xec0   :  { %v1091_v27 = vpop.f32.mrf.mxu1 }
 0xec1   :  { %v1099_v30 = vrot.slane %v1091_v27, 2 }
 0xec2   :  { %v1093_v33 = vpop.f32.mrf.mxu1 }
 0xec3   :  { %v1101_v34 = vadd.f32 %v1099_v30, %v1047_v31  ;;  %v1108_v45 = vadd.f32 %v3381_v14, %v1093_v33  ;;  %v2650_v14 = vld [vmem:[#allocation13 + $0x20] ss:$8 sps:$4 sm:$0xff]   ;;  %v1334_v31 = vrot.slane %v1325_v29, %v408_v49 }
 0xec4   :  { %v1095_v35 = vpop.f32.mrf.mxu1  ;;  %1207 = vmatpush1.bf16.msra.mxu0 %v2650_v14 }
 0xec5   :  { %v2509_v37 = vmul.f32 -1.442695, %v1101_v34  ;;  %v1110_v40 = vrot.slane %v1108_v45, 2  ;;  %1208 = vmatprep.subr.bf16.mxu0 %v2658_v60 }
 0xec6   :  { %v1096_v36 = vpop.f32.mrf.mxu1 }
 0xec7   :  { %2728 = vpow2.f32 %v2509_v37 }
 0xec8   :  { %1209 = vmatpush1.bf16.msra.mxu0 %v2656_v59 }
 0xec9   :  { %1210 = vmatprep.subr.bf16.mxu0 %v2664_v2 }
 0xecc   :  { %1211 = vmatpush1.bf16.msra.mxu0 %v2662_v4 }
 0xecd   :  { %1404 = vmatprep.subr.bf16.mxu0 %v3501_v5 }
 0xed4   :  { %v2729_v38 = vpop.eup %2728 }
 0xed5   :  { %v1105_v39 = vadd.f32 1.0, %v2729_v38 }
 0xed7   :  { %2730 = vrcp.f32 %v1105_v39 }
 0xee4   :  { %v2731_v42 = vpop.eup %2730 }
 0xee5   :  { %v1112_v48 = vmul.f32 %v2731_v42, %v1110_v40  ;;  %v1123_v43 = vmul.f32 %v2731_v42, %v1121_v41 }
 0xee7   :  { %v1113_v44 = vadd.f32 %v1112_v48, %v1048_v50 }
 0xee9   :  { %2732 = vtanh.f32 %v1113_v44 }
 0xef6   :  { %v2733_v51 = vpop.eup %2732 }
 0xef7   :  { %1117 = vrot.lane.b32.xlu0 %v2733_v51, %s3067_s0 }
 0xefb   :  { %626 = vrot.lane.b32.xlu0 %v3403_v61, %s3067_s0  ;;  %v2665_v61 = vld [vmem:[#allocation12] ss:$8 sps:$4 sm:$0xff]  }
 0xefc   :  { %1297 = vmatpush1.bf16.msra.mxu1 %v2665_v61 }
 0xefd   :  { %1487 = vmatprep.subr.bf16.mxu1 %v3501_v5 }
 0xeff   :  { %796 = vrot.lane.b32.xlu0 %v3439_v63, %s3067_s0  ;;  %v1115_v63 = vsub.f32 1.0, %v2731_v42 }
 0xf03   :  { %958 = vrot.lane.b32.xlu0 %v3473_v56, %s3067_s0 }
 0xf69   :  { %v1118_v6 = vpop.permute.xlu0 %1117 }
 0xf6a   :  { %v1120_v56 = vmul.f32 %v1118_v6, %v1115_v63 }
 0xf6c   :  { %v1124_v7 = vadd.f32 %v1123_v43, %v1120_v56 }
 0xf6d   :  { %v627_v8 = vpop.permute.xlu0 %626 }
 0xf6e   :  { %630 = vst.msk [vmem:[#allocation4] sm:$0xc] %vm629_vm7, %v627_v8  ;;  %631 = vst.msk [vmem:[#allocation5 + $0xa] sm:$0xc] %vm629_vm7, %v627_v8  ;;  %1126 = vrot.lane.b32.xlu0 %v1124_v7, %s3067_s0 }
 0xf71   :  { %v797_v9 = vpop.permute.xlu0 %796 }
 0xf72   :  { %800 = vst.msk [vmem:[#allocation4] sm:$0xc0] %vm799_vm8, %v797_v9  ;;  %801 = vst.msk [vmem:[#allocation5 + $0x2] sm:$0xc0] %vm799_vm8, %v797_v9 }
 0xf75   :  { %v959_v10 = vpop.permute.xlu0 %958 }
 0xf76   :  { %961 = vst.msk [vmem:[#allocation4 + $0x8] sm:$0xc] %vm629_vm7, %v959_v10  ;;  %962 = vst.msk [vmem:[#allocation5 + $0x2] sm:$0xc] %vm629_vm7, %v959_v10  ;;  %vm2313_vm7 = vcmask 130048  }
 0xf79   :  { %v1135_v12 = vld [vmem:[#allocation5 + $0x8] sm:$0xff]  ;;  %v1131_v16 = vld [vmem:[#allocation4] sm:$0xff] }
 0xfe0   :  { %v1127_v11 = vpop.permute.xlu0 %1126 }
 0xfe1   :  { %1129 = vst.msk [vmem:[#allocation4 + $0x8] sm:$0xc0] %vm799_vm8, %v1127_v11  ;;  %1130 = vst.msk [vmem:[#allocation5 - $0x6] sm:$0xc0] %vm799_vm8, %v1127_v11 }
 0xfe8   :  { %v1134_v15 = vld [vmem:[#allocation5] sm:$0xff]  ;;  %v1132_v17 = vld [vmem:[#allocation4 + $0x8] sm:$0xff] }
 0xfe9   :  { %v1136_v18 = vpack.c.bf16 %v1135_v12, %v1134_v15  ;;  %v1133_v19 = vpack.c.bf16 %v1132_v17, %v1131_v16 }
 0xfeb   :  { %2518 = vmatmul.mubr.msk.bf16.vlgmr.msra.gmra.mxu0 %vm417_vm4, %v1136_v18  ;;  %2527 = vmatmul.mubr.msk.bf16.vlgmr.msra.gmra.mxu1 %vm417_vm4, %v1133_v19 }
 0xfec   :  { %1405 = vmatpush1.bf16.msra.mxu0 %v3506_v13  ;;  %1428 = vmatprep.mubr.bf16.mxu0 %v3066_v0 }
 0xfed   :  { %1406 = vmatprep.subr.bf16.mxu0 %v3508_v20  ;;  %1488 = vmatpush1.bf16.msra.mxu1 %v3506_v13 }
 0xfee   :  { %1489 = vmatprep.subr.bf16.mxu1 %v3508_v20  ;;  %1511 = vmatprep.mubr.bf16.mxu1 %v3066_v0 }
 0xff0   :  { %1407 = vmatpush1.bf16.msra.mxu0 %v3513_v21 }
 0xff1   :  { %1408 = vmatprep.subr.bf16.mxu0 %v3517_v22  ;;  %1490 = vmatpush1.bf16.msra.mxu1 %v3513_v21 }
 0xff2   :  { %1491 = vmatprep.subr.bf16.mxu1 %v3517_v22 }
 0xff4   :  { %1409 = vmatpush1.bf16.msra.mxu0 %v3523_v23 }
 0xff5   :  { %1410 = vmatprep.subr.bf16.mxu0 %v3526_v24  ;;  %1492 = vmatpush1.bf16.msra.mxu1 %v3523_v23 }
 0xff6   :  { %1493 = vmatprep.subr.bf16.mxu1 %v3526_v24 }
 0xff8   :  { %1411 = vmatpush1.bf16.msra.mxu0 %v3531_v28 }
 0xff9   :  { %1494 = vmatpush1.bf16.msra.mxu1 %v3531_v28  ;;  %1573 = vmatprep.subr.bf16.mxu0 %v3501_v5 }
 0xffa   :  { %1659 = vmatprep.subr.bf16.mxu1 %v3501_v5 }
 0xffb   :  { %1429 = vmatmul.mubr.bf16.vlgmr.msra.gmra.mxu0 %v3066_v0 }
 0xffc   :  { %1574 = vmatpush1.bf16.msra.mxu0 %v3506_v13  ;;  %1597 = vmatprep.mubr.bf16.mxu0 %v3066_v0 }
 0xffd   :  { %1575 = vmatprep.subr.bf16.mxu0 %v3508_v20 }
0x1000   :  { %1576 = vmatpush1.bf16.msra.mxu0 %v3513_v21 }
0x1001   :  { %1577 = vmatprep.subr.bf16.mxu0 %v3517_v22 }
0x1004   :  { %1578 = vmatpush1.bf16.msra.mxu0 %v3523_v23 }
0x1005   :  { %1579 = vmatprep.subr.bf16.mxu0 %v3526_v24 }
0x1008   :  { %1580 = vmatpush1.bf16.msra.mxu0 %v3531_v28 }
0x1009   :  { %1745 = vmatprep.subr.bf16.mxu0 %v3501_v5 }
0x10ab   :  { %v1230_v26 = vpop.f32.mrf.mxu0  ;;  %v1316_v27 = vpop.f32.mrf.mxu1 }
0x10ac   :  { %v1317_v30 = vadd.f32 %v1316_v27, %v1230_v26 }
0x10ad   :  { %v1232_v33 = vpop.f32.mrf.mxu0  ;;  %v1318_v34 = vpop.f32.mrf.mxu1 }
0x10ae   :  { %v1337_v35 = vadd.f32 %v1330_v25, %v1317_v30  ;;  %v1319_v37 = vadd.f32 %v1318_v34, %v1232_v33 }
0x10af   :  { %v1234_v36 = vpop.f32.mrf.mxu0  ;;  %v1320_v38 = vpop.f32.mrf.mxu1 }
0x10b0   :  { %1341 = vst [vmem:[#allocation3] sm:$0xff] %v1337_v35  ;;  %v1338_v39 = vadd.f32 %v1334_v31, %v1319_v37  ;;  %v1321_v45 = vadd.f32 %v1320_v38, %v1234_v36 }
0x10b1   :  { %v1236_v40 = vpop.f32.mrf.mxu0  ;;  %v1322_v41 = vpop.f32.mrf.mxu1 }
0x10b2   :  { %1342 = vst.msk [vmem:[#allocation3 + $0x8] sm:$0xff] %vm417_vm4, %v1338_v39  ;;  %v1339_v47 = vadd.f32 %v1330_v25, %v1321_v45  ;;  %v1323_v42 = vadd.f32 %v1322_v41, %v1236_v40 }
0x10b4   :  { %1343 = vst [vmem:[#allocation3 + $0x10] sm:$0xff] %v1339_v47  ;;  %v1340_v48 = vadd.f32 %v1334_v31, %v1323_v42 }
0x10b6   :  { %1344 = vst.msk [vmem:[#allocation3 + $0x18] sm:$0xff] %vm417_vm4, %v1340_v48 }
0x10b7   :  { %v1354_v46 = vld [vmem:[#allocation3] sm:$0x3]  ;;  %v1470_v7 = vld [vmem:[#allocation3] sm:$0xc]  ;;  %v1555_v41 = vld [vmem:[#allocation3] sm:$0x30] }
0x10b9   :  { %v1355_v58 = vld [vmem:[#allocation3 + $0x8] sm:$0x3]  ;;  %v1471_v25 = vld [vmem:[#allocation3 + $0x8] sm:$0xc] }
0x10bb   :  { %v1430_v49 = vpop.f32.mrf.mxu0 }
0x10bc   :  { %v1437_v43 = vadd.f32 %v1430_v49, %v1354_v46 }
0x10bd   :  { %v1432_v50 = vpop.f32.mrf.mxu0 }
0x10be   :  { %v2536_v44 = vmul.f32 -1.442695, %v1437_v43  ;;  %v1450_v32 = vadd.f32 %v3556_v55, %v1432_v50 }
0x10bf   :  { %v1434_v51 = vpop.f32.mrf.mxu0 }
0x10c0   :  { %2734 = vpow2.f32 %v2536_v44 }
0x10c1   :  { %v1435_v52 = vpop.f32.mrf.mxu0 }
0x10cd   :  { %v2735_v53 = vpop.eup %2734 }
0x10ce   :  { %v1441_v54 = vadd.f32 1.0, %v2735_v53 }
0x10d0   :  { %2736 = vrcp.f32 %v1441_v54  ;;  %v1556_v54 = vld [vmem:[#allocation3 + $0x8] sm:$0x30] }
0x10dd   :  { %v2737_v57 = vpop.eup %2736 }
0x10de   :  { %v1451_v14 = vmul.f32 %v2737_v57, %v1450_v32  ;;  %v1454_v62 = vsub.f32 1.0, %v2737_v57  ;;  %v1460_v2 = vmul.f32 0.0, %v2737_v57 }
0x10e0   :  { %v1452_v59 = vadd.f32 %v1451_v14, %v1355_v58 }
0x10e2   :  { %2738 = vtanh.f32 %v1452_v59 }
0x10ef   :  { %v2739_v60 = vpop.eup %2738 }
0x10f0   :  { %1456 = vrot.lane.b32.xlu1 %v2739_v60, %s3067_s0 }
0x1162   :  { %v1457_v1 = vpop.permute.xlu1 %1456 }
0x1163   :  { %v1459_v3 = vmul.f32 %v1457_v1, %v1454_v62 }
0x1165   :  { %v3560_v4 = vadd.f32 %v1460_v2, %v1459_v3 }
0x1167   :  { %v1472_v61 = vpack.c.bf16 %v3560_v4, %v3560_v4  ;;  %v1543_v31 = vrot.slane %v3560_v4, 6 }
0x1169   :  { %1474 = vrot.lane.b32.xlu0 %v1472_v61, %s3067_s0 }
0x11db   :  { %v1475_v63 = vpop.permute.xlu0 %1474 }
0x11dc   :  { %2538 = vmatmul.mubr.msk.bf16.vlgmr.msra.gmra.mxu1 %vm417_vm4, %v1475_v63 }
0x11dd   :  { %1660 = vmatpush1.bf16.msra.mxu1 %v3506_v13  ;;  %1683 = vmatprep.mubr.bf16.mxu1 %v3066_v0 }
0x11de   :  { %1661 = vmatprep.subr.bf16.mxu1 %v3508_v20 }
0x11e1   :  { %1662 = vmatpush1.bf16.msra.mxu1 %v3513_v21 }
0x11e2   :  { %1663 = vmatprep.subr.bf16.mxu1 %v3517_v22 }
0x11e5   :  { %1664 = vmatpush1.bf16.msra.mxu1 %v3523_v23 }
0x11e6   :  { %1665 = vmatprep.subr.bf16.mxu1 %v3526_v24 }
0x11e9   :  { %1666 = vmatpush1.bf16.msra.mxu1 %v3531_v28 }
0x11ea   :  { %1822 = vmatprep.subr.bf16.mxu1 %v3501_v5 }
0x129c   :  { %v1513_v6 = vpop.f32.mrf.mxu1 }
0x129d   :  { %v1521_v56 = vrot.slane %v1513_v6, 6 }
0x129e   :  { %v1515_v8 = vpop.f32.mrf.mxu1 }
0x129f   :  { %v1523_v9 = vadd.f32 %v1521_v56, %v1470_v7  ;;  %v1530_v17 = vadd.f32 %v3556_v55, %v1515_v8  ;;  %v1641_v56 = vld [vmem:[#allocation3] sm:$0xc0] }
0x12a0   :  { %v1517_v10 = vpop.f32.mrf.mxu1 }
0x12a1   :  { %v2539_v11 = vmul.f32 -1.442695, %v1523_v9  ;;  %v1532_v18 = vrot.slane %v1530_v17, 6 }
0x12a2   :  { %v1518_v12 = vpop.f32.mrf.mxu1 }
0x12a3   :  { %2740 = vpow2.f32 %v2539_v11 }
0x12b0   :  { %v2741_v15 = vpop.eup %2740 }
0x12b1   :  { %v1527_v16 = vadd.f32 1.0, %v2741_v15 }
0x12b3   :  { %2742 = vrcp.f32 %v1527_v16 }
0x12c0   :  { %v2743_v19 = vpop.eup %2742 }
0x12c1   :  { %v1534_v29 = vmul.f32 %v2743_v19, %v1532_v18  ;;  %v1537_v30 = vsub.f32 1.0, %v2743_v19  ;;  %v1545_v34 = vmul.f32 %v2743_v19, %v1543_v31 }
0x12c3   :  { %v1535_v26 = vadd.f32 %v1534_v29, %v1471_v25  ;;  %v1642_v29 = vld [vmem:[#allocation3 + $0x8] sm:$0xc0] }
0x12c5   :  { %2744 = vtanh.f32 %v1535_v26 }
0x12d2   :  { %v2745_v27 = vpop.eup %2744 }
0x12d3   :  { %1539 = vrot.lane.b32.xlu1 %v2745_v27, %s3067_s0 }
0x1345   :  { %v1540_v33 = vpop.permute.xlu1 %1539 }
0x1346   :  { %v1542_v35 = vmul.f32 %v1540_v33, %v1537_v30 }
0x1348   :  { %v3578_v37 = vadd.f32 %v1545_v34, %v1542_v35 }
0x134a   :  { %v1557_v36 = vpack.c.bf16 %v3578_v37, %v3578_v37  ;;  %v1629_v58 = vrot.slane %v3578_v37, 6 }
0x134c   :  { %v1559_v38 = vrot.slane %v1557_v36, 1 }
0x134e   :  { %1560 = vrot.lane.b32.xlu0 %v1559_v38, %s3067_s0 }
0x13c0   :  { %v1561_v39 = vpop.permute.xlu0 %1560 }
0x13c1   :  { %2540 = vmatmul.mubr.msk.bf16.vlgmr.msra.gmra.mxu0 %vm417_vm4, %v1561_v39  ;;  %v1727_v39 = vld [vmem:[#allocation3 + $0x10] sm:$0x3] }
0x13c2   :  { %1746 = vmatpush1.bf16.msra.mxu0 %v3506_v13  ;;  %1769 = vmatprep.mubr.bf16.mxu0 %v3066_v0 }
0x13c3   :  { %1747 = vmatprep.subr.bf16.mxu0 %v3508_v20 }
0x13c6   :  { %1748 = vmatpush1.bf16.msra.mxu0 %v3513_v21 }
0x13c7   :  { %1749 = vmatprep.subr.bf16.mxu0 %v3517_v22 }
0x13ca   :  { %1750 = vmatpush1.bf16.msra.mxu0 %v3523_v23 }
0x13cb   :  { %1751 = vmatprep.subr.bf16.mxu0 %v3526_v24 }
0x13ce   :  { %1752 = vmatpush1.bf16.msra.mxu0 %v3531_v28 }
0x13cf   :  { %1906 = vmatprep.subr.bf16.mxu0 %v3501_v5 }
0x1481   :  { %v1599_v45 = vpop.f32.mrf.mxu0 }
0x1482   :  { %v1607_v40 = vrot.slane %v1599_v45, 4 }
0x1483   :  { %v1601_v47 = vpop.f32.mrf.mxu0 }
0x1484   :  { %v1609_v42 = vadd.f32 %v1607_v40, %v1555_v41  ;;  %v1616_v44 = vadd.f32 %v3556_v55, %v1601_v47 }
0x1485   :  { %v1603_v48 = vpop.f32.mrf.mxu0 }
0x1486   :  { %v2541_v46 = vmul.f32 -1.442695, %v1609_v42  ;;  %v1618_v51 = vrot.slane %v1616_v44, 4 }
0x1487   :  { %v1604_v49 = vpop.f32.mrf.mxu0 }
0x1488   :  { %2746 = vpow2.f32 %v2541_v46 }
0x1495   :  { %v2747_v43 = vpop.eup %2746 }
0x1496   :  { %v1613_v50 = vadd.f32 1.0, %v2747_v43 }
0x1498   :  { %2748 = vrcp.f32 %v1613_v50 }
0x14a5   :  { %v2749_v52 = vpop.eup %2748 }
0x14a6   :  { %v1620_v53 = vmul.f32 %v2749_v52, %v1618_v51  ;;  %v1623_v14 = vsub.f32 1.0, %v2749_v52  ;;  %v1631_v60 = vmul.f32 %v2749_v52, %v1629_v58  ;;  %v1728_v51 = vld [vmem:[#allocation3 + $0x18] sm:$0x3] }
0x14a8   :  { %v1621_v32 = vadd.f32 %v1620_v53, %v1556_v54 }
0x14aa   :  { %2750 = vtanh.f32 %v1621_v32 }
0x14b7   :  { %v2751_v57 = vpop.eup %2750 }
0x14b8   :  { %1625 = vrot.lane.b32.xlu1 %v2751_v57, %s3067_s0 }
0x152a   :  { %v1626_v59 = vpop.permute.xlu1 %1625 }
0x152b   :  { %v1628_v62 = vmul.f32 %v1626_v59, %v1623_v14 }
0x152d   :  { %v3596_v1 = vadd.f32 %v1631_v60, %v1628_v62 }
0x152f   :  { %v1643_v2 = vpack.c.bf16 %v3596_v1, %v3596_v1  ;;  %v1715_v27 = vrot.slane %v3596_v1, 6 }
0x1531   :  { %v1645_v3 = vrot.slane %v1643_v2, 2 }
0x1533   :  { %1646 = vrot.lane.b32.xlu0 %v1645_v3, %s3067_s0 }
0x15a5   :  { %v1647_v61 = vpop.permute.xlu0 %1646 }
0x15a6   :  { %2542 = vmatmul.mubr.msk.bf16.vlgmr.msra.gmra.mxu1 %vm417_vm4, %v1647_v61  ;;  %v1805_v61 = vld [vmem:[#allocation3 + $0x10] sm:$0xc] }
0x15a7   :  { %1823 = vmatpush1.bf16.msra.mxu1 %v3506_v13  ;;  %1846 = vmatprep.mubr.bf16.mxu1 %v3066_v0 }
0x15a8   :  { %1824 = vmatprep.subr.bf16.mxu1 %v3508_v20 }
0x15ab   :  { %1825 = vmatpush1.bf16.msra.mxu1 %v3513_v21 }
0x15ac   :  { %1826 = vmatprep.subr.bf16.mxu1 %v3517_v22 }
0x15af   :  { %1827 = vmatpush1.bf16.msra.mxu1 %v3523_v23 }
0x15b0   :  { %1828 = vmatprep.subr.bf16.mxu1 %v3526_v24 }
0x15b3   :  { %1829 = vmatpush1.bf16.msra.mxu1 %v3531_v28 }
0x15b4   :  { %1990 = vmatprep.subr.bf16.mxu1 %v3501_v5 }
0x1666   :  { %v1685_v63 = vpop.f32.mrf.mxu1 }
0x1667   :  { %v1693_v6 = vrot.slane %v1685_v63, 2 }
0x1668   :  { %v1687_v7 = vpop.f32.mrf.mxu1 }
0x1669   :  { %v1695_v8 = vadd.f32 %v1693_v6, %v1641_v56  ;;  %v1702_v16 = vadd.f32 %v3556_v55, %v1687_v7 }
0x166a   :  { %v1689_v9 = vpop.f32.mrf.mxu1 }
0x166b   :  { %v2543_v10 = vmul.f32 -1.442695, %v1695_v8  ;;  %v1704_v17 = vrot.slane %v1702_v16, 2 }
0x166c   :  { %v1690_v11 = vpop.f32.mrf.mxu1 }
0x166d   :  { %2752 = vpow2.f32 %v2543_v10 }
0x167a   :  { %v2753_v12 = vpop.eup %2752 }
0x167b   :  { %v1699_v15 = vadd.f32 1.0, %v2753_v12 }
0x167d   :  { %2754 = vrcp.f32 %v1699_v15 }
0x168a   :  { %v2755_v18 = vpop.eup %2754 }
0x168b   :  { %v1706_v19 = vmul.f32 %v2755_v18, %v1704_v17  ;;  %v1709_v26 = vsub.f32 1.0, %v2755_v18  ;;  %v1717_v31 = vmul.f32 %v2755_v18, %v1715_v27 }
0x168d   :  { %v1707_v25 = vadd.f32 %v1706_v19, %v1642_v29 }
0x168f   :  { %2756 = vtanh.f32 %v1707_v25 }
0x169c   :  { %v2757_v5 = vpop.eup %2756 }
0x169d   :  { %1711 = vrot.lane.b32.xlu1 %v2757_v5, %s3067_s0 }
0x170f   :  { %v1712_v30 = vpop.permute.xlu1 %1711 }
0x1710   :  { %v1714_v33 = vmul.f32 %v1712_v30, %v1709_v26  ;;  %v1888_v26 = vld [vmem:[#allocation3 + $0x10] sm:$0x30] }
0x1712   :  { %v3614_v34 = vadd.f32 %v1717_v31, %v1714_v33 }
0x1714   :  { %v1729_v35 = vpack.c.bf16 %v3614_v34, %v3614_v34  ;;  %v1795_v32 = vrot.slane %v3614_v34, 6 }
0x1716   :  { %v1731_v36 = vrot.slane %v1729_v35, 3 }
0x1718   :  { %1732 = vrot.lane.b32.xlu0 %v1731_v36, %s3067_s0 }
0x178a   :  { %v1733_v38 = vpop.permute.xlu0 %1732 }
0x178b   :  { %2544 = vmatmul.mubr.msk.bf16.vlgmr.msra.gmra.mxu0 %vm417_vm4, %v1733_v38 }
0x178c   :  { %1907 = vmatpush1.bf16.msra.mxu0 %v3506_v13  ;;  %1930 = vmatprep.mubr.bf16.mxu0 %v3066_v0 }
0x178d   :  { %1908 = vmatprep.subr.bf16.mxu0 %v3508_v20 }
0x1790   :  { %1909 = vmatpush1.bf16.msra.mxu0 %v3513_v21 }
0x1791   :  { %1910 = vmatprep.subr.bf16.mxu0 %v3517_v22 }
0x1794   :  { %1911 = vmatpush1.bf16.msra.mxu0 %v3523_v23 }
0x1795   :  { %1912 = vmatprep.subr.bf16.mxu0 %v3526_v24 }
0x1798   :  { %1913 = vmatpush1.bf16.msra.mxu0 %v3531_v28 }
0x184b   :  { %v1771_v45 = vpop.f32.mrf.mxu0 }
0x184c   :  { %v1778_v40 = vadd.f32 %v1771_v45, %v1727_v39 }
0x184d   :  { %v1773_v41 = vpop.f32.mrf.mxu0 }
0x184e   :  { %v2545_v47 = vmul.f32 -1.442695, %v1778_v40  ;;  %v1785_v43 = vadd.f32 %v3556_v55, %v1773_v41 }
0x184f   :  { %v1775_v42 = vpop.f32.mrf.mxu0 }
0x1850   :  { %2758 = vpow2.f32 %v2545_v47  ;;  %v1889_v47 = vld [vmem:[#allocation3 + $0x18] sm:$0x30] }
0x1851   :  { %v1776_v48 = vpop.f32.mrf.mxu0 }
0x185d   :  { %v2759_v46 = vpop.eup %2758 }
0x185e   :  { %v1782_v49 = vadd.f32 1.0, %v2759_v46 }
0x1860   :  { %2760 = vrcp.f32 %v1782_v49 }
0x186d   :  { %v2761_v50 = vpop.eup %2760 }
0x186e   :  { %v1786_v44 = vmul.f32 %v2761_v50, %v1785_v43  ;;  %v1789_v54 = vsub.f32 1.0, %v2761_v50  ;;  %v1797_v14 = vmul.f32 %v2761_v50, %v1795_v32 }
0x1870   :  { %v1787_v52 = vadd.f32 %v1786_v44, %v1728_v51 }
0x1872   :  { %2762 = vtanh.f32 %v1787_v52 }
0x187f   :  { %v2763_v53 = vpop.eup %2762 }
0x1880   :  { %1791 = vrot.lane.b32.xlu1 %v2763_v53, %s3067_s0 }
0x18f2   :  { %v1792_v57 = vpop.permute.xlu1 %1791 }
0x18f3   :  { %v1794_v58 = vmul.f32 %v1792_v57, %v1789_v54 }
0x18f5   :  { %v3631_v59 = vadd.f32 %v1797_v14, %v1794_v58  ;;  %v1972_v14 = vld [vmem:[#allocation3 + $0x10] sm:$0xc0] }
0x18f7   :  { %v1807_v60 = vpack.c.bf16 %v3631_v59, %v3631_v59  ;;  %v1878_v11 = vrot.slane %v3631_v59, 6 }
0x18f9   :  { %1809 = vrot.lane.b32.xlu0 %v1807_v60, %s3067_s0 }
0x196b   :  { %v1810_v62 = vpop.permute.xlu0 %1809 }
0x196c   :  { %2546 = vmatmul.mubr.msk.bf16.vlgmr.msra.gmra.mxu1 %vm417_vm4, %v1810_v62 }
0x196d   :  { %1991 = vmatpush1.bf16.msra.mxu1 %v3506_v13  ;;  %2014 = vmatprep.mubr.bf16.mxu1 %v3066_v0 }
0x196e   :  { %1992 = vmatprep.subr.bf16.mxu1 %v3508_v20 }
0x1971   :  { %1993 = vmatpush1.bf16.msra.mxu1 %v3513_v21 }
0x1972   :  { %1994 = vmatprep.subr.bf16.mxu1 %v3517_v22 }
0x1975   :  { %1995 = vmatpush1.bf16.msra.mxu1 %v3523_v23 }
0x1976   :  { %1996 = vmatprep.subr.bf16.mxu1 %v3526_v24  ;;  %v1806_v24 = vld [vmem:[#allocation3 + $0x18] sm:$0xc] }
0x1979   :  { %1997 = vmatpush1.bf16.msra.mxu1 %v3531_v28 }
0x1a2c   :  { %v1848_v2 = vpop.f32.mrf.mxu1 }
0x1a2d   :  { %v1856_v3 = vrot.slane %v1848_v2, 6 }
0x1a2e   :  { %v1850_v63 = vpop.f32.mrf.mxu1 }
0x1a2f   :  { %v1858_v6 = vadd.f32 %v1856_v3, %v1805_v61  ;;  %v1865_v21 = vadd.f32 %v3556_v55, %v1850_v63 }
0x1a30   :  { %v1852_v13 = vpop.f32.mrf.mxu1 }
0x1a31   :  { %v2547_v56 = vmul.f32 -1.442695, %v1858_v6  ;;  %v1867_v22 = vrot.slane %v1865_v21, 6 }
0x1a32   :  { %v1853_v0 = vpop.f32.mrf.mxu1 }
0x1a33   :  { %2764 = vpow2.f32 %v2547_v56 }
0x1a40   :  { %v2765_v20 = vpop.eup %2764 }
0x1a41   :  { %v1862_v7 = vadd.f32 1.0, %v2765_v20 }
0x1a43   :  { %2766 = vrcp.f32 %v1862_v7  ;;  %v1973_v7 = vld [vmem:[#allocation3 + $0x18] sm:$0xc0] }
0x1a50   :  { %v2767_v23 = vpop.eup %2766 }
0x1a51   :  { %v1869_v8 = vmul.f32 %v2767_v23, %v1867_v22  ;;  %v1872_v10 = vsub.f32 1.0, %v2767_v23  ;;  %v1880_v15 = vmul.f32 %v2767_v23, %v1878_v11 }
0x1a53   :  { %v1870_v9 = vadd.f32 %v1869_v8, %v1806_v24 }
0x1a55   :  { %2768 = vtanh.f32 %v1870_v9 }
0x1a62   :  { %v2769_v28 = vpop.eup %2768 }
0x1a63   :  { %1874 = vrot.lane.b32.xlu1 %v2769_v28, %s3067_s0 }
0x1ad5   :  { %v1875_v12 = vpop.permute.xlu1 %1874 }
0x1ad6   :  { %v1877_v16 = vmul.f32 %v1875_v12, %v1872_v10 }
0x1ad8   :  { %v3648_v17 = vadd.f32 %v1880_v15, %v1877_v16 }
0x1ada   :  { %v1890_v18 = vpack.c.bf16 %v3648_v17, %v3648_v17  ;;  %v1962_v49 = vrot.slane %v3648_v17, 6 }
0x1adc   :  { %v1892_v19 = vrot.slane %v1890_v18, 1 }
0x1ade   :  { %1893 = vrot.lane.b32.xlu0 %v1892_v19, %s3067_s0 }
0x1b50   :  { %v1894_v29 = vpop.permute.xlu0 %1893 }
0x1b51   :  { %2548 = vmatmul.mubr.msk.bf16.vlgmr.msra.gmra.mxu0 %vm417_vm4, %v1894_v29 }
0x1c11   :  { %v1932_v25 = vpop.f32.mrf.mxu0 }
0x1c12   :  { %v1940_v5 = vrot.slane %v1932_v25, 4 }
0x1c13   :  { %v1934_v27 = vpop.f32.mrf.mxu0 }
0x1c14   :  { %v1942_v30 = vadd.f32 %v1940_v5, %v1888_v26  ;;  %v1949_v39 = vadd.f32 %v3556_v55, %v1934_v27 }
0x1c15   :  { %v1936_v31 = vpop.f32.mrf.mxu0 }
0x1c16   :  { %v2549_v33 = vmul.f32 -1.442695, %v1942_v30  ;;  %v1951_v45 = vrot.slane %v1949_v39, 4  ;;  %v2682_v39 = vld [vmem:[%s3786_s13 + $0x8] sm:$0xff]  }
0x1c17   :  { %v1937_v35 = vpop.f32.mrf.mxu0 }
0x1c18   :  { %2770 = vpow2.f32 %v2549_v33  ;;  %v2680_v35 = vld [vmem:[%s3786_s13 + $0x18] sm:$0xff]  }
0x1c25   :  { %v2771_v36 = vpop.eup %2770 }
0x1c26   :  { %v1946_v38 = vadd.f32 1.0, %v2771_v36  ;;  %v3068_v36 = vmov 0.0  }
0x1c27   :  { %2578 = vmatprep.subr.bf16.mxu0 %v3068_v36  ;;  %2590 = vmatprep.subr.bf16.mxu1 %v3068_v36 }
0x1c28   :  { %2772 = vrcp.f32 %v1946_v38  ;;  %2579 = vmatpush3.bf16.msra.mxu0 %v2680_v35  ;;  %v2681_v38 = vld [vmem:[%s3786_s13 + $0x10] sm:$0xff]   ;;  %2586 = vmatprep.mubr.msk.bf16.mxu0 %vm3069_vm1, %v3068_v36 }
0x1c29   :  { %2580 = vmatprep.subr.bf16.mxu0 %v3068_v36 }
0x1c2c   :  { %2581 = vmatpush3.bf16.msra.mxu0 %v2681_v38 }
0x1c2d   :  { %2582 = vmatprep.subr.bf16.mxu0 %v3068_v36 }
0x1c30   :  { %2583 = vmatpush3.bf16.msra.mxu0 %v2682_v39 }
0x1c31   :  { %2584 = vmatprep.subr.bf16.mxu0 %v3068_v36 }
0x1c35   :  { %v2773_v40 = vpop.eup %2772 }
0x1c36   :  { %v1953_v41 = vmul.f32 %v2773_v40, %v1951_v45  ;;  %v1956_v46 = vsub.f32 1.0, %v2773_v40  ;;  %v1964_v50 = vmul.f32 %v2773_v40, %v1962_v49  ;;  %v2683_v45 = vld [vmem:[%s3786_s13] sm:$0xff]  }
0x1c37   :  { %2585 = vmatpush3.bf16.msra.mxu0 %v2683_v45  ;;  %v2562_v45 = vld [vmem:[%s3791_s18] ss:$0 sm:$0xff] }
0x1c38   :  { %v1954_v42 = vadd.f32 %v1953_v41, %v1889_v47 }
0x1c3a   :  { %2774 = vtanh.f32 %v1954_v42 }
0x1c47   :  { %v2775_v48 = vpop.eup %2774 }
0x1c48   :  { %1958 = vrot.lane.b32.xlu1 %v2775_v48, %s3067_s0 }
0x1cba   :  { %v1959_v43 = vpop.permute.xlu1 %1958 }
0x1cbb   :  { %v1961_v44 = vmul.f32 %v1959_v43, %v1956_v46  ;;  %v2552_v43 = vld [vmem:[#allocation19] ss:$0 sm:$0xff] }
0x1cbd   :  { %v1965_v51 = vadd.f32 %v1964_v50, %v1961_v44  ;;  %v2553_v44 = vld [vmem:[#allocation21] ss:$0 sm:$0xff] }
0x1cbf   :  { %v1974_v52 = vpack.c.bf16 %v1965_v51, %v1965_v51  ;;  %v2046_v13 = vrot.slane %v1965_v51, 6 }
0x1cc1   :  { %v1976_v53 = vrot.slane %v1974_v52, 2 }
0x1cc3   :  { %1977 = vrot.lane.b32.xlu0 %v1976_v53, %s3067_s0 }
0x1cc7   :  { %1463 = vrot.lane.b32.xlu0 %v3560_v4, %s3067_s0 }
0x1ccb   :  { %1634 = vrot.lane.b32.xlu0 %v3596_v1, %s3067_s0 }
0x1ccf   :  { %1800 = vrot.lane.b32.xlu0 %v3631_v59, %s3067_s0 }
0x1cd3   :  { %1967 = vrot.lane.b32.xlu0 %v1965_v51, %s3067_s0 }
0x1d35   :  { %v1978_v54 = vpop.permute.xlu0 %1977 }
0x1d36   :  { %2550 = vmatmul.mubr.msk.bf16.vlgmr.msra.gmra.mxu1 %vm417_vm4, %v1978_v54 }
0x1d37   :  { %2594 = vmatprep.mubr.msk.bf16.mxu1 %vm3069_vm1, %v3068_v36  ;;  %vm2461_vm1 = vcmask 1042304  }
0x1d39   :  { %v1464_v32 = vpop.permute.xlu0 %1463 }
0x1d3a   :  { %1467 = vst.msk [vmem:[#allocation6] sm:$0x3] %vm1466_vm9, %v1464_v32 }
0x1d3b   :  { %1469 = vst.msk [vmem:[#allocation6 + $0xe] sm:$0x3] %vm1468_vm10, %v1464_v32 }
0x1d3d   :  { %v1635_v4 = vpop.permute.xlu0 %1634 }
0x1d3e   :  { %1638 = vst.msk [vmem:[#allocation6] sm:$0x30] %vm1637_vm11, %v1635_v4 }
0x1d3f   :  { %1640 = vst.msk [vmem:[#allocation6 + $0x6] sm:$0x30] %vm1639_vm12, %v1635_v4 }
0x1df6   :  { %v2016_v1 = vpop.f32.mrf.mxu1 }
0x1df7   :  { %v2024_v57 = vrot.slane %v2016_v1, 2 }
0x1df8   :  { %v2018_v58 = vpop.f32.mrf.mxu1 }
0x1df9   :  { %v2026_v59 = vadd.f32 %v2024_v57, %v1972_v14  ;;  %v2033_v63 = vadd.f32 %v3556_v55, %v2018_v58  ;;  %v1801_v55 = vpop.permute.xlu0 %1800 }
0x1dfa   :  { %v2020_v60 = vpop.f32.mrf.mxu1 }
0x1dfb   :  { %v2551_v62 = vmul.f32 -1.442695, %v2026_v59  ;;  %v2035_v6 = vrot.slane %v2033_v63, 2  ;;  %v2554_v60 = vld [vmem:[#allocation22] ss:$0 sm:$0xff] }
0x1dfc   :  { %v2021_v2 = vpop.f32.mrf.mxu1 }
0x1dfd   :  { %2776 = vpow2.f32 %v2551_v62  ;;  %v1968_v10 = vpop.permute.xlu0 %1967 }
0x1e0a   :  { %v2777_v3 = vpop.eup %2776 }
0x1e0b   :  { %v2030_v61 = vadd.f32 1.0, %v2777_v3 }
0x1e0d   :  { %2778 = vrcp.f32 %v2030_v61 }
0x1e1a   :  { %v2779_v56 = vpop.eup %2778 }
0x1e1b   :  { %v2037_v0 = vmul.f32 %v2779_v56, %v2035_v6  ;;  %v2048_v20 = vmul.f32 %v2779_v56, %v2046_v13  ;;  %v2040_v23 = vsub.f32 1.0, %v2779_v56 }
0x1e1d   :  { %v2038_v21 = vadd.f32 %v2037_v0, %v1973_v7 }
0x1e1f   :  { %2780 = vtanh.f32 %v2038_v21 }
0x1e2c   :  { %v2781_v22 = vpop.eup %2780 }
0x1e2d   :  { %2042 = vrot.lane.b32.xlu1 %v2781_v22, %s3067_s0 }
0x1e31   :  { %1548 = vrot.lane.b32.xlu1 %v3578_v37, %s3067_s0 }
0x1e35   :  { %1720 = vrot.lane.b32.xlu1 %v3614_v34, %s3067_s0 }
0x1e39   :  { %1883 = vrot.lane.b32.xlu1 %v3648_v17, %s3067_s0 }
0x1e9f   :  { %v2043_v8 = vpop.permute.xlu1 %2042 }
0x1ea0   :  { %v2045_v24 = vmul.f32 %v2043_v8, %v2040_v23 }
0x1ea2   :  { %v2049_v9 = vadd.f32 %v2048_v20, %v2045_v24 }
0x1ea3   :  { %v1549_v28 = vpop.permute.xlu1 %1548 }
0x1ea4   :  { %1552 = vst.msk [vmem:[#allocation6] sm:$0xc] %vm1551_vm13, %v1549_v28  ;;  %2051 = vrot.lane.b32.xlu1 %v2049_v9, %s3067_s0 }
0x1ea5   :  { %1554 = vst.msk [vmem:[#allocation6 + $0xa] sm:$0xc] %vm1553_vm14, %v1549_v28  ;;  %v2684_v28 = vld [vmem:[%s3790_s17 + $0x8] sm:$0xff]  }
0x1ea6   :  { %1970 = vst.msk [vmem:[#allocation6 + $0x8] sm:$0x30] %vm1637_vm11, %v1968_v10  ;;  %2591 = vmatpush3.bf16.msra.mxu1 %v2684_v28  ;;  %vm2419_vm11 = vcmask 255104  }
0x1ea7   :  { %1971 = vst.msk [vmem:[#allocation6 - $0x2] sm:$0x30] %vm1639_vm12, %v1968_v10  ;;  %v1721_v37 = vpop.permute.xlu1 %1720  ;;  %v2685_v10 = vld [vmem:[%s3790_s17] sm:$0xff]   ;;  %2592 = vmatprep.subr.bf16.mxu1 %v3068_v36  ;;  %vm2426_vm12 = vcmask 386304  }
0x1ea8   :  { %1724 = vst.msk [vmem:[#allocation6] sm:$0xc0] %vm1723_vm15, %v1721_v37 }
0x1ea9   :  { %1726 = vst.msk [vmem:[#allocation6 + $0x2] sm:$0xc0] %vm1725_vm0, %v1721_v37 }
0x1eaa   :  { %1803 = vst.msk [vmem:[#allocation6 + $0x8] sm:$0x3] %vm1466_vm9, %v1801_v55  ;;  %2593 = vmatpush3.bf16.msra.mxu1 %v2685_v10 }
0x1eab   :  { %1804 = vst.msk [vmem:[#allocation6 + $0x6] sm:$0x3] %vm1468_vm10, %v1801_v55  ;;  %v1884_v34 = vpop.permute.xlu1 %1883  ;;  %vm2412_vm10 = vcmask 123904  }
0x1eac   :  { %1886 = vst.msk [vmem:[#allocation6 + $0x8] sm:$0xc] %vm1551_vm13, %v1884_v34  ;;  %vm2433_vm13 = vcmask 517504  }
0x1ead   :  { %1887 = vst.msk [vmem:[#allocation6 + $0x2] sm:$0xc] %vm1553_vm14, %v1884_v34  ;;  %vm2440_vm14 = vcmask 648704  }
0x1f16   :  { %v2052_v11 = vpop.permute.xlu1 %2051 }
0x1f17   :  { %2054 = vst.msk [vmem:[#allocation6 + $0x8] sm:$0xc0] %vm1723_vm15, %v2052_v11  ;;  %vm2447_vm15 = vcmask 779904  }
0x1f18   :  { %2055 = vst.msk [vmem:[#allocation6 - $0x6] sm:$0xc0] %vm1725_vm0, %v2052_v11  ;;  %vm2454_vm0 = vcmask 911104  }
0x1f1e   :  { %v2057_v15 = vld [vmem:[#allocation6 + $0x8] sm:$0xff] }
0x1f1f   :  { %v2056_v12 = vld [vmem:[#allocation6] sm:$0xff]  ;;  %v2061_v17 = vsel %vm417_vm4, %v2057_v15, 0.0 }
0x1f20   :  { %v2058_v16 = vsel %vm417_vm4, %v2056_v12, 0.0  ;;  %2062 = vadd.xlane.f32.xlu1 %v2061_v17 }
0x1f21   :  { %2059 = vadd.xlane.f32.xlu0 %v2058_v16 }
0x1fa9   :  { %v2063_v19 = vpop.xlane.xlu1 %2062 }
0x1faa   :  { %v2060_v18 = vpop.xlane.xlu0 %2059  ;;  %v2066_v25 = vmul.f32 0.015625, %v2063_v19 }
0x1fab   :  { %v2065_v29 = vmul.f32 0.015625, %v2060_v18  ;;  %v2560_v18 = vld [vmem:[#allocation24] ss:$0 sm:$0xff] }
0x1fac   :  { %v2068_v26 = vsub.f32 %v2057_v15, %v2066_v25 }
0x1fad   :  { %v2067_v5 = vsub.f32 %v2056_v12, %v2065_v29  ;;  %v2561_v29 = vld [vmem:[#allocation25] ss:$0 sm:$0xff] }
0x1fae   :  { %v2070_v31 = vmul.f32 %v2068_v26, %v2068_v26 }
0x1faf   :  { %v2069_v27 = vmul.f32 %v2067_v5, %v2067_v5 }
0x1fb0   :  { %v2074_v33 = vsel %vm417_vm4, %v2070_v31, 0.0 }
0x1fb1   :  { %v2071_v30 = vsel %vm417_vm4, %v2069_v27, 0.0 }
0x1fb2   :  { %2072 = vadd.xlane.f32.xlu0 %v2071_v30 }
0x1fb6   :  { %2075 = vadd.xlane.f32.xlu0 %v2074_v33 }
0x203b   :  { %v2073_v40 = vpop.xlane.xlu0 %2072 }
0x203c   :  { %v2077_v41 = vmul.f32 0.015625, %v2073_v40 }
0x203e   :  { %v2079_v47 = vadd.f32 1e-05, %v2077_v41 }
0x203f   :  { %v2076_v42 = vpop.xlane.xlu0 %2075 }
0x2040   :  { %2782 = vrsqrt.f32 %v2079_v47  ;;  %v2078_v48 = vmul.f32 0.015625, %v2076_v42 }
0x2042   :  { %v2080_v46 = vadd.f32 1e-05, %v2078_v48 }
0x2044   :  { %2784 = vrsqrt.f32 %v2080_v46 }
0x204d   :  { %v2783_v49 = vpop.eup %2782 }
0x204e   :  { %v2083_v50 = vmul.f32 %v2783_v49, %v2067_v5 }
0x2050   :  { %v2092_v51 = vmul.f32 %v2552_v43, %v2083_v50 }
0x2051   :  { %v2785_v52 = vpop.eup %2784 }
0x2052   :  { %v2084_v53 = vmul.f32 %v2785_v52, %v2068_v26  ;;  %v2101_v54 = vadd.f32 %v2553_v44, %v2092_v51 }
0x2054   :  { %v2093_v32 = vmul.f32 %v2552_v43, %v2084_v53  ;;  %v2105_v1 = vmul.f32 0.01, %v2101_v54  ;;  %vm2103_vm2 = vcmp.ge.f32.partialorder %v2101_v54, 0.0 }
0x2056   :  { %v2102_v4 = vadd.f32 %v2553_v44, %v2093_v32  ;;  %v2107_v14 = vsel %vm2103_vm2, %v2101_v54, %v2105_v1 }
0x2058   :  { %vm2104_vm3 = vcmp.ge.f32.partialorder %v2102_v4, 0.0  ;;  %v2106_v57 = vmul.f32 0.01, %v2102_v4 }
0x205a   :  { %v2108_v58 = vsel %vm2104_vm3, %v2102_v4, %v2106_v57 }
0x205b   :  { %v2109_v59 = vpack.c.bf16 %v2108_v58, %v2107_v14 }
0x205d   :  { %2587 = vmatmul.mubr.msk.bf16.vlgmr.msra.gmra.mxu0 %vm417_vm4, %v2109_v59 }
0x211d   :  { %v2186_v62 = vpop.f32.mrf.mxu0 }
0x211e   :  { %v2187_v2 = vadd.f32 %v2554_v60, %v2186_v62 }
0x211f   :  { %v2588_v3 = vpop.f32.mrf.mxu0 }
0x2120   :  { %v2194_v61 = vsel %vm2193_vm5, %v2187_v2, 0.0 }
0x2121   :  { %2195 = vadd.xlane.f32.xlu1 %v2194_v61  ;;  %v2189_v63 = vpop.f32.mrf.mxu0  ;;  %v2566_v61 = vld [vmem:[%s3792_s19] ss:$0 sm:$0xff] }
0x2122   :  { %v2190_v6 = vadd.f32 %v2554_v60, %v2189_v63 }
0x2123   :  { %v2589_v13 = vpop.f32.mrf.mxu0 }
0x2124   :  { %v2197_v56 = vsel %vm2193_vm5, %v2190_v6, 0.0 }
0x2125   :  { %2198 = vadd.xlane.f32.xlu0 %v2197_v56 }
0x21aa   :  { %v2196_v0 = vpop.xlane.xlu1 %2195 }
0x21ab   :  { %v2201_v20 = vmul.f32 0.03125, %v2196_v0 }
0x21ad   :  { %v2203_v7 = vsub.f32 %v2187_v2, %v2201_v20 }
0x21ae   :  { %v2199_v21 = vpop.xlane.xlu0 %2198 }
0x21af   :  { %v2202_v22 = vmul.f32 0.03125, %v2199_v21  ;;  %v2205_v55 = vmul.f32 %v2203_v7, %v2203_v7 }
0x21b1   :  { %v2204_v23 = vsub.f32 %v2190_v6, %v2202_v22  ;;  %v2207_v8 = vsel %vm2193_vm5, %v2205_v55, 0.0  ;;  %v2567_v6 = vld [vmem:[%s3793_s20] ss:$0 sm:$0xff] }
0x21b2   :  { %2208 = vadd.xlane.f32.xlu1 %v2207_v8 }
0x21b3   :  { %v2206_v24 = vmul.f32 %v2204_v23, %v2204_v23 }
0x21b5   :  { %v2210_v9 = vsel %vm2193_vm5, %v2206_v24, 0.0 }
0x21b6   :  { %2211 = vadd.xlane.f32.xlu0 %v2210_v9 }
0x223b   :  { %v2209_v37 = vpop.xlane.xlu1 %2208 }
0x223c   :  { %v2213_v34 = vmul.f32 0.03125, %v2209_v37 }
0x223e   :  { %v2215_v11 = vadd.f32 1e-05, %v2213_v34 }
0x223f   :  { %v2212_v12 = vpop.xlane.xlu0 %2211 }
0x2240   :  { %2786 = vrsqrt.f32 %v2215_v11  ;;  %v2214_v15 = vmul.f32 0.03125, %v2212_v12 }
0x2242   :  { %v2216_v16 = vadd.f32 1e-05, %v2214_v15 }
0x2244   :  { %2788 = vrsqrt.f32 %v2216_v16 }
0x224d   :  { %v2787_v17 = vpop.eup %2786 }
0x224e   :  { %v2219_v19 = vmul.f32 %v2787_v17, %v2203_v7 }
0x2250   :  { %v2228_v25 = vmul.f32 %v2560_v18, %v2219_v19 }
0x2251   :  { %v2789_v5 = vpop.eup %2788 }
0x2252   :  { %v2220_v26 = vmul.f32 %v2789_v5, %v2204_v23  ;;  %v2237_v27 = vadd.f32 %v2561_v29, %v2228_v25 }
0x2254   :  { %v2229_v30 = vmul.f32 %v2560_v18, %v2220_v26  ;;  %v2241_v33 = vmul.f32 0.01, %v2237_v27  ;;  %vm2239_vm4 = vcmp.ge.f32.partialorder %v2237_v27, 0.0 }
0x2256   :  { %v2238_v31 = vadd.f32 %v2561_v29, %v2229_v30  ;;  %v2243_v36 = vsel %vm2239_vm4, %v2237_v27, %v2241_v33 }
0x2258   :  { %vm2240_vm6 = vcmp.ge.f32.partialorder %v2238_v31, 0.0  ;;  %v2242_v35 = vmul.f32 0.01, %v2238_v31 }
0x225a   :  { %v2244_v38 = vsel %vm2240_vm6, %v2238_v31, %v2242_v35  ;;  %v2568_v31 = vld [vmem:[%s3794_s21] ss:$0 sm:$0xff]  ;;  %s3071_s21 = smov 32  }
0x225b   :  { %v2245_v39 = vpack.c.bf16 %v2244_v38, %v2243_v36  ;;  %v2569_v35 = vld [vmem:[%s3795_s22] ss:$0 sm:$0xff] }
0x225d   :  { %2595 = vmatmul.mubr.msk.bf16.vlgmr.msra.gmra.mxu1 %vm2193_vm5, %v2245_v39 }
0x231d   :  { %v2306_v40 = vpop.f32.mrf.mxu1 }
0x231e   :  { %v2307_v41 = vadd.f32 %v2562_v45, %v2306_v40 }
0x231f   :  { %v2596_v47 = vpop.f32.mrf.mxu1 }
0x2320   :  { %v2314_v42 = vsel %vm2313_vm7, %v2307_v41, 0.0 }
0x2321   :  { %2315 = vadd.xlane.f32.xlu1 %v2314_v42  ;;  %v2309_v48 = vpop.f32.mrf.mxu1 }
0x2322   :  { %v2310_v46 = vadd.f32 %v2562_v45, %v2309_v48 }
0x2323   :  { %v2597_v49 = vpop.f32.mrf.mxu1 }
0x2324   :  { %v2317_v43 = vsel %vm2313_vm7, %v2310_v46, 0.0 }
0x2325   :  { %2318 = vadd.xlane.f32.xlu0 %v2317_v43 }
0x23aa   :  { %v2316_v50 = vpop.xlane.xlu1 %2315 }
0x23ab   :  { %v2321_v44 = vmul.f32 0.0625, %v2316_v50 }
0x23ad   :  { %v2323_v51 = vsub.f32 %v2307_v41, %v2321_v44 }
0x23ae   :  { %v2319_v52 = vpop.xlane.xlu0 %2318 }
0x23af   :  { %v2322_v53 = vmul.f32 0.0625, %v2319_v52  ;;  %v2325_v54 = vmul.f32 %v2323_v51, %v2323_v51 }
0x23b1   :  { %v2324_v32 = vsub.f32 %v2310_v46, %v2322_v53  ;;  %v2327_v4 = vsel %vm2313_vm7, %v2325_v54, 0.0 }
0x23b2   :  { %2328 = vadd.xlane.f32.xlu1 %v2327_v4 }
0x23b3   :  { %v2326_v1 = vmul.f32 %v2324_v32, %v2324_v32 }
0x23b5   :  { %v2330_v57 = vsel %vm2313_vm7, %v2326_v1, 0.0 }
0x23b6   :  { %2331 = vadd.xlane.f32.xlu0 %v2330_v57 }
0x243b   :  { %v2329_v14 = vpop.xlane.xlu1 %2328 }
0x243c   :  { %v2333_v58 = vmul.f32 0.0625, %v2329_v14 }
0x243e   :  { %v2335_v59 = vadd.f32 1e-05, %v2333_v58 }
0x243f   :  { %v2332_v60 = vpop.xlane.xlu0 %2331 }
0x2440   :  { %2790 = vrsqrt.f32 %v2335_v59  ;;  %v2334_v62 = vmul.f32 0.0625, %v2332_v60 }
0x2442   :  { %v2336_v2 = vadd.f32 1e-05, %v2334_v62 }
0x2444   :  { %2792 = vrsqrt.f32 %v2336_v2 }
0x244d   :  { %v2791_v3 = vpop.eup %2790 }
0x244e   :  { %v2339_v63 = vmul.f32 %v2791_v3, %v2323_v51 }
0x2450   :  { %v2348_v13 = vmul.f32 %v2566_v61, %v2339_v63 }
0x2451   :  { %v2793_v56 = vpop.eup %2792 }
0x2452   :  { %v2357_v0 = vadd.f32 %v2567_v6, %v2348_v13  ;;  %v2340_v20 = vmul.f32 %v2793_v56, %v2324_v32 }
0x2454   :  { %vm2359_vm8 = vcmp.ge.f32.partialorder %v2357_v0, 0.0  ;;  %v2361_v7 = vmul.f32 0.01, %v2357_v0  ;;  %v2349_v21 = vmul.f32 %v2566_v61, %v2340_v20 }
0x2456   :  { %v2363_v22 = vsel %vm2359_vm8, %v2357_v0, %v2361_v7  ;;  %v2358_v55 = vadd.f32 %v2567_v6, %v2349_v21 }
0x2457   :  { %v2365_v23 = vsel %vm2313_vm7, %v2363_v22, 0.0 }
0x2458   :  { %2366 = vadd.xlane.f32.xlu1 %v2365_v23  ;;  %vm2360_vm9 = vcmp.ge.f32.partialorder %v2358_v55, 0.0  ;;  %v2362_v8 = vmul.f32 0.01, %v2358_v55 }
0x245a   :  { %v2364_v24 = vsel %vm2360_vm9, %v2358_v55, %v2362_v8 }
0x245b   :  { %v2368_v9 = vsel %vm2313_vm7, %v2364_v24, 0.0 }
0x245c   :  { %2369 = vadd.xlane.f32.xlu0 %v2368_v9 }
0x24e1   :  { %v2367_v28 = vpop.xlane.xlu1 %2366 }
0x24e2   :  { %v2371_v10 = vmul.f32 0.0625, %v2367_v28 }
0x24e4   :  { %v2373_v37 = vsub.f32 %v2363_v22, %v2371_v10 }
0x24e5   :  { %v2370_v34 = vpop.xlane.xlu0 %2369 }
0x24e6   :  { %v2372_v11 = vmul.f32 0.0625, %v2370_v34  ;;  %v2375_v12 = vmul.f32 %v2373_v37, %v2373_v37 }
0x24e8   :  { %v2374_v15 = vsub.f32 %v2364_v24, %v2372_v11  ;;  %v2377_v16 = vsel %vm2313_vm7, %v2375_v12, 0.0 }
0x24e9   :  { %2378 = vadd.xlane.f32.xlu1 %v2377_v16 }
0x24ea   :  { %v2376_v17 = vmul.f32 %v2374_v15, %v2374_v15 }
0x24ec   :  { %v2380_v18 = vsel %vm2313_vm7, %v2376_v17, 0.0 }
0x24ed   :  { %2381 = vadd.xlane.f32.xlu0 %v2380_v18 }
0x2572   :  { %v2379_v19 = vpop.xlane.xlu1 %2378 }
0x2573   :  { %v2383_v29 = vmul.f32 0.0625, %v2379_v19 }
0x2575   :  { %v2385_v25 = vadd.f32 1e-05, %v2383_v29 }
0x2576   :  { %v2382_v5 = vpop.xlane.xlu0 %2381 }
0x2577   :  { %2794 = vrsqrt.f32 %v2385_v25  ;;  %v2384_v26 = vmul.f32 0.0625, %v2382_v5 }
0x2579   :  { %v2386_v27 = vadd.f32 1e-05, %v2384_v26 }
0x257b   :  { %2796 = vrsqrt.f32 %v2386_v27 }
0x2584   :  { %v2795_v30 = vpop.eup %2794 }
0x2585   :  { %v2389_v33 = vmul.f32 %v2795_v30, %v2373_v37 }
0x2587   :  { %v2398_v36 = vmul.f32 %v2568_v31, %v2389_v33 }
0x2588   :  { %v2797_v38 = vpop.eup %2796 }
0x2589   :  { %v2407_v39 = vadd.f32 %v2569_v35, %v2398_v36  ;;  %v2390_v45 = vmul.f32 %v2797_v38, %v2374_v15 }
0x258b   :  { %2409 = vst.msk [vmem:[#allocation7] sm:$0xff] %vm2313_vm7, %v2407_v39  ;;  %v2399_v40 = vmul.f32 %v2568_v31, %v2390_v45 }
0x258d   :  { %v2408_v41 = vadd.f32 %v2569_v35, %v2399_v40 }
0x258f   :  { %2410 = vst.msk [vmem:[#allocation7 + $0x8] sm:$0xff] %vm2313_vm7, %v2408_v41 }
0x2592   :  { %v2414_v47 = vld [vmem:[#allocation7 + $0x2] sm:$0x3]  ;;  %v2421_v42 = vld [vmem:[#allocation7 + $0x4] sm:$0x3]  ;;  %v2411_v48 = vld [vmem:[#allocation7] sm:$0x3] }
0x2593   :  { %2416 = vrot.lane.b32.xlu1 %v2414_v47, %s3070_s16  ;;  %2423 = vrot.lane.b32.xlu0 %v2421_v42, %s3071_s21  ;;  %2413 = vst.msk [vmem:[%s3796_s23] sm:$0x3] %vm2412_vm10, %v2411_v48  ;;  %v2428_v46 = vld [vmem:[#allocation7 + $0x6] sm:$0x3] }
0x2596   :  { %v2442_v49 = vld [vmem:[#allocation7 + $0xa] sm:$0x3]  ;;  %v2456_v43 = vld [vmem:[#allocation7 + $0xe] sm:$0x3]  ;;  %v2435_v50 = vld [vmem:[#allocation7 + $0x8] sm:$0x3] }
0x2597   :  { %2430 = vrot.lane.b32.xlu1 %v2428_v46, %s3072_s11  ;;  %2444 = vrot.lane.b32.xlu0 %v2442_v49, %s3073_s26  ;;  %v2449_v44 = vld [vmem:[#allocation7 + $0xc] sm:$0x3] }
0x259b   :  { %2458 = vrot.lane.b32.xlu0 %v2456_v43, %s3074_s6  ;;  %2437 = vrot.lane.b32.xlu1 %v2435_v50, %s3067_s0 }
0x259f   :  { %2451 = vrot.lane.b32.xlu1 %v2449_v44, %s3075_s14 }
0x2605   :  { %v2417_v51 = vpop.permute.xlu1 %2416  ;;  %v2424_v52 = vpop.permute.xlu0 %2423 }
0x2606   :  { %2420 = vst.msk [vmem:[%s3796_s23] sm:$0x3] %vm2419_vm11, %v2417_v51 }
0x2607   :  { %2427 = vst.msk [vmem:[%s3796_s23] sm:$0x3] %vm2426_vm12, %v2424_v52 }
0x2609   :  { %v2431_v53 = vpop.permute.xlu1 %2430  ;;  %v2445_v54 = vpop.permute.xlu0 %2444 }
0x260a   :  { %2434 = vst.msk [vmem:[%s3796_s23] sm:$0x3] %vm2433_vm13, %v2431_v53 }
0x260d   :  { %v2438_v32 = vpop.permute.xlu1 %2437  ;;  %v2459_v1 = vpop.permute.xlu0 %2458 }
0x260e   :  { %2441 = vst.msk [vmem:[%s3796_s23] sm:$0x3] %vm2440_vm14, %v2438_v32 }
0x260f   :  { %2448 = vst.msk [vmem:[%s3796_s23] sm:$0x3] %vm2447_vm15, %v2445_v54 }
0x2611   :  { %v2452_v4 = vpop.permute.xlu1 %2451 }
0x2612   :  { %2455 = vst.msk [vmem:[%s3796_s23] sm:$0x3] %vm2454_vm0, %v2452_v4 }
0x2613   :  { %2462 = vst.msk [vmem:[%s3796_s23] sm:$0x3] %vm2461_vm1, %v2459_v1 }
0x2614   :  { %2467 = vsyncpa [#allocation9], 1 }
0x2615   :  { %2468 = vsyncpa [#allocation11], 1 }
0x2616   :  { %2469 = vsyncpa [#allocation14], 1 }
0x2617   :  { %2470 = vsyncpa [#allocation17], 1 }
0x2618   :  { %2471 = vsyncpa [#allocation20], 1 }
0x2619   :  { %2472 = vsyncpa [#allocation23], 1 }
0x261a   :  { %2473 = vsyncpa [#allocation26], 1 }

</bundles_post_ra>
